<compile_context>
chip_gen: v7x
topology: tpu7x:2x2x1
jax: 0.10.0
libtpu: 0.0.40
codegen_flags: <defaults>
</compile_context>

<pallas_src>
import jax
import jax.numpy as jnp
from jax import lax
from jax.experimental import pallas as pl
from jax.experimental.pallas import tpu as pltpu


# ---------------------------------------------------------------------------
# Shared LSTM recurrence (encoder + decoder), used by both kernel variants.
# ---------------------------------------------------------------------------

def _lstm_step(pre_gates, h, c, whh_bf16, Hp):
    """One LSTM step (PyTorch gate order i,f,g,o).  MXU operands bf16, f32 acc;
    gate nonlinearities / elementwise math kept in f32 (v5e has no bf16 VPU/EUP)."""
    gates = pre_gates + jnp.dot(h.astype(jnp.bfloat16), whh_bf16,
                                preferred_element_type=jnp.float32)
    i = jax.nn.sigmoid(gates[:, 0 * Hp:1 * Hp])
    f = jax.nn.sigmoid(gates[:, 1 * Hp:2 * Hp])
    g = jnp.tanh(gates[:, 2 * Hp:3 * Hp])
    o = jax.nn.sigmoid(gates[:, 3 * Hp:4 * Hp])
    c_new = f * c + i * g
    h_new = o * jnp.tanh(c_new)
    return h_new, c_new


def _recurrence(tmax_ref, x_ref, y_ref, len_ref,
                wih_e_ref, whh_e_ref, b_e_ref,
                wih_d_ref, whh_d_ref, b_d_ref,
                hs_ref, xg_ref, yg_ref):
    T, Bb, Dp = x_ref.shape
    Hp = whh_e_ref.shape[0]

    # Hoisted input-side gate projections: two big bf16 MXU matmuls over all
    # timesteps at once; each recurrence step only does h @ whh + VPU gate math.
    x2d = x_ref[...].reshape(T * Bb, Dp).astype(jnp.bfloat16)
    y2d = y_ref[...].reshape(T * Bb, Dp).astype(jnp.bfloat16)
    xg_ref[...] = (jnp.dot(x2d, wih_e_ref[...], preferred_element_type=jnp.float32)
                   + b_e_ref[...]).reshape(T, Bb, 4 * Hp)
    yg_ref[...] = (jnp.dot(y2d, wih_d_ref[...], preferred_element_type=jnp.float32)
                   + b_d_ref[...]).reshape(T, Bb, 4 * Hp)

    # lengths loaded ONCE (no per-step VMEM load inside the loop body).
    len_col = len_ref[...]                              # (Bb, 1) int32
    h0 = jnp.zeros((Bb, Hp), jnp.float32)
    c0 = jnp.zeros((Bb, Hp), jnp.float32)

    # ---- Encoder: masked (packed-sequence) recurrence, bounded by max(lengths)
    # (scalar prefetched into SMEM); fully-masked tail steps are skipped.
    t_max = tmax_ref[0]

    def enc_step(t, carry):
        h, c = carry
        h_new, c_new = _lstm_step(xg_ref[t], h, c, whh_e_ref[...], Hp)
        mask = t < len_col                              # (Bb, 1) compare
        return (jnp.where(mask, h_new, h), jnp.where(mask, c_new, c))

    h_enc, c_enc = lax.fori_loop(0, t_max, enc_step, (h0, c0))

    # ---- Decoder: recurrence over embedded targets, init from encoder state.
    unroll = True if T <= 16 else 4                     # LLO scheduler visibility

    def dec_step(t, carry):
        h, c = carry
        h, c = _lstm_step(yg_ref[t], h, c, whh_d_ref[...], Hp)
        hs_ref[t, :, :] = h.astype(hs_ref.dtype)        # leading-axis, lane-dense
        return (h, c)

    lax.fori_loop(0, T, dec_step, (h_enc, c_enc), unroll=unroll)


def lstm_kernel(tmax_ref, x_ref, y_ref, len_ref,
                wih_e_ref, whh_e_ref, b_e_ref,
                wih_d_ref, whh_d_ref, b_d_ref,
                hs_ref, xg_ref, yg_ref):
    _recurrence(tmax_ref, x_ref, y_ref, len_ref,
                wih_e_ref, whh_e_ref, b_e_ref,
                wih_d_ref, whh_d_ref, b_d_ref,
                hs_ref, xg_ref, yg_ref)


def lstm_fused_kernel(tmax_ref, x_ref, y_ref, len_ref,
                      wih_e_ref, whh_e_ref, b_e_ref,
                      wih_d_ref, whh_d_ref, b_d_ref,
                      wout_ref, bout_ref,
                      out_ref, xg_ref, yg_ref, hs_ref):
    _recurrence(tmax_ref, x_ref, y_ref, len_ref,
                wih_e_ref, whh_e_ref, b_e_ref,
                wih_d_ref, whh_d_ref, b_d_ref,
                hs_ref, xg_ref, yg_ref)
    T, Bb, Hp = hs_ref.shape
    Vp = wout_ref.shape[1]
    # One big projection matmul over all decoder states (hs never leaves VMEM).
    hs2d = hs_ref[...].reshape(T * Bb, Hp).astype(jnp.bfloat16)
    out_ref[...] = (jnp.dot(hs2d, wout_ref[...], preferred_element_type=jnp.float32)
                    + bout_ref[...]).reshape(T, Bb, Vp)


# ---------------------------------------------------------------------------
# Fallback kernel 2: tiled vocab projection (vocab axis outermost in the grid).
# ---------------------------------------------------------------------------

def proj_kernel(hs_ref, w_ref, b_ref, out_ref):
    out_ref[...] = (jnp.dot(hs_ref[...].astype(jnp.bfloat16), w_ref[...],
                            preferred_element_type=jnp.float32)
                    + b_ref[...])


# ---------------------------------------------------------------------------
# Wrapper
# ---------------------------------------------------------------------------

def _round_up(x, m):
    return (x + m - 1) // m * m


def _choose_tile(total, candidates):
    for c in candidates:
        if total % c == 0:
            return c
    return total


def _pad_gate_cols(w, H, Hp):
    """(..., 4H) -> (..., 4Hp): pad each gate block (i,f,g,o) to Hp columns."""
    lead = w.shape[:-1]
    w4 = w.reshape(lead + (4, H))
    out = jnp.zeros(lead + (4, Hp), w.dtype).at[..., :H].set(w4)
    return out.reshape(lead + (4 * Hp,))


def _pad2d(w, shape):
    out = jnp.zeros(shape, w.dtype)
    return out.at[:w.shape[0], :w.shape[1]].set(w)


def _vmem_limit_bytes():
    """Per-generation VMEM request: spend 128 MiB chips' VMEM, leave v7x headroom."""
    try:
        kind = jax.devices()[0].device_kind.lower()
    except Exception:
        kind = ""
    if ("v5" in kind) or ("v6" in kind):
        return 100 * 1024 * 1024
    if "v7" in kind:
        return 56 * 1024 * 1024
    return None          # unknown chip: keep compiler default


def _k1_footprint(Bb, T, Dp, Hp, Vp, fused):
    """Rough VMEM bytes for one kernel-1 batch tile (inputs double-buffered)."""
    f32, bf16 = 4, 2
    b = 2 * (T * Bb * Dp * f32) * 2                               # x, y
    b += 2 * (T * Bb * 4 * Hp * f32)                              # xg, yg scratch
    b += 2 * ((Dp + Hp) * 4 * Hp * bf16 + 4 * Hp * f32) * 2       # weights + biases
    b += 6 * Bb * Hp * f32                                        # live h/c state
    if fused:
        b += (Hp * Vp * bf16 + Vp * f32) * 2                      # wout, bout
        b += (T * Bb * Vp * f32) * 2                              # logits out
        b += T * Bb * Hp * f32                                    # hs scratch
    else:
        b += (T * Bb * Hp * f32) * 2                              # hs out
    return b


def _pick_batch_tile(B, T, Dp, Hp, Vp, fused, budget):
    """Largest batch tile (multiple of 8) whose footprint fits the VMEM budget."""
    n = 1
    while True:
        Bb = _round_up(-(-B // n), 8)
        if Bb == 8 or _k1_footprint(Bb, T, Dp, Hp, Vp, fused) <= budget:
            return Bb, n
        n *= 2


def elmo_forward(params, inputs, lengths, targets):
    """inputs/targets: (B, T) int32 token ids, lengths: (B,) int32 -> (B, T, V)."""
    emb = params["embedding"].astype(jnp.float32)
    B, T = inputs.shape
    D = emb.shape[1]
    H = params["whh_e"].shape[0]
    V = params["wout"].shape[1]

    Dp = _round_up(D, 128)
    Hp = _round_up(H, 128)
    Vp = _round_up(V, 128)

    vmem_limit = _vmem_limit_bytes()
    budget = int(0.7 * (vmem_limit if vmem_limit is not None else 32 * 1024 * 1024))

    # Fuse the vocab projection into kernel 1 when wout (and a per-tile logits
    # block) comfortably fits in VMEM; otherwise use the separate tiled kernel.
    fuse_proj = ((Hp * Vp * 2 + Vp * 4) <= 4 * 1024 * 1024 and
                 (T * 8 * Vp * 4 * 2) <= 8 * 1024 * 1024)

    Bb, num_btiles = _pick_batch_tile(B, T, Dp, Hp, Vp, fuse_proj, budget)
    Bp = Bb * num_btiles

    # Embedding lookups (gathers) are glue — plain XLA.
    x_emb = jnp.take(emb, inputs, axis=0)           # (B, T, D)
    y_emb = jnp.take(emb, targets, axis=0)          # (B, T, D)

    # Time-major + padded: per-step access inside the kernel is a free
    # leading-axis offset.
    def to_time_major(a):
        return jnp.zeros((T, Bp, Dp), jnp.float32).at[:, :B, :D].set(
            jnp.transpose(a, (1, 0, 2)).astype(jnp.float32))

    x_tm = to_time_major(x_emb)
    y_tm = to_time_major(y_emb)
    len2d = jnp.zeros((Bp, 1), jnp.int32).at[:B, 0].set(lengths.astype(jnp.int32))
    # Encoder trip count = max(lengths) (clamped to T), prefetched into SMEM.
    tmax = jnp.minimum(jnp.max(lengths.astype(jnp.int32)), T).reshape((1,))

    # Weights bf16 (MXU operands, half the HBM/VMEM traffic); biases f32.
    # Gate columns padded per-gate so every gate slice is a whole lane tile.
    bf16 = jnp.bfloat16
    wih_e = _pad2d(_pad_gate_cols(params["wih_e"], H, Hp), (Dp, 4 * Hp)).astype(bf16)
    whh_e = _pad2d(_pad_gate_cols(params["whh_e"], H, Hp), (Hp, 4 * Hp)).astype(bf16)
    b_e = _pad_gate_cols(params["b_e"], H, Hp).astype(jnp.float32)
    wih_d = _pad2d(_pad_gate_cols(params["wih_d"], H, Hp), (Dp, 4 * Hp)).astype(bf16)
    whh_d = _pad2d(_pad_gate_cols(params["whh_d"], H, Hp), (Hp, 4 * Hp)).astype(bf16)
    b_d = _pad_gate_cols(params["b_d"], H, Hp).astype(jnp.float32)
    wout = _pad2d(params["wout"].astype(jnp.float32), (Hp, Vp)).astype(bf16)
    bout = _pad2d(params["bout"].astype(jnp.float32), (1, Vp))

    cp_kw = dict(dimension_semantics=("parallel",))
    if vmem_limit is not None:
        cp_kw["vmem_limit_bytes"] = vmem_limit

    common_in_specs = [
        pl.BlockSpec((T, Bb, Dp), lambda b, tm: (0, b, 0)),     # x (time-major)
        pl.BlockSpec((T, Bb, Dp), lambda b, tm: (0, b, 0)),     # y (time-major)
        pl.BlockSpec((Bb, 1), lambda b, tm: (b, 0)),            # lengths
        pl.BlockSpec((Dp, 4 * Hp), lambda b, tm: (0, 0)),       # wih_e
        pl.BlockSpec((Hp, 4 * Hp), lambda b, tm: (0, 0)),       # whh_e
        pl.BlockSpec((1, 4 * Hp), lambda b, tm: (0, 0)),        # b_e
        pl.BlockSpec((Dp, 4 * Hp), lambda b, tm: (0, 0)),       # wih_d
        pl.BlockSpec((Hp, 4 * Hp), lambda b, tm: (0, 0)),       # whh_d
        pl.BlockSpec((1, 4 * Hp), lambda b, tm: (0, 0)),        # b_d
    ]
    gate_scratch = [pltpu.VMEM((T, Bb, 4 * Hp), jnp.float32),   # X pre-gates
                    pltpu.VMEM((T, Bb, 4 * Hp), jnp.float32)]   # Y pre-gates

    if fuse_proj:
        # ---- Single fused kernel: recurrence + vocab projection. ----
        logits_tm = pl.pallas_call(
            lstm_fused_kernel,
            out_shape=jax.ShapeDtypeStruct((T, Bp, Vp), jnp.float32),
            grid_spec=pltpu.PrefetchScalarGridSpec(
                num_scalar_prefetch=1,
                grid=(num_btiles,),
                in_specs=common_in_specs + [
                    pl.BlockSpec((Hp, Vp), lambda b, tm: (0, 0)),   # wout
                    pl.BlockSpec((1, Vp), lambda b, tm: (0, 0)),    # bout
                ],
                out_specs=pl.BlockSpec((T, Bb, Vp), lambda b, tm: (0, b, 0)),
                scratch_shapes=gate_scratch + [pltpu.VMEM((T, Bb, Hp), jnp.float32)],
            ),
            compiler_params=pltpu.CompilerParams(**cp_kw),
        )(tmax, x_tm, y_tm, len2d, wih_e, whh_e, b_e, wih_d, whh_d, b_d, wout, bout)
        logits = logits_tm[:, :B, :V]
        return jnp.transpose(logits, (1, 0, 2))

    # ---- Two-kernel path: recurrence -> hs, then tiled vocab projection. ----
    hs = pl.pallas_call(
        lstm_kernel,
        out_shape=jax.ShapeDtypeStruct((T, Bp, Hp), jnp.float32),
        grid_spec=pltpu.PrefetchScalarGridSpec(
            num_scalar_prefetch=1,
            grid=(num_btiles,),
            in_specs=common_in_specs,
            out_specs=pl.BlockSpec((T, Bb, Hp), lambda b, tm: (0, b, 0)),
            scratch_shapes=gate_scratch,
        ),
        compiler_params=pltpu.CompilerParams(**cp_kw),
    )(tmax, x_tm, y_tm, len2d, wih_e, whh_e, b_e, wih_d, whh_d, b_d)

    Rp = T * Bp
    hs2d = hs.reshape(Rp, Hp)
    tr = _choose_tile(Rp, (512, 256, 128, 64, 32, 16, 8))
    tv = _choose_tile(Vp, (1024, 512, 256, 128))

    cp2_kw = dict(dimension_semantics=("parallel", "parallel"))
    if vmem_limit is not None:
        cp2_kw["vmem_limit_bytes"] = vmem_limit

    # Vocab axis OUTERMOST: each wout column tile is DMA'd exactly once while
    # the row tiles stream through it.
    logits2d = pl.pallas_call(
        proj_kernel,
        out_shape=jax.ShapeDtypeStruct((Rp, Vp), jnp.float32),
        grid_spec=pltpu.PrefetchScalarGridSpec(
            num_scalar_prefetch=0,
            grid=(Vp // tv, Rp // tr),
            in_specs=[
                pl.BlockSpec((tr, Hp), lambda j, i: (i, 0)),
                pl.BlockSpec((Hp, tv), lambda j, i: (0, j)),
                pl.BlockSpec((1, tv), lambda j, i: (0, j)),
            ],
            out_specs=pl.BlockSpec((tr, tv), lambda j, i: (i, j)),
        ),
        compiler_params=pltpu.CompilerParams(**cp2_kw),
    )(hs2d, wout, bout)

    logits = logits2d.reshape(T, Bp, Vp)[:, :B, :V]
    return jnp.transpose(logits, (1, 0, 2))


# ---------------------------------------------------------------------------
# Pure-JAX reference (same semantics) and parameter init
# ---------------------------------------------------------------------------

def elmo_reference(params, inputs, lengths, targets):
    emb = params["embedding"]
    x = jnp.take(emb, inputs, axis=0).astype(jnp.float32)
    y = jnp.take(emb, targets, axis=0).astype(jnp.float32)
    B, T, _ = x.shape
    H = params["whh_e"].shape[0]
    hi = lax.Precision.HIGHEST

    def cell(x_t, h, c, wih, whh, b):
        g = (jnp.dot(x_t, wih, precision=hi) + jnp.dot(h, whh, precision=hi) + b)
        i = jax.nn.sigmoid(g[:, 0 * H:1 * H])
        f = jax.nn.sigmoid(g[:, 1 * H:2 * H])
        gg = jnp.tanh(g[:, 2 * H:3 * H])
        o = jax.nn.sigmoid(g[:, 3 * H:4 * H])
        c = f * c + i * gg
        return o * jnp.tanh(c), c

    h = jnp.zeros((B, H), jnp.float32)
    c = jnp.zeros((B, H), jnp.float32)
    for t in range(T):
        hn, cn = cell(x[:, t], h, c, params["wih_e"], params["whh_e"], params["b_e"])
        m = (t < lengths)[:, None]
        h = jnp.where(m, hn, h)
        c = jnp.where(m, cn, c)
    outs = []
    for t in range(T):
        h, c = cell(y[:, t], h, c, params["wih_d"], params["whh_d"], params["b_d"])
        outs.append(jnp.dot(h, params["wout"], precision=hi) + params["bout"])
    return jnp.stack(outs, axis=1)                    # (B, T, V)


def init_params(key, input_size, hidden_size, vocab_size):
    D, H, V = input_size, hidden_size, vocab_size
    keys = jax.random.split(key, 10)
    s = 0.1
    return {
        "embedding": s * jax.random.normal(keys[0], (V, D), jnp.float32),
        "wih_e": s * jax.random.normal(keys[1], (D, 4 * H), jnp.float32),
        "whh_e": s * jax.random.normal(keys[2], (H, 4 * H), jnp.float32),
        "b_e":   s * jax.random.normal(keys[3], (1, 4 * H), jnp.float32),
        "wih_d": s * jax.random.normal(keys[4], (D, 4 * H), jnp.float32),
        "whh_d": s * jax.random.normal(keys[5], (H, 4 * H), jnp.float32),
        "b_d":   s * jax.random.normal(keys[6], (1, 4 * H), jnp.float32),
        "wout":  s * jax.random.normal(keys[7], (H, V), jnp.float32),
        "bout":  s * jax.random.normal(keys[8], (1, V), jnp.float32),
    }


if __name__ == "__main__":
    # Small shapes consistent with the module's __init__ arguments.
    input_size = 32       # embedding dim
    hidden_size = 32      # LSTM hidden dim
    max_len = 8           # sequence length
    vocab_size = 64
    sentiment_size = 3    # unused by this forward path (discarded by `h, _, _`)
    batch = 2

    key = jax.random.PRNGKey(0)
    kp, ki, kt = jax.random.split(key, 3)

    params = init_params(kp, input_size, hidden_size, vocab_size)
    inputs = jax.random.randint(ki, (batch, max_len), 0, vocab_size, jnp.int32)
    targets = jax.random.randint(kt, (batch, max_len), 0, vocab_size, jnp.int32)
    lengths = jnp.array([max_len, max_len - 3], dtype=jnp.int32)

    out = jax.block_until_ready(elmo_forward(params, inputs, lengths, targets))
    ref = jax.block_until_ready(elmo_reference(params, inputs, lengths, targets))

    assert out.shape == (batch, max_len, vocab_size)
    assert bool(jnp.all(jnp.isfinite(out)))
    max_err = float(jnp.max(jnp.abs(out - ref)))
    assert max_err < 1e-2, f"mismatch vs reference, max abs err = {max_err}"
    print("KERNEL_OK")
</pallas_src>

<mosaic_0001>
module attributes {stable_mosaic.version = 11 : i64} {
  func.func @lstm_fused_kernel(%arg0: i32, %arg1: memref<1xi32, #tpu.memory_space<smem>>, %arg2: memref<8x8x128xf32, #tpu.memory_space<vmem>>, %arg3: memref<8x8x128xf32, #tpu.memory_space<vmem>>, %arg4: memref<8x1xi32, #tpu.memory_space<vmem>>, %arg5: memref<128x512xbf16, #tpu.memory_space<vmem>>, %arg6: memref<128x512xbf16, #tpu.memory_space<vmem>>, %arg7: memref<1x512xf32, #tpu.memory_space<vmem>>, %arg8: memref<128x512xbf16, #tpu.memory_space<vmem>>, %arg9: memref<128x512xbf16, #tpu.memory_space<vmem>>, %arg10: memref<1x512xf32, #tpu.memory_space<vmem>>, %arg11: memref<128x128xbf16, #tpu.memory_space<vmem>>, %arg12: memref<1x128xf32, #tpu.memory_space<vmem>>, %arg13: memref<8x8x128xf32, #tpu.memory_space<vmem>>, %arg14: memref<8x8x512xf32, #tpu.memory_space<vmem>>, %arg15: memref<8x8x512xf32, #tpu.memory_space<vmem>>, %arg16: memref<8x8x128xf32, #tpu.memory_space<vmem>>) attributes {dimension_semantics = [#tpu.dimension_semantics<parallel>], iteration_bounds = array<i64: 1>, scalar_prefetch = 1 : i64, scratch_operands = 3 : i64, tpu.core_type = #tpu.core_type<tc>, window_params = [{transform_indices = @transform_0, window_bounds = array<i64: 8, 8, 128>}, {transform_indices = @transform_1, window_bounds = array<i64: 8, 8, 128>}, {transform_indices = @transform_2, window_bounds = array<i64: 8, 1>}, {pipeline_mode = #tpu.pipeline_mode<synchronous>, transform_indices = @transform_3, window_bounds = array<i64: 128, 512>}, {pipeline_mode = #tpu.pipeline_mode<synchronous>, transform_indices = @transform_4, window_bounds = array<i64: 128, 512>}, {pipeline_mode = #tpu.pipeline_mode<synchronous>, transform_indices = @transform_5, window_bounds = array<i64: 1, 512>}, {pipeline_mode = #tpu.pipeline_mode<synchronous>, transform_indices = @transform_6, window_bounds = array<i64: 128, 512>}, {pipeline_mode = #tpu.pipeline_mode<synchronous>, transform_indices = @transform_7, window_bounds = array<i64: 128, 512>}, {pipeline_mode = #tpu.pipeline_mode<synchronous>, transform_indices = @transform_8, window_bounds = array<i64: 1, 512>}, {pipeline_mode = #tpu.pipeline_mode<synchronous>, transform_indices = @transform_9, window_bounds = array<i64: 128, 128>}, {pipeline_mode = #tpu.pipeline_mode<synchronous>, transform_indices = @transform_10, window_bounds = array<i64: 1, 128>}, {transform_indices = @transform_11, window_bounds = array<i64: 8, 8, 128>}]} {
    %c0 = arith.constant 0 : index
    %c0_0 = arith.constant 0 : index
    %c0_1 = arith.constant 0 : index
    %0 = vector.load %arg2[%c0, %c0_0, %c0_1] : memref<8x8x128xf32, #tpu.memory_space<vmem>>, vector<8x8x128xf32>
    %1 = vector.shape_cast %0 : vector<8x8x128xf32> to vector<64x128xf32>
    %2 = arith.truncf %1 : vector<64x128xf32> to vector<64x128xbf16>
    %c0_2 = arith.constant 0 : index
    %c0_3 = arith.constant 0 : index
    %c0_4 = arith.constant 0 : index
    %3 = vector.load %arg3[%c0_2, %c0_3, %c0_4] : memref<8x8x128xf32, #tpu.memory_space<vmem>>, vector<8x8x128xf32>
    %4 = vector.shape_cast %3 : vector<8x8x128xf32> to vector<64x128xf32>
    %5 = arith.truncf %4 : vector<64x128xf32> to vector<64x128xbf16>
    %c0_5 = arith.constant 0 : index
    %c0_6 = arith.constant 0 : index
    %6 = vector.load %arg5[%c0_5, %c0_6] : memref<128x512xbf16, #tpu.memory_space<vmem>>, vector<128x512xbf16>
    %cst = arith.constant dense<0.000000e+00> : vector<64x512xf32>
    %7 = tpu.matmul %2, %6, %cst {dimension_numbers = #tpu.dot_dimension_numbers<[1], [0], [0], [1], [0, 0, 1, 1], [], []>} : vector<64x128xbf16>, vector<128x512xbf16>, vector<64x512xf32> -> vector<64x512xf32>
    %c0_7 = arith.constant 0 : index
    %c0_8 = arith.constant 0 : index
    %8 = vector.load %arg7[%c0_7, %c0_8] : memref<1x512xf32, #tpu.memory_space<vmem>>, vector<1x512xf32>
    %9 = vector.broadcast %8 : vector<1x512xf32> to vector<64x512xf32>
    %10 = arith.addf %7, %9 : vector<64x512xf32>
    %11 = vector.shape_cast %10 : vector<64x512xf32> to vector<8x8x512xf32>
    %c0_9 = arith.constant 0 : index
    %c0_10 = arith.constant 0 : index
    %c0_11 = arith.constant 0 : index
    %12 = vector.load %arg14[%c0_9, %c0_10, %c0_11] : memref<8x8x512xf32, #tpu.memory_space<vmem>>, vector<8x8x512xf32>
    tpu.vector_store %arg14[%c0_9, %c0_10, %c0_11], %11 {strides = array<i32>} : memref<8x8x512xf32, #tpu.memory_space<vmem>>, vector<8x8x512xf32>,
    %c0_12 = arith.constant 0 : index
    %c0_13 = arith.constant 0 : index
    %13 = vector.load %arg8[%c0_12, %c0_13] : memref<128x512xbf16, #tpu.memory_space<vmem>>, vector<128x512xbf16>
    %cst_14 = arith.constant dense<0.000000e+00> : vector<64x512xf32>
    %14 = tpu.matmul %5, %13, %cst_14 {dimension_numbers = #tpu.dot_dimension_numbers<[1], [0], [0], [1], [0, 0, 1, 1], [], []>} : vector<64x128xbf16>, vector<128x512xbf16>, vector<64x512xf32> -> vector<64x512xf32>
    %c0_15 = arith.constant 0 : index
    %c0_16 = arith.constant 0 : index
    %15 = vector.load %arg10[%c0_15, %c0_16] : memref<1x512xf32, #tpu.memory_space<vmem>>, vector<1x512xf32>
    %16 = vector.broadcast %15 : vector<1x512xf32> to vector<64x512xf32>
    %17 = arith.addf %14, %16 : vector<64x512xf32>
    %18 = vector.shape_cast %17 : vector<64x512xf32> to vector<8x8x512xf32>
    %c0_17 = arith.constant 0 : index
    %c0_18 = arith.constant 0 : index
    %c0_19 = arith.constant 0 : index
    %19 = vector.load %arg15[%c0_17, %c0_18, %c0_19] : memref<8x8x512xf32, #tpu.memory_space<vmem>>, vector<8x8x512xf32>
    tpu.vector_store %arg15[%c0_17, %c0_18, %c0_19], %18 {strides = array<i32>} : memref<8x8x512xf32, #tpu.memory_space<vmem>>, vector<8x8x512xf32>,
    %c0_20 = arith.constant 0 : index
    %c0_21 = arith.constant 0 : index
    %20 = vector.load %arg4[%c0_20, %c0_21] : memref<8x1xi32, #tpu.memory_space<vmem>>, vector<8x1xi32>
    %cst_22 = arith.constant 0.000000e+00 : f32
    %21 = vector.broadcast %cst_22 : f32 to vector<8x128xf32>
    %cst_23 = arith.constant 0.000000e+00 : f32
    %22 = vector.broadcast %cst_23 : f32 to vector<8x128xf32>
    %c0_24 = arith.constant 0 : index
    %23 = memref.load %arg1[%c0_24] : memref<1xi32, #tpu.memory_space<smem>>
    %c0_i32 = arith.constant 0 : i32
    %24 = arith.subi %23, %c0_i32 : i32
    %25 = arith.addi %c0_i32, %24 : i32
    %c1_i32 = arith.constant 1 : i32
    %26:2 = scf.for %arg17 = %c0_i32 to %25 step %c1_i32 iter_args(%arg18 = %21, %arg19 = %22) -> (vector<8x128xf32>, vector<8x128xf32>)  : i32 {
      %325 = arith.index_cast %arg17 : i32 to index
      %c0_118 = arith.constant 0 : index
      %c0_119 = arith.constant 0 : index
      %326 = vector.load %arg14[%325, %c0_118, %c0_119] : memref<8x8x512xf32, #tpu.memory_space<vmem>>, vector<1x8x512xf32>
      %327 = vector.shape_cast %326 : vector<1x8x512xf32> to vector<8x512xf32>
      %c0_120 = arith.constant 0 : index
      %c0_121 = arith.constant 0 : index
      %328 = vector.load %arg6[%c0_120, %c0_121] : memref<128x512xbf16, #tpu.memory_space<vmem>>, vector<128x512xbf16>
      %329 = arith.truncf %arg18 : vector<8x128xf32> to vector<8x128xbf16>
      %cst_122 = arith.constant dense<0.000000e+00> : vector<8x512xf32>
      %330 = tpu.matmul %329, %328, %cst_122 {dimension_numbers = #tpu.dot_dimension_numbers<[1], [0], [0], [1], [0, 0, 1, 1], [], []>} : vector<8x128xbf16>, vector<128x512xbf16>, vector<8x512xf32> -> vector<8x512xf32>
      %331 = arith.addf %327, %330 : vector<8x512xf32>
      %332 = vector.extract_strided_slice %331 {offsets = [0, 0], sizes = [8, 128], strides = [1, 1]} : vector<8x512xf32> to vector<8x128xf32>
      %333 = arith.negf %332 : vector<8x128xf32>
      %334 = math.exp %333 : vector<8x128xf32>
      %cst_123 = arith.constant 1.000000e+00 : f32
      %335 = vector.broadcast %cst_123 : f32 to vector<8x128xf32>
      %336 = arith.addf %335, %334 : vector<8x128xf32>
      %337 = arith.divf %335, %336 : vector<8x128xf32>
      %338 = vector.extract_strided_slice %331 {offsets = [0, 128], sizes = [8, 128], strides = [1, 1]} : vector<8x512xf32> to vector<8x128xf32>
      %339 = arith.negf %338 : vector<8x128xf32>
      %340 = math.exp %339 : vector<8x128xf32>
      %cst_124 = arith.constant 1.000000e+00 : f32
      %341 = vector.broadcast %cst_124 : f32 to vector<8x128xf32>
      %342 = arith.addf %341, %340 : vector<8x128xf32>
      %343 = arith.divf %341, %342 : vector<8x128xf32>
      %344 = vector.extract_strided_slice %331 {offsets = [0, 256], sizes = [8, 128], strides = [1, 1]} : vector<8x512xf32> to vector<8x128xf32>
      %345 = math.tanh %344 : vector<8x128xf32>
      %346 = vector.extract_strided_slice %331 {offsets = [0, 384], sizes = [8, 128], strides = [1, 1]} : vector<8x512xf32> to vector<8x128xf32>
      %347 = arith.negf %346 : vector<8x128xf32>
      %348 = math.exp %347 : vector<8x128xf32>
      %cst_125 = arith.constant 1.000000e+00 : f32
      %349 = vector.broadcast %cst_125 : f32 to vector<8x128xf32>
      %350 = arith.addf %349, %348 : vector<8x128xf32>
      %351 = arith.divf %349, %350 : vector<8x128xf32>
      %352 = arith.mulf %343, %arg19 : vector<8x128xf32>
      %353 = arith.mulf %337, %345 : vector<8x128xf32>
      %354 = arith.addf %352, %353 : vector<8x128xf32>
      %355 = math.tanh %354 : vector<8x128xf32>
      %356 = arith.mulf %351, %355 : vector<8x128xf32>
      %357 = vector.broadcast %arg17 : i32 to vector<8x1xi32>
      %358 = arith.cmpi slt, %357, %20 : vector<8x1xi32>
      %359 = vector.shape_cast %358 : vector<8x1xi1> to vector<8x1xi1>
      %360 = vector.broadcast %359 : vector<8x1xi1> to vector<8x128xi1>
      %361 = arith.select %360, %356, %arg18 : vector<8x128xi1>, vector<8x128xf32>
      %362 = vector.shape_cast %358 : vector<8x1xi1> to vector<8x1xi1>
      %363 = vector.broadcast %362 : vector<8x1xi1> to vector<8x128xi1>
      %364 = arith.select %363, %354, %arg19 : vector<8x128xi1>, vector<8x128xf32>
      scf.yield %361, %364 : vector<8x128xf32>, vector<8x128xf32>
    }
    %c0_i32_25 = arith.constant 0 : i32
    %27 = arith.index_cast %c0_i32_25 : i32 to index
    %c0_26 = arith.constant 0 : index
    %c0_27 = arith.constant 0 : index
    %28 = vector.load %arg15[%27, %c0_26, %c0_27] : memref<8x8x512xf32, #tpu.memory_space<vmem>>, vector<1x8x512xf32>
    %29 = vector.shape_cast %28 : vector<1x8x512xf32> to vector<8x512xf32>
    %c0_28 = arith.constant 0 : index
    %c0_29 = arith.constant 0 : index
    %30 = vector.load %arg9[%c0_28, %c0_29] : memref<128x512xbf16, #tpu.memory_space<vmem>>, vector<128x512xbf16>
    %31 = arith.truncf %26#0 : vector<8x128xf32> to vector<8x128xbf16>
    %cst_30 = arith.constant dense<0.000000e+00> : vector<8x512xf32>
    %32 = tpu.matmul %31, %30, %cst_30 {dimension_numbers = #tpu.dot_dimension_numbers<[1], [0], [0], [1], [0, 0, 1, 1], [], []>} : vector<8x128xbf16>, vector<128x512xbf16>, vector<8x512xf32> -> vector<8x512xf32>
    %33 = arith.addf %29, %32 : vector<8x512xf32>
    %34 = vector.extract_strided_slice %33 {offsets = [0, 0], sizes = [8, 128], strides = [1, 1]} : vector<8x512xf32> to vector<8x128xf32>
    %35 = arith.negf %34 : vector<8x128xf32>
    %36 = math.exp %35 : vector<8x128xf32>
    %cst_31 = arith.constant 1.000000e+00 : f32
    %37 = vector.broadcast %cst_31 : f32 to vector<8x128xf32>
    %38 = arith.addf %37, %36 : vector<8x128xf32>
    %39 = arith.divf %37, %38 : vector<8x128xf32>
    %40 = vector.extract_strided_slice %33 {offsets = [0, 128], sizes = [8, 128], strides = [1, 1]} : vector<8x512xf32> to vector<8x128xf32>
    %41 = arith.negf %40 : vector<8x128xf32>
    %42 = math.exp %41 : vector<8x128xf32>
    %cst_32 = arith.constant 1.000000e+00 : f32
    %43 = vector.broadcast %cst_32 : f32 to vector<8x128xf32>
    %44 = arith.addf %43, %42 : vector<8x128xf32>
    %45 = arith.divf %43, %44 : vector<8x128xf32>
    %46 = vector.extract_strided_slice %33 {offsets = [0, 256], sizes = [8, 128], strides = [1, 1]} : vector<8x512xf32> to vector<8x128xf32>
    %47 = math.tanh %46 : vector<8x128xf32>
    %48 = vector.extract_strided_slice %33 {offsets = [0, 384], sizes = [8, 128], strides = [1, 1]} : vector<8x512xf32> to vector<8x128xf32>
    %49 = arith.negf %48 : vector<8x128xf32>
    %50 = math.exp %49 : vector<8x128xf32>
    %cst_33 = arith.constant 1.000000e+00 : f32
    %51 = vector.broadcast %cst_33 : f32 to vector<8x128xf32>
    %52 = arith.addf %51, %50 : vector<8x128xf32>
    %53 = arith.divf %51, %52 : vector<8x128xf32>
    %54 = arith.mulf %45, %26#1 : vector<8x128xf32>
    %55 = arith.mulf %39, %47 : vector<8x128xf32>
    %56 = arith.addf %54, %55 : vector<8x128xf32>
    %57 = math.tanh %56 : vector<8x128xf32>
    %58 = arith.mulf %53, %57 : vector<8x128xf32>
    %59 = arith.index_cast %c0_i32_25 : i32 to index
    %c0_34 = arith.constant 0 : index
    %c0_35 = arith.constant 0 : index
    %60 = vector.load %arg16[%59, %c0_34, %c0_35] : memref<8x8x128xf32, #tpu.memory_space<vmem>>, vector<1x8x128xf32>
    %61 = vector.shape_cast %60 : vector<1x8x128xf32> to vector<8x128xf32>
    %62 = vector.shape_cast %58 : vector<8x128xf32> to vector<1x8x128xf32>
    tpu.vector_store %arg16[%59, %c0_34, %c0_35], %62 {strides = array<i32>} : memref<8x8x128xf32, #tpu.memory_space<vmem>>, vector<1x8x128xf32>,
    %c1_i32_36 = arith.constant 1 : i32
    %63 = arith.index_cast %c1_i32_36 : i32 to index
    %c0_37 = arith.constant 0 : index
    %c0_38 = arith.constant 0 : index
    %64 = vector.load %arg15[%63, %c0_37, %c0_38] : memref<8x8x512xf32, #tpu.memory_space<vmem>>, vector<1x8x512xf32>
    %65 = vector.shape_cast %64 : vector<1x8x512xf32> to vector<8x512xf32>
    %c0_39 = arith.constant 0 : index
    %c0_40 = arith.constant 0 : index
    %66 = vector.load %arg9[%c0_39, %c0_40] : memref<128x512xbf16, #tpu.memory_space<vmem>>, vector<128x512xbf16>
    %67 = arith.truncf %58 : vector<8x128xf32> to vector<8x128xbf16>
    %cst_41 = arith.constant dense<0.000000e+00> : vector<8x512xf32>
    %68 = tpu.matmul %67, %66, %cst_41 {dimension_numbers = #tpu.dot_dimension_numbers<[1], [0], [0], [1], [0, 0, 1, 1], [], []>} : vector<8x128xbf16>, vector<128x512xbf16>, vector<8x512xf32> -> vector<8x512xf32>
    %69 = arith.addf %65, %68 : vector<8x512xf32>
    %70 = vector.extract_strided_slice %69 {offsets = [0, 0], sizes = [8, 128], strides = [1, 1]} : vector<8x512xf32> to vector<8x128xf32>
    %71 = arith.negf %70 : vector<8x128xf32>
    %72 = math.exp %71 : vector<8x128xf32>
    %cst_42 = arith.constant 1.000000e+00 : f32
    %73 = vector.broadcast %cst_42 : f32 to vector<8x128xf32>
    %74 = arith.addf %73, %72 : vector<8x128xf32>
    %75 = arith.divf %73, %74 : vector<8x128xf32>
    %76 = vector.extract_strided_slice %69 {offsets = [0, 128], sizes = [8, 128], strides = [1, 1]} : vector<8x512xf32> to vector<8x128xf32>
    %77 = arith.negf %76 : vector<8x128xf32>
    %78 = math.exp %77 : vector<8x128xf32>
    %cst_43 = arith.constant 1.000000e+00 : f32
    %79 = vector.broadcast %cst_43 : f32 to vector<8x128xf32>
    %80 = arith.addf %79, %78 : vector<8x128xf32>
    %81 = arith.divf %79, %80 : vector<8x128xf32>
    %82 = vector.extract_strided_slice %69 {offsets = [0, 256], sizes = [8, 128], strides = [1, 1]} : vector<8x512xf32> to vector<8x128xf32>
    %83 = math.tanh %82 : vector<8x128xf32>
    %84 = vector.extract_strided_slice %69 {offsets = [0, 384], sizes = [8, 128], strides = [1, 1]} : vector<8x512xf32> to vector<8x128xf32>
    %85 = arith.negf %84 : vector<8x128xf32>
    %86 = math.exp %85 : vector<8x128xf32>
    %cst_44 = arith.constant 1.000000e+00 : f32
    %87 = vector.broadcast %cst_44 : f32 to vector<8x128xf32>
    %88 = arith.addf %87, %86 : vector<8x128xf32>
    %89 = arith.divf %87, %88 : vector<8x128xf32>
    %90 = arith.mulf %81, %56 : vector<8x128xf32>
    %91 = arith.mulf %75, %83 : vector<8x128xf32>
    %92 = arith.addf %90, %91 : vector<8x128xf32>
    %93 = math.tanh %92 : vector<8x128xf32>
    %94 = arith.mulf %89, %93 : vector<8x128xf32>
    %95 = arith.index_cast %c1_i32_36 : i32 to index
    %c0_45 = arith.constant 0 : index
    %c0_46 = arith.constant 0 : index
    %96 = vector.load %arg16[%95, %c0_45, %c0_46] : memref<8x8x128xf32, #tpu.memory_space<vmem>>, vector<1x8x128xf32>
    %97 = vector.shape_cast %96 : vector<1x8x128xf32> to vector<8x128xf32>
    %98 = vector.shape_cast %94 : vector<8x128xf32> to vector<1x8x128xf32>
    tpu.vector_store %arg16[%95, %c0_45, %c0_46], %98 {strides = array<i32>} : memref<8x8x128xf32, #tpu.memory_space<vmem>>, vector<1x8x128xf32>,
    %c2_i32 = arith.constant 2 : i32
    %99 = arith.index_cast %c2_i32 : i32 to index
    %c0_47 = arith.constant 0 : index
    %c0_48 = arith.constant 0 : index
    %100 = vector.load %arg15[%99, %c0_47, %c0_48] : memref<8x8x512xf32, #tpu.memory_space<vmem>>, vector<1x8x512xf32>
    %101 = vector.shape_cast %100 : vector<1x8x512xf32> to vector<8x512xf32>
    %c0_49 = arith.constant 0 : index
    %c0_50 = arith.constant 0 : index
    %102 = vector.load %arg9[%c0_49, %c0_50] : memref<128x512xbf16, #tpu.memory_space<vmem>>, vector<128x512xbf16>
    %103 = arith.truncf %94 : vector<8x128xf32> to vector<8x128xbf16>
    %cst_51 = arith.constant dense<0.000000e+00> : vector<8x512xf32>
    %104 = tpu.matmul %103, %102, %cst_51 {dimension_numbers = #tpu.dot_dimension_numbers<[1], [0], [0], [1], [0, 0, 1, 1], [], []>} : vector<8x128xbf16>, vector<128x512xbf16>, vector<8x512xf32> -> vector<8x512xf32>
    %105 = arith.addf %101, %104 : vector<8x512xf32>
    %106 = vector.extract_strided_slice %105 {offsets = [0, 0], sizes = [8, 128], strides = [1, 1]} : vector<8x512xf32> to vector<8x128xf32>
    %107 = arith.negf %106 : vector<8x128xf32>
    %108 = math.exp %107 : vector<8x128xf32>
    %cst_52 = arith.constant 1.000000e+00 : f32
    %109 = vector.broadcast %cst_52 : f32 to vector<8x128xf32>
    %110 = arith.addf %109, %108 : vector<8x128xf32>
    %111 = arith.divf %109, %110 : vector<8x128xf32>
    %112 = vector.extract_strided_slice %105 {offsets = [0, 128], sizes = [8, 128], strides = [1, 1]} : vector<8x512xf32> to vector<8x128xf32>
    %113 = arith.negf %112 : vector<8x128xf32>
    %114 = math.exp %113 : vector<8x128xf32>
    %cst_53 = arith.constant 1.000000e+00 : f32
    %115 = vector.broadcast %cst_53 : f32 to vector<8x128xf32>
    %116 = arith.addf %115, %114 : vector<8x128xf32>
    %117 = arith.divf %115, %116 : vector<8x128xf32>
    %118 = vector.extract_strided_slice %105 {offsets = [0, 256], sizes = [8, 128], strides = [1, 1]} : vector<8x512xf32> to vector<8x128xf32>
    %119 = math.tanh %118 : vector<8x128xf32>
    %120 = vector.extract_strided_slice %105 {offsets = [0, 384], sizes = [8, 128], strides = [1, 1]} : vector<8x512xf32> to vector<8x128xf32>
    %121 = arith.negf %120 : vector<8x128xf32>
    %122 = math.exp %121 : vector<8x128xf32>
    %cst_54 = arith.constant 1.000000e+00 : f32
    %123 = vector.broadcast %cst_54 : f32 to vector<8x128xf32>
    %124 = arith.addf %123, %122 : vector<8x128xf32>
    %125 = arith.divf %123, %124 : vector<8x128xf32>
    %126 = arith.mulf %117, %92 : vector<8x128xf32>
    %127 = arith.mulf %111, %119 : vector<8x128xf32>
    %128 = arith.addf %126, %127 : vector<8x128xf32>
    %129 = math.tanh %128 : vector<8x128xf32>
    %130 = arith.mulf %125, %129 : vector<8x128xf32>
    %131 = arith.index_cast %c2_i32 : i32 to index
    %c0_55 = arith.constant 0 : index
    %c0_56 = arith.constant 0 : index
    %132 = vector.load %arg16[%131, %c0_55, %c0_56] : memref<8x8x128xf32, #tpu.memory_space<vmem>>, vector<1x8x128xf32>
    %133 = vector.shape_cast %132 : vector<1x8x128xf32> to vector<8x128xf32>
    %134 = vector.shape_cast %130 : vector<8x128xf32> to vector<1x8x128xf32>
    tpu.vector_store %arg16[%131, %c0_55, %c0_56], %134 {strides = array<i32>} : memref<8x8x128xf32, #tpu.memory_space<vmem>>, vector<1x8x128xf32>,
    %c3_i32 = arith.constant 3 : i32
    %135 = arith.index_cast %c3_i32 : i32 to index
    %c0_57 = arith.constant 0 : index
    %c0_58 = arith.constant 0 : index
    %136 = vector.load %arg15[%135, %c0_57, %c0_58] : memref<8x8x512xf32, #tpu.memory_space<vmem>>, vector<1x8x512xf32>
    %137 = vector.shape_cast %136 : vector<1x8x512xf32> to vector<8x512xf32>
    %c0_59 = arith.constant 0 : index
    %c0_60 = arith.constant 0 : index
    %138 = vector.load %arg9[%c0_59, %c0_60] : memref<128x512xbf16, #tpu.memory_space<vmem>>, vector<128x512xbf16>
    %139 = arith.truncf %130 : vector<8x128xf32> to vector<8x128xbf16>
    %cst_61 = arith.constant dense<0.000000e+00> : vector<8x512xf32>
    %140 = tpu.matmul %139, %138, %cst_61 {dimension_numbers = #tpu.dot_dimension_numbers<[1], [0], [0], [1], [0, 0, 1, 1], [], []>} : vector<8x128xbf16>, vector<128x512xbf16>, vector<8x512xf32> -> vector<8x512xf32>
    %141 = arith.addf %137, %140 : vector<8x512xf32>
    %142 = vector.extract_strided_slice %141 {offsets = [0, 0], sizes = [8, 128], strides = [1, 1]} : vector<8x512xf32> to vector<8x128xf32>
    %143 = arith.negf %142 : vector<8x128xf32>
    %144 = math.exp %143 : vector<8x128xf32>
    %cst_62 = arith.constant 1.000000e+00 : f32
    %145 = vector.broadcast %cst_62 : f32 to vector<8x128xf32>
    %146 = arith.addf %145, %144 : vector<8x128xf32>
    %147 = arith.divf %145, %146 : vector<8x128xf32>
    %148 = vector.extract_strided_slice %141 {offsets = [0, 128], sizes = [8, 128], strides = [1, 1]} : vector<8x512xf32> to vector<8x128xf32>
    %149 = arith.negf %148 : vector<8x128xf32>
    %150 = math.exp %149 : vector<8x128xf32>
    %cst_63 = arith.constant 1.000000e+00 : f32
    %151 = vector.broadcast %cst_63 : f32 to vector<8x128xf32>
    %152 = arith.addf %151, %150 : vector<8x128xf32>
    %153 = arith.divf %151, %152 : vector<8x128xf32>
    %154 = vector.extract_strided_slice %141 {offsets = [0, 256], sizes = [8, 128], strides = [1, 1]} : vector<8x512xf32> to vector<8x128xf32>
    %155 = math.tanh %154 : vector<8x128xf32>
    %156 = vector.extract_strided_slice %141 {offsets = [0, 384], sizes = [8, 128], strides = [1, 1]} : vector<8x512xf32> to vector<8x128xf32>
    %157 = arith.negf %156 : vector<8x128xf32>
    %158 = math.exp %157 : vector<8x128xf32>
    %cst_64 = arith.constant 1.000000e+00 : f32
    %159 = vector.broadcast %cst_64 : f32 to vector<8x128xf32>
    %160 = arith.addf %159, %158 : vector<8x128xf32>
    %161 = arith.divf %159, %160 : vector<8x128xf32>
    %162 = arith.mulf %153, %128 : vector<8x128xf32>
    %163 = arith.mulf %147, %155 : vector<8x128xf32>
    %164 = arith.addf %162, %163 : vector<8x128xf32>
    %165 = math.tanh %164 : vector<8x128xf32>
    %166 = arith.mulf %161, %165 : vector<8x128xf32>
    %167 = arith.index_cast %c3_i32 : i32 to index
    %c0_65 = arith.constant 0 : index
    %c0_66 = arith.constant 0 : index
    %168 = vector.load %arg16[%167, %c0_65, %c0_66] : memref<8x8x128xf32, #tpu.memory_space<vmem>>, vector<1x8x128xf32>
    %169 = vector.shape_cast %168 : vector<1x8x128xf32> to vector<8x128xf32>
    %170 = vector.shape_cast %166 : vector<8x128xf32> to vector<1x8x128xf32>
    tpu.vector_store %arg16[%167, %c0_65, %c0_66], %170 {strides = array<i32>} : memref<8x8x128xf32, #tpu.memory_space<vmem>>, vector<1x8x128xf32>,
    %c4_i32 = arith.constant 4 : i32
    %171 = arith.index_cast %c4_i32 : i32 to index
    %c0_67 = arith.constant 0 : index
    %c0_68 = arith.constant 0 : index
    %172 = vector.load %arg15[%171, %c0_67, %c0_68] : memref<8x8x512xf32, #tpu.memory_space<vmem>>, vector<1x8x512xf32>
    %173 = vector.shape_cast %172 : vector<1x8x512xf32> to vector<8x512xf32>
    %c0_69 = arith.constant 0 : index
    %c0_70 = arith.constant 0 : index
    %174 = vector.load %arg9[%c0_69, %c0_70] : memref<128x512xbf16, #tpu.memory_space<vmem>>, vector<128x512xbf16>
    %175 = arith.truncf %166 : vector<8x128xf32> to vector<8x128xbf16>
    %cst_71 = arith.constant dense<0.000000e+00> : vector<8x512xf32>
    %176 = tpu.matmul %175, %174, %cst_71 {dimension_numbers = #tpu.dot_dimension_numbers<[1], [0], [0], [1], [0, 0, 1, 1], [], []>} : vector<8x128xbf16>, vector<128x512xbf16>, vector<8x512xf32> -> vector<8x512xf32>
    %177 = arith.addf %173, %176 : vector<8x512xf32>
    %178 = vector.extract_strided_slice %177 {offsets = [0, 0], sizes = [8, 128], strides = [1, 1]} : vector<8x512xf32> to vector<8x128xf32>
    %179 = arith.negf %178 : vector<8x128xf32>
    %180 = math.exp %179 : vector<8x128xf32>
    %cst_72 = arith.constant 1.000000e+00 : f32
    %181 = vector.broadcast %cst_72 : f32 to vector<8x128xf32>
    %182 = arith.addf %181, %180 : vector<8x128xf32>
    %183 = arith.divf %181, %182 : vector<8x128xf32>
    %184 = vector.extract_strided_slice %177 {offsets = [0, 128], sizes = [8, 128], strides = [1, 1]} : vector<8x512xf32> to vector<8x128xf32>
    %185 = arith.negf %184 : vector<8x128xf32>
    %186 = math.exp %185 : vector<8x128xf32>
    %cst_73 = arith.constant 1.000000e+00 : f32
    %187 = vector.broadcast %cst_73 : f32 to vector<8x128xf32>
    %188 = arith.addf %187, %186 : vector<8x128xf32>
    %189 = arith.divf %187, %188 : vector<8x128xf32>
    %190 = vector.extract_strided_slice %177 {offsets = [0, 256], sizes = [8, 128], strides = [1, 1]} : vector<8x512xf32> to vector<8x128xf32>
    %191 = math.tanh %190 : vector<8x128xf32>
    %192 = vector.extract_strided_slice %177 {offsets = [0, 384], sizes = [8, 128], strides = [1, 1]} : vector<8x512xf32> to vector<8x128xf32>
    %193 = arith.negf %192 : vector<8x128xf32>
    %194 = math.exp %193 : vector<8x128xf32>
    %cst_74 = arith.constant 1.000000e+00 : f32
    %195 = vector.broadcast %cst_74 : f32 to vector<8x128xf32>
    %196 = arith.addf %195, %194 : vector<8x128xf32>
    %197 = arith.divf %195, %196 : vector<8x128xf32>
    %198 = arith.mulf %189, %164 : vector<8x128xf32>
    %199 = arith.mulf %183, %191 : vector<8x128xf32>
    %200 = arith.addf %198, %199 : vector<8x128xf32>
    %201 = math.tanh %200 : vector<8x128xf32>
    %202 = arith.mulf %197, %201 : vector<8x128xf32>
    %203 = arith.index_cast %c4_i32 : i32 to index
    %c0_75 = arith.constant 0 : index
    %c0_76 = arith.constant 0 : index
    %204 = vector.load %arg16[%203, %c0_75, %c0_76] : memref<8x8x128xf32, #tpu.memory_space<vmem>>, vector<1x8x128xf32>
    %205 = vector.shape_cast %204 : vector<1x8x128xf32> to vector<8x128xf32>
    %206 = vector.shape_cast %202 : vector<8x128xf32> to vector<1x8x128xf32>
    tpu.vector_store %arg16[%203, %c0_75, %c0_76], %206 {strides = array<i32>} : memref<8x8x128xf32, #tpu.memory_space<vmem>>, vector<1x8x128xf32>,
    %c5_i32 = arith.constant 5 : i32
    %207 = arith.index_cast %c5_i32 : i32 to index
    %c0_77 = arith.constant 0 : index
    %c0_78 = arith.constant 0 : index
    %208 = vector.load %arg15[%207, %c0_77, %c0_78] : memref<8x8x512xf32, #tpu.memory_space<vmem>>, vector<1x8x512xf32>
    %209 = vector.shape_cast %208 : vector<1x8x512xf32> to vector<8x512xf32>
    %c0_79 = arith.constant 0 : index
    %c0_80 = arith.constant 0 : index
    %210 = vector.load %arg9[%c0_79, %c0_80] : memref<128x512xbf16, #tpu.memory_space<vmem>>, vector<128x512xbf16>
    %211 = arith.truncf %202 : vector<8x128xf32> to vector<8x128xbf16>
    %cst_81 = arith.constant dense<0.000000e+00> : vector<8x512xf32>
    %212 = tpu.matmul %211, %210, %cst_81 {dimension_numbers = #tpu.dot_dimension_numbers<[1], [0], [0], [1], [0, 0, 1, 1], [], []>} : vector<8x128xbf16>, vector<128x512xbf16>, vector<8x512xf32> -> vector<8x512xf32>
    %213 = arith.addf %209, %212 : vector<8x512xf32>
    %214 = vector.extract_strided_slice %213 {offsets = [0, 0], sizes = [8, 128], strides = [1, 1]} : vector<8x512xf32> to vector<8x128xf32>
    %215 = arith.negf %214 : vector<8x128xf32>
    %216 = math.exp %215 : vector<8x128xf32>
    %cst_82 = arith.constant 1.000000e+00 : f32
    %217 = vector.broadcast %cst_82 : f32 to vector<8x128xf32>
    %218 = arith.addf %217, %216 : vector<8x128xf32>
    %219 = arith.divf %217, %218 : vector<8x128xf32>
    %220 = vector.extract_strided_slice %213 {offsets = [0, 128], sizes = [8, 128], strides = [1, 1]} : vector<8x512xf32> to vector<8x128xf32>
    %221 = arith.negf %220 : vector<8x128xf32>
    %222 = math.exp %221 : vector<8x128xf32>
    %cst_83 = arith.constant 1.000000e+00 : f32
    %223 = vector.broadcast %cst_83 : f32 to vector<8x128xf32>
    %224 = arith.addf %223, %222 : vector<8x128xf32>
    %225 = arith.divf %223, %224 : vector<8x128xf32>
    %226 = vector.extract_strided_slice %213 {offsets = [0, 256], sizes = [8, 128], strides = [1, 1]} : vector<8x512xf32> to vector<8x128xf32>
    %227 = math.tanh %226 : vector<8x128xf32>
    %228 = vector.extract_strided_slice %213 {offsets = [0, 384], sizes = [8, 128], strides = [1, 1]} : vector<8x512xf32> to vector<8x128xf32>
    %229 = arith.negf %228 : vector<8x128xf32>
    %230 = math.exp %229 : vector<8x128xf32>
    %cst_84 = arith.constant 1.000000e+00 : f32
    %231 = vector.broadcast %cst_84 : f32 to vector<8x128xf32>
    %232 = arith.addf %231, %230 : vector<8x128xf32>
    %233 = arith.divf %231, %232 : vector<8x128xf32>
    %234 = arith.mulf %225, %200 : vector<8x128xf32>
    %235 = arith.mulf %219, %227 : vector<8x128xf32>
    %236 = arith.addf %234, %235 : vector<8x128xf32>
    %237 = math.tanh %236 : vector<8x128xf32>
    %238 = arith.mulf %233, %237 : vector<8x128xf32>
    %239 = arith.index_cast %c5_i32 : i32 to index
    %c0_85 = arith.constant 0 : index
    %c0_86 = arith.constant 0 : index
    %240 = vector.load %arg16[%239, %c0_85, %c0_86] : memref<8x8x128xf32, #tpu.memory_space<vmem>>, vector<1x8x128xf32>
    %241 = vector.shape_cast %240 : vector<1x8x128xf32> to vector<8x128xf32>
    %242 = vector.shape_cast %238 : vector<8x128xf32> to vector<1x8x128xf32>
    tpu.vector_store %arg16[%239, %c0_85, %c0_86], %242 {strides = array<i32>} : memref<8x8x128xf32, #tpu.memory_space<vmem>>, vector<1x8x128xf32>,
    %c6_i32 = arith.constant 6 : i32
    %243 = arith.index_cast %c6_i32 : i32 to index
    %c0_87 = arith.constant 0 : index
    %c0_88 = arith.constant 0 : index
    %244 = vector.load %arg15[%243, %c0_87, %c0_88] : memref<8x8x512xf32, #tpu.memory_space<vmem>>, vector<1x8x512xf32>
    %245 = vector.shape_cast %244 : vector<1x8x512xf32> to vector<8x512xf32>
    %c0_89 = arith.constant 0 : index
    %c0_90 = arith.constant 0 : index
    %246 = vector.load %arg9[%c0_89, %c0_90] : memref<128x512xbf16, #tpu.memory_space<vmem>>, vector<128x512xbf16>
    %247 = arith.truncf %238 : vector<8x128xf32> to vector<8x128xbf16>
    %cst_91 = arith.constant dense<0.000000e+00> : vector<8x512xf32>
    %248 = tpu.matmul %247, %246, %cst_91 {dimension_numbers = #tpu.dot_dimension_numbers<[1], [0], [0], [1], [0, 0, 1, 1], [], []>} : vector<8x128xbf16>, vector<128x512xbf16>, vector<8x512xf32> -> vector<8x512xf32>
    %249 = arith.addf %245, %248 : vector<8x512xf32>
    %250 = vector.extract_strided_slice %249 {offsets = [0, 0], sizes = [8, 128], strides = [1, 1]} : vector<8x512xf32> to vector<8x128xf32>
    %251 = arith.negf %250 : vector<8x128xf32>
    %252 = math.exp %251 : vector<8x128xf32>
    %cst_92 = arith.constant 1.000000e+00 : f32
    %253 = vector.broadcast %cst_92 : f32 to vector<8x128xf32>
    %254 = arith.addf %253, %252 : vector<8x128xf32>
    %255 = arith.divf %253, %254 : vector<8x128xf32>
    %256 = vector.extract_strided_slice %249 {offsets = [0, 128], sizes = [8, 128], strides = [1, 1]} : vector<8x512xf32> to vector<8x128xf32>
    %257 = arith.negf %256 : vector<8x128xf32>
    %258 = math.exp %257 : vector<8x128xf32>
    %cst_93 = arith.constant 1.000000e+00 : f32
    %259 = vector.broadcast %cst_93 : f32 to vector<8x128xf32>
    %260 = arith.addf %259, %258 : vector<8x128xf32>
    %261 = arith.divf %259, %260 : vector<8x128xf32>
    %262 = vector.extract_strided_slice %249 {offsets = [0, 256], sizes = [8, 128], strides = [1, 1]} : vector<8x512xf32> to vector<8x128xf32>
    %263 = math.tanh %262 : vector<8x128xf32>
    %264 = vector.extract_strided_slice %249 {offsets = [0, 384], sizes = [8, 128], strides = [1, 1]} : vector<8x512xf32> to vector<8x128xf32>
    %265 = arith.negf %264 : vector<8x128xf32>
    %266 = math.exp %265 : vector<8x128xf32>
    %cst_94 = arith.constant 1.000000e+00 : f32
    %267 = vector.broadcast %cst_94 : f32 to vector<8x128xf32>
    %268 = arith.addf %267, %266 : vector<8x128xf32>
    %269 = arith.divf %267, %268 : vector<8x128xf32>
    %270 = arith.mulf %261, %236 : vector<8x128xf32>
    %271 = arith.mulf %255, %263 : vector<8x128xf32>
    %272 = arith.addf %270, %271 : vector<8x128xf32>
    %273 = math.tanh %272 : vector<8x128xf32>
    %274 = arith.mulf %269, %273 : vector<8x128xf32>
    %275 = arith.index_cast %c6_i32 : i32 to index
    %c0_95 = arith.constant 0 : index
    %c0_96 = arith.constant 0 : index
    %276 = vector.load %arg16[%275, %c0_95, %c0_96] : memref<8x8x128xf32, #tpu.memory_space<vmem>>, vector<1x8x128xf32>
    %277 = vector.shape_cast %276 : vector<1x8x128xf32> to vector<8x128xf32>
    %278 = vector.shape_cast %274 : vector<8x128xf32> to vector<1x8x128xf32>
    tpu.vector_store %arg16[%275, %c0_95, %c0_96], %278 {strides = array<i32>} : memref<8x8x128xf32, #tpu.memory_space<vmem>>, vector<1x8x128xf32>,
    %c7_i32 = arith.constant 7 : i32
    %279 = arith.index_cast %c7_i32 : i32 to index
    %c0_97 = arith.constant 0 : index
    %c0_98 = arith.constant 0 : index
    %280 = vector.load %arg15[%279, %c0_97, %c0_98] : memref<8x8x512xf32, #tpu.memory_space<vmem>>, vector<1x8x512xf32>
    %281 = vector.shape_cast %280 : vector<1x8x512xf32> to vector<8x512xf32>
    %c0_99 = arith.constant 0 : index
    %c0_100 = arith.constant 0 : index
    %282 = vector.load %arg9[%c0_99, %c0_100] : memref<128x512xbf16, #tpu.memory_space<vmem>>, vector<128x512xbf16>
    %283 = arith.truncf %274 : vector<8x128xf32> to vector<8x128xbf16>
    %cst_101 = arith.constant dense<0.000000e+00> : vector<8x512xf32>
    %284 = tpu.matmul %283, %282, %cst_101 {dimension_numbers = #tpu.dot_dimension_numbers<[1], [0], [0], [1], [0, 0, 1, 1], [], []>} : vector<8x128xbf16>, vector<128x512xbf16>, vector<8x512xf32> -> vector<8x512xf32>
    %285 = arith.addf %281, %284 : vector<8x512xf32>
    %286 = vector.extract_strided_slice %285 {offsets = [0, 0], sizes = [8, 128], strides = [1, 1]} : vector<8x512xf32> to vector<8x128xf32>
    %287 = arith.negf %286 : vector<8x128xf32>
    %288 = math.exp %287 : vector<8x128xf32>
    %cst_102 = arith.constant 1.000000e+00 : f32
    %289 = vector.broadcast %cst_102 : f32 to vector<8x128xf32>
    %290 = arith.addf %289, %288 : vector<8x128xf32>
    %291 = arith.divf %289, %290 : vector<8x128xf32>
    %292 = vector.extract_strided_slice %285 {offsets = [0, 128], sizes = [8, 128], strides = [1, 1]} : vector<8x512xf32> to vector<8x128xf32>
    %293 = arith.negf %292 : vector<8x128xf32>
    %294 = math.exp %293 : vector<8x128xf32>
    %cst_103 = arith.constant 1.000000e+00 : f32
    %295 = vector.broadcast %cst_103 : f32 to vector<8x128xf32>
    %296 = arith.addf %295, %294 : vector<8x128xf32>
    %297 = arith.divf %295, %296 : vector<8x128xf32>
    %298 = vector.extract_strided_slice %285 {offsets = [0, 256], sizes = [8, 128], strides = [1, 1]} : vector<8x512xf32> to vector<8x128xf32>
    %299 = math.tanh %298 : vector<8x128xf32>
    %300 = vector.extract_strided_slice %285 {offsets = [0, 384], sizes = [8, 128], strides = [1, 1]} : vector<8x512xf32> to vector<8x128xf32>
    %301 = arith.negf %300 : vector<8x128xf32>
    %302 = math.exp %301 : vector<8x128xf32>
    %cst_104 = arith.constant 1.000000e+00 : f32
    %303 = vector.broadcast %cst_104 : f32 to vector<8x128xf32>
    %304 = arith.addf %303, %302 : vector<8x128xf32>
    %305 = arith.divf %303, %304 : vector<8x128xf32>
    %306 = arith.mulf %297, %272 : vector<8x128xf32>
    %307 = arith.mulf %291, %299 : vector<8x128xf32>
    %308 = arith.addf %306, %307 : vector<8x128xf32>
    %309 = math.tanh %308 : vector<8x128xf32>
    %310 = arith.mulf %305, %309 : vector<8x128xf32>
    %311 = arith.index_cast %c7_i32 : i32 to index
    %c0_105 = arith.constant 0 : index
    %c0_106 = arith.constant 0 : index
    %312 = vector.load %arg16[%311, %c0_105, %c0_106] : memref<8x8x128xf32, #tpu.memory_space<vmem>>, vector<1x8x128xf32>
    %313 = vector.shape_cast %312 : vector<1x8x128xf32> to vector<8x128xf32>
    %314 = vector.shape_cast %310 : vector<8x128xf32> to vector<1x8x128xf32>
    tpu.vector_store %arg16[%311, %c0_105, %c0_106], %314 {strides = array<i32>} : memref<8x8x128xf32, #tpu.memory_space<vmem>>, vector<1x8x128xf32>,
    %c8_i32 = arith.constant 8 : i32
    %c0_107 = arith.constant 0 : index
    %c0_108 = arith.constant 0 : index
    %c0_109 = arith.constant 0 : index
    %315 = vector.load %arg16[%c0_107, %c0_108, %c0_109] : memref<8x8x128xf32, #tpu.memory_space<vmem>>, vector<8x8x128xf32>
    %316 = vector.shape_cast %315 : vector<8x8x128xf32> to vector<64x128xf32>
    %317 = arith.truncf %316 : vector<64x128xf32> to vector<64x128xbf16>
    %c0_110 = arith.constant 0 : index
    %c0_111 = arith.constant 0 : index
    %318 = vector.load %arg11[%c0_110, %c0_111] : memref<128x128xbf16, #tpu.memory_space<vmem>>, vector<128x128xbf16>
    %cst_112 = arith.constant dense<0.000000e+00> : vector<64x128xf32>
    %319 = tpu.matmul %317, %318, %cst_112 {dimension_numbers = #tpu.dot_dimension_numbers<[1], [0], [0], [1], [0, 0, 1, 1], [], []>} : vector<64x128xbf16>, vector<128x128xbf16>, vector<64x128xf32> -> vector<64x128xf32>
    %c0_113 = arith.constant 0 : index
    %c0_114 = arith.constant 0 : index
    %320 = vector.load %arg12[%c0_113, %c0_114] : memref<1x128xf32, #tpu.memory_space<vmem>>, vector<1x128xf32>
    %321 = vector.broadcast %320 : vector<1x128xf32> to vector<64x128xf32>
    %322 = arith.addf %319, %321 : vector<64x128xf32>
    %323 = vector.shape_cast %322 : vector<64x128xf32> to vector<8x8x128xf32>
    %c0_115 = arith.constant 0 : index
    %c0_116 = arith.constant 0 : index
    %c0_117 = arith.constant 0 : index
    %324 = vector.load %arg13[%c0_115, %c0_116, %c0_117] : memref<8x8x128xf32, #tpu.memory_space<vmem>>, vector<8x8x128xf32>
    tpu.vector_store %arg13[%c0_115, %c0_116, %c0_117], %323 {strides = array<i32>} : memref<8x8x128xf32, #tpu.memory_space<vmem>>, vector<8x8x128xf32>,
    return
  }
  func.func @transform_0(%arg0: i32, %arg1: memref<1xi32, #tpu.memory_space<smem>>) -> (i32, i32, i32) {
    %c0_i32 = arith.constant 0 : i32
    %c0_i32_0 = arith.constant 0 : i32
    %c0_i32_1 = arith.constant 0 : i32
    return %c0_i32, %arg0, %c0_i32_0 : i32, i32, i32
  }
  func.func @transform_1(%arg0: i32, %arg1: memref<1xi32, #tpu.memory_space<smem>>) -> (i32, i32, i32) {
    %c0_i32 = arith.constant 0 : i32
    %c0_i32_0 = arith.constant 0 : i32
    %c0_i32_1 = arith.constant 0 : i32
    return %c0_i32, %arg0, %c0_i32_0 : i32, i32, i32
  }
  func.func @transform_2(%arg0: i32, %arg1: memref<1xi32, #tpu.memory_space<smem>>) -> (i32, i32) {
    %c0_i32 = arith.constant 0 : i32
    %c0_i32_0 = arith.constant 0 : i32
    return %arg0, %c0_i32 : i32, i32
  }
  func.func @transform_3(%arg0: i32, %arg1: memref<1xi32, #tpu.memory_space<smem>>) -> (i32, i32) {
    %c0_i32 = arith.constant 0 : i32
    %c0_i32_0 = arith.constant 0 : i32
    %c0_i32_1 = arith.constant 0 : i32
    return %c0_i32, %c0_i32_0 : i32, i32
  }
  func.func @transform_4(%arg0: i32, %arg1: memref<1xi32, #tpu.memory_space<smem>>) -> (i32, i32) {
    %c0_i32 = arith.constant 0 : i32
    %c0_i32_0 = arith.constant 0 : i32
    %c0_i32_1 = arith.constant 0 : i32
    return %c0_i32, %c0_i32_0 : i32, i32
  }
  func.func @transform_5(%arg0: i32, %arg1: memref<1xi32, #tpu.memory_space<smem>>) -> (i32, i32) {
    %c0_i32 = arith.constant 0 : i32
    %c0_i32_0 = arith.constant 0 : i32
    %c0_i32_1 = arith.constant 0 : i32
    return %c0_i32, %c0_i32_0 : i32, i32
  }
  func.func @transform_6(%arg0: i32, %arg1: memref<1xi32, #tpu.memory_space<smem>>) -> (i32, i32) {
    %c0_i32 = arith.constant 0 : i32
    %c0_i32_0 = arith.constant 0 : i32
    %c0_i32_1 = arith.constant 0 : i32
    return %c0_i32, %c0_i32_0 : i32, i32
  }
  func.func @transform_7(%arg0: i32, %arg1: memref<1xi32, #tpu.memory_space<smem>>) -> (i32, i32) {
    %c0_i32 = arith.constant 0 : i32
    %c0_i32_0 = arith.constant 0 : i32
    %c0_i32_1 = arith.constant 0 : i32
    return %c0_i32, %c0_i32_0 : i32, i32
  }
  func.func @transform_8(%arg0: i32, %arg1: memref<1xi32, #tpu.memory_space<smem>>) -> (i32, i32) {
    %c0_i32 = arith.constant 0 : i32
    %c0_i32_0 = arith.constant 0 : i32
    %c0_i32_1 = arith.constant 0 : i32
    return %c0_i32, %c0_i32_0 : i32, i32
  }
  func.func @transform_9(%arg0: i32, %arg1: memref<1xi32, #tpu.memory_space<smem>>) -> (i32, i32) {
    %c0_i32 = arith.constant 0 : i32
    %c0_i32_0 = arith.constant 0 : i32
    %c0_i32_1 = arith.constant 0 : i32
    return %c0_i32, %c0_i32_0 : i32, i32
  }
  func.func @transform_10(%arg0: i32, %arg1: memref<1xi32, #tpu.memory_space<smem>>) -> (i32, i32) {
    %c0_i32 = arith.constant 0 : i32
    %c0_i32_0 = arith.constant 0 : i32
    %c0_i32_1 = arith.constant 0 : i32
    return %c0_i32, %c0_i32_0 : i32, i32
  }
  func.func @transform_11(%arg0: i32, %arg1: memref<1xi32, #tpu.memory_space<smem>>) -> (i32, i32, i32) {
    %c0_i32 = arith.constant 0 : i32
    %c0_i32_0 = arith.constant 0 : i32
    %c0_i32_1 = arith.constant 0 : i32
    return %c0_i32, %arg0, %c0_i32_0 : i32, i32, i32
  }
}

</mosaic_0001>

<bundles_post_ra>
// kernel: tpu_custom_call.1
= control target key start
LH: loop header
LB: loop body
LE: loop exit
PB: predicated region body
PF: predicated region fallthrough
CT: control target
= control target key end

     0   :  { %18 = vsyncpa [#allocation8], 0  ;;  %s5886_s0 = inlined_call_operand.<no memory space> [shape: s32[1], index: 0, kind: input, shape index: {}]   ;;  %s5887_s1 = inlined_call_operand.hbm [shape: f32[8,8,128], index: 1, kind: input, shape index: {}]   ;;  %s5888_s2 = inlined_call_operand.hbm [shape: f32[8,8,128], index: 2, kind: input, shape index: {}]   ;;  %s5889_s3 = inlined_call_operand.vmem [shape: s32[8,1], index: 3, kind: input, shape index: {}]   ;;  %s5890_s4 = inlined_call_operand.hbm [shape: bf16[128,512], index: 4, kind: input, shape index: {}]   ;;  %s5891_s5 = inlined_call_operand.hbm [shape: bf16[128,512], index: 5, kind: input, shape index: {}]   ;;  %s5892_s6 = inlined_call_operand.vmem [shape: f32[1,512], index: 6, kind: input, shape index: {}]   ;;  %s5893_s7 = inlined_call_operand.hbm [shape: bf16[128,512], index: 7, kind: input, shape index: {}]   ;;  %s5894_s8 = inlined_call_operand.hbm [shape: bf16[128,512], index: 8, kind: input, shape index: {}]   ;;  %s5895_s9 = inlined_call_operand.vmem [shape: f32[1,512], index: 9, kind: input, shape index: {}]   ;;  %s5896_s10 = inlined_call_operand.hbm [shape: bf16[128,128], index: 10, kind: input, shape index: {}]   ;;  %s5897_s11 = inlined_call_operand.vmem [shape: f32[1,128], index: 11, kind: input, shape index: {}]   ;;  %s5898_s12 = inlined_call_operand.hbm [shape: f32[8,8,128], index: 12, kind: output, shape index: {}]  }
   0x1   :  { %19 = vsyncpa [#allocation11], 0 }
   0x2   :  { %20 = vsyncpa [#allocation14], 0 }
   0x3   :  { %21 = vsyncpa [#allocation17], 0 }
   0x4   :  { %22 = vsyncpa [#allocation9], 0  ;;  %s5044_s21 = smov [#allocation10]   ;;  %s4818_s25 = scalar_lea.hbm %s5888_s2, 1024 }
   0x5   :  { %s40_s22 = sshll.u32 %s5044_s21, 4  ;;  %p4819_p0 = scmp.ne.s32.totalorder %s5888_s2, %s4818_s25  ;;  %s41_s22 = int_to_ptr.vmem [resolvable:$true] %s40_s22 }
   0x6   :  { %p4822_p1 = scmp.lt.u32.totalorder %s4818_s25, %s5888_s2 }
   0x8   :  { %p4824_p2 = pnand %p4822_p1, %p4819_p0 }
   0xa   :  { %4827 = shalt.err (!%p4824_p2)
}
   0xb   :  { %s4828_s30 = scalar_lea.vmem %s41_s22, 1024  ;;  %p4833_p4 = scmp.lt.s32.totalorder %s41_s22, %s41_s22 }
   0xc   :  { %p4829_p3 = scmp.ne.s32.totalorder %s41_s22, %s4828_s30  ;;  %p4834_p5 = scmp.lt.s32.totalorder %s4828_s30, %s4828_s30 }
   0xe   :  { %p4835_p6 = por %p4834_p5, %p4833_p4 }
  0x10   :  { %p4836_p7 = pnand %p4835_p6, %p4829_p3 }
  0x12   :  { %4839 = shalt.err (!%p4836_p7)
}
  0x13   :  { %s5045_s13 = smov 128   ;;  %s5046_s14 = smov 8  }
  0x14   :  { %46 = dma.hbm_to_vmem [thread:$0]  %s5888_s2, 1024, %s41_s22, [#allocation11], %s5045_s13, %s5045_s13, %s5046_s14  }
  0x15   :  { %s5047_s17 = smov [#allocation13]   ;;  %s5048_s19 = smov [#allocation16]  }
  0x16   :  { %s66_s18 = sshll.u32 %s5047_s17, 4  ;;  %s92_s20 = sshll.u32 %s5048_s19, 4  ;;  %s67_s18 = int_to_ptr.vmem [resolvable:$true] %s66_s18  ;;  %s93_s20 = int_to_ptr.vmem [resolvable:$true] %s92_s20 }
  0x17   :  { %s4840_s24 = scalar_lea.hbm %s5891_s5, 4096 }
  0x18   :  { %p4841_p8 = scmp.ne.s32.totalorder %s5891_s5, %s4840_s24  ;;  %p4844_p9 = scmp.lt.u32.totalorder %s4840_s24, %s5891_s5 }
  0x1a   :  { %p4846_p10 = pnand %p4844_p9, %p4841_p8 }
  0x1c   :  { %4849 = shalt.err (!%p4846_p10)
}
  0x1d   :  { %s4850_s2 = scalar_lea.vmem %s67_s18, 4096  ;;  %p4855_p12 = scmp.lt.s32.totalorder %s67_s18, %s67_s18 }
  0x1e   :  { %p4851_p11 = scmp.ne.s32.totalorder %s67_s18, %s4850_s2  ;;  %p4856_p13 = scmp.lt.s32.totalorder %s4850_s2, %s4850_s2 }
  0x20   :  { %p4857_p0 = por %p4856_p13, %p4855_p12 }
  0x22   :  { %p4858_p1 = pnand %p4857_p0, %p4851_p11 }
  0x24   :  { %4861 = shalt.err (!%p4858_p1)
}
  0x25   :  { %s5049_s22 = smov 256   ;;  %s5050_s29 = smov 16  }
  0x26   :  { %72 = dma.hbm_to_vmem [thread:$0]  %s5891_s5, 4096, %s67_s18, [#allocation14], %s5049_s22, %s5049_s22, %s5050_s29  }
  0x27   :  { %s4862_s19 = scalar_lea.hbm %s5894_s8, 4096 }
  0x28   :  { %p4863_p2 = scmp.ne.s32.totalorder %s5894_s8, %s4862_s19  ;;  %p4866_p3 = scmp.lt.u32.totalorder %s4862_s19, %s5894_s8 }
  0x2a   :  { %p4868_p4 = pnand %p4866_p3, %p4863_p2 }
  0x2c   :  { %4871 = shalt.err (!%p4868_p4)
}
  0x2d   :  { %s4872_s26 = scalar_lea.vmem %s93_s20, 4096  ;;  %p4877_p6 = scmp.lt.s32.totalorder %s93_s20, %s93_s20 }
  0x2e   :  { %p4873_p5 = scmp.ne.s32.totalorder %s93_s20, %s4872_s26  ;;  %p4878_p7 = scmp.lt.s32.totalorder %s4872_s26, %s4872_s26 }
  0x30   :  { %p4879_p8 = por %p4878_p7, %p4877_p6 }
  0x32   :  { %p4880_p9 = pnand %p4879_p8, %p4873_p5 }
  0x34   :  { %4883 = shalt.err (!%p4880_p9)
}
  0x35   :  { %98 = dma.hbm_to_vmem [thread:$0]  %s5894_s8, 4096, %s93_s20, [#allocation17], %s5049_s22, %s5049_s22, %s5050_s29  }
  0x36   :  { %s5051_s27 = smov [#allocation7]   ;;  %s5052_s2 = smov [#allocation12]  }
  0x37   :  { %s28_s28 = sshll.u32 %s5051_s27, 4  ;;  %s54_s30 = sshll.u32 %s5052_s2, 4  ;;  %s29_s28 = int_to_ptr.vmem [resolvable:$true] %s28_s28  ;;  %s55_s30 = int_to_ptr.vmem [resolvable:$true] %s54_s30 }
  0x38   :  { %s4884_s17 = scalar_lea.hbm %s5887_s1, 1024 }
  0x39   :  { %p4885_p10 = scmp.ne.s32.totalorder %s5887_s1, %s4884_s17  ;;  %p4888_p11 = scmp.lt.u32.totalorder %s4884_s17, %s5887_s1 }
  0x3b   :  { %p4890_p12 = pnand %p4888_p11, %p4885_p10 }
  0x3d   :  { %4893 = shalt.err (!%p4890_p12)
}
  0x3e   :  { %s4894_s8 = scalar_lea.vmem %s29_s28, 1024  ;;  %p4899_p0 = scmp.lt.s32.totalorder %s29_s28, %s29_s28 }
  0x3f   :  { %p4895_p13 = scmp.ne.s32.totalorder %s29_s28, %s4894_s8  ;;  %p4900_p1 = scmp.lt.s32.totalorder %s4894_s8, %s4894_s8 }
  0x41   :  { %p4901_p2 = por %p4900_p1, %p4899_p0 }
  0x43   :  { %p4902_p3 = pnand %p4901_p2, %p4895_p13 }
  0x45   :  { %4905 = shalt.err (!%p4902_p3)
}
  0x46   :  { %34 = dma.hbm_to_vmem [thread:$0]  %s5887_s1, 1024, %s29_s28, [#allocation8], %s5045_s13, %s5045_s13, %s5046_s14  }
  0x47   :  { %s4906_s18 = scalar_lea.hbm %s5890_s4, 4096 }
  0x48   :  { %p4907_p4 = scmp.ne.s32.totalorder %s5890_s4, %s4906_s18  ;;  %p4910_p5 = scmp.lt.u32.totalorder %s4906_s18, %s5890_s4 }
  0x4a   :  { %p4912_p6 = pnand %p4910_p5, %p4907_p4 }
  0x4c   :  { %4915 = shalt.err (!%p4912_p6)
}
  0x4d   :  { %s4916_s17 = scalar_lea.vmem %s55_s30, 4096  ;;  %p4921_p8 = scmp.lt.s32.totalorder %s55_s30, %s55_s30 }
  0x4e   :  { %p4917_p7 = scmp.ne.s32.totalorder %s55_s30, %s4916_s17  ;;  %p4922_p9 = scmp.lt.s32.totalorder %s4916_s17, %s4916_s17 }
  0x50   :  { %p4923_p10 = por %p4922_p9, %p4921_p8 }
  0x52   :  { %p4924_p11 = pnand %p4923_p10, %p4917_p7 }
  0x54   :  { %4927 = shalt.err (!%p4924_p11)
}
  0x55   :  { %60 = dma.hbm_to_vmem [thread:$0]  %s5890_s4, 4096, %s55_s30, [#allocation11], %s5049_s22, %s5049_s22, %s5050_s29  }
  0x56   :  { %s5053_s19 = smov [#allocation15]   ;;  %s5054_s23 = smov [#allocation18]  }
  0x57   :  { %s80_s21 = sshll.u32 %s5053_s19, 4  ;;  %s106_s24 = sshll.u32 %s5054_s23, 4  ;;  %s81_s21 = int_to_ptr.vmem [resolvable:$true] %s80_s21  ;;  %s107_s24 = int_to_ptr.vmem [resolvable:$true] %s106_s24 }
  0x58   :  { %s4928_s25 = scalar_lea.hbm %s5893_s7, 4096 }
  0x59   :  { %p4929_p12 = scmp.ne.s32.totalorder %s5893_s7, %s4928_s25  ;;  %p4932_p13 = scmp.lt.u32.totalorder %s4928_s25, %s5893_s7 }
  0x5b   :  { %p4934_p0 = pnand %p4932_p13, %p4929_p12 }
  0x5d   :  { %4937 = shalt.err (!%p4934_p0)
}
  0x5e   :  { %s4938_s4 = scalar_lea.vmem %s81_s21, 4096  ;;  %p4943_p2 = scmp.lt.s32.totalorder %s81_s21, %s81_s21 }
  0x5f   :  { %p4939_p1 = scmp.ne.s32.totalorder %s81_s21, %s4938_s4  ;;  %p4944_p3 = scmp.lt.s32.totalorder %s4938_s4, %s4938_s4 }
  0x61   :  { %p4945_p4 = por %p4944_p3, %p4943_p2 }
  0x63   :  { %p4946_p5 = pnand %p4945_p4, %p4939_p1 }
  0x65   :  { %4949 = shalt.err (!%p4946_p5)
}
  0x66   :  { %86 = dma.hbm_to_vmem [thread:$0]  %s5893_s7, 4096, %s81_s21, [#allocation14], %s5049_s22, %s5049_s22, %s5050_s29  }
  0x67   :  { %s4950_s17 = scalar_lea.hbm %s5896_s10, 1024 }
  0x68   :  { %p4951_p6 = scmp.ne.s32.totalorder %s5896_s10, %s4950_s17  ;;  %p4954_p7 = scmp.lt.u32.totalorder %s4950_s17, %s5896_s10 }
  0x6a   :  { %p4956_p8 = pnand %p4954_p7, %p4951_p6 }
  0x6c   :  { %4959 = shalt.err (!%p4956_p8)
}
  0x6d   :  { %s4960_s8 = scalar_lea.vmem %s107_s24, 1024  ;;  %p4965_p10 = scmp.lt.s32.totalorder %s107_s24, %s107_s24 }
  0x6e   :  { %p4961_p9 = scmp.ne.s32.totalorder %s107_s24, %s4960_s8  ;;  %p4966_p11 = scmp.lt.s32.totalorder %s4960_s8, %s4960_s8 }
  0x70   :  { %p4967_p12 = por %p4966_p11, %p4965_p10 }
  0x72   :  { %p4968_p13 = pnand %p4967_p12, %p4961_p9 }
  0x74   :  { %4971 = shalt.err (!%p4968_p13)
}
  0x75   :  { %s5055_s7 = smov 64   ;;  %s5056_s22 = smov 4  }
  0x76   :  { %112 = dma.hbm_to_vmem [thread:$0]  %s5896_s10, 1024, %s107_s24, [#allocation17], %s5055_s7, %s5055_s7, %s5056_s22  }
  0x77   :  { %5014 = dma.done.wait [#allocation8], 1024  }
  0x78   :  { %5015 = vsyncadd [#allocation8], 4294966272 }
  0x79   :  { %5016 = dma.done.wait [#allocation11], 5120  }
  0x7a   :  { %5017 = vsyncadd [#allocation11], 4294962176 }
  0x7b   :  { %5018 = dma.done.wait [#allocation14], 8192  }
  0x7c   :  { %5019 = vsyncadd [#allocation14], 4294959104 }
  0x7d   :  { %5020 = dma.done.wait [#allocation17], 5120  }
  0x7e   :  { %5021 = vsyncadd [#allocation17], 4294962176  ;;  %v5057_v0 = vmov 0   ;;  %v5232_v1 = vld [vmem:[%s5889_s3] sm:$0xff]  ;;  %v4427_v3 = vld [vmem:[#allocation12 + $0xc] ss:$16 sps:$4 sm:$0xff]  }
  0x7f   :  { %407 = vmatprep.mubr.bf16.mxu0 %v5057_v0  ;;  %480 = vmatprep.mubr.bf16.mxu1 %v5057_v0  ;;  %v4425_v2 = vld [vmem:[#allocation12 + $0x4] ss:$16 sps:$4 sm:$0xff]   ;;  %v4429_v4 = vld [vmem:[#allocation12] ss:$16 sps:$4 sm:$0xff]   ;;  %v4430_v5 = vld [vmem:[#allocation12 + $0x8] ss:$16 sps:$4 sm:$0xff]  }
  0x80   :  { %375 = vmatprep.subr.bf16.mxu0 %v4425_v2  ;;  %v4431_v6 = vld [vmem:[#allocation12 + $0x24] ss:$16 sps:$4 sm:$0xff]   ;;  %448 = vmatprep.subr.bf16.mxu1 %v4427_v3  ;;  %v4433_v7 = vld [vmem:[#allocation12 + $0x2c] ss:$16 sps:$4 sm:$0xff]   ;;  %v4435_v8 = vld [vmem:[#allocation12 + $0x20] ss:$16 sps:$4 sm:$0xff]  }
  0x81   :  { %376 = vmatpush1.bf16.msra.mxu0 %v4429_v4  ;;  %449 = vmatpush1.bf16.msra.mxu1 %v4430_v5  ;;  %v4436_v9 = vld [vmem:[#allocation12 + $0x28] ss:$16 sps:$4 sm:$0xff]   ;;  %v4437_v10 = vld [vmem:[#allocation12 + $0x44] ss:$16 sps:$4 sm:$0xff]   ;;  %v4439_v11 = vld [vmem:[#allocation12 + $0x4c] ss:$16 sps:$4 sm:$0xff]  }
  0x82   :  { %377 = vmatprep.subr.bf16.mxu0 %v4431_v6  ;;  %450 = vmatprep.subr.bf16.mxu1 %v4433_v7  ;;  %v4441_v12 = vld [vmem:[#allocation12 + $0x40] ss:$16 sps:$4 sm:$0xff]   ;;  %v4442_v13 = vld [vmem:[#allocation12 + $0x48] ss:$16 sps:$4 sm:$0xff]   ;;  %v4443_v14 = vld [vmem:[#allocation12 + $0x64] ss:$16 sps:$4 sm:$0xff]  }
  0x83   :  { %v4445_v15 = vld [vmem:[#allocation12 + $0x6c] ss:$16 sps:$4 sm:$0xff]   ;;  %v4447_v16 = vld [vmem:[#allocation12 + $0x60] ss:$16 sps:$4 sm:$0xff]   ;;  %v4448_v17 = vld [vmem:[#allocation12 + $0x68] ss:$16 sps:$4 sm:$0xff]  }
  0x84   :  { %v4449_v18 = vld [vmem:[#allocation12 + $0x84] ss:$16 sps:$4 sm:$0xff]   ;;  %v4451_v19 = vld [vmem:[#allocation12 + $0x8c] ss:$16 sps:$4 sm:$0xff]   ;;  %v4453_v20 = vld [vmem:[#allocation12 + $0x80] ss:$16 sps:$4 sm:$0xff]  }
  0x85   :  { %378 = vmatpush1.bf16.msra.mxu0 %v4435_v8  ;;  %451 = vmatpush1.bf16.msra.mxu1 %v4436_v9  ;;  %v4454_v21 = vld [vmem:[#allocation12 + $0x88] ss:$16 sps:$4 sm:$0xff]   ;;  %v4455_v22 = vld [vmem:[#allocation12 + $0xa4] ss:$16 sps:$4 sm:$0xff]   ;;  %v4457_v23 = vld [vmem:[#allocation12 + $0xac] ss:$16 sps:$4 sm:$0xff]  }
  0x86   :  { %379 = vmatprep.subr.bf16.mxu0 %v4437_v10  ;;  %452 = vmatprep.subr.bf16.mxu1 %v4439_v11  ;;  %v4459_v24 = vld [vmem:[#allocation12 + $0xa0] ss:$16 sps:$4 sm:$0xff]   ;;  %v4460_v25 = vld [vmem:[#allocation12 + $0xa8] ss:$16 sps:$4 sm:$0xff]   ;;  %v4461_v26 = vld [vmem:[#allocation12 + $0xc4] ss:$16 sps:$4 sm:$0xff]  }
  0x87   :  { %v4463_v27 = vld [vmem:[#allocation12 + $0xcc] ss:$16 sps:$4 sm:$0xff]   ;;  %v4465_v28 = vld [vmem:[#allocation12 + $0xc0] ss:$16 sps:$4 sm:$0xff]   ;;  %v4466_v29 = vld [vmem:[#allocation12 + $0xc8] ss:$16 sps:$4 sm:$0xff]  }
  0x88   :  { %v4467_v30 = vld [vmem:[#allocation12 + $0xe4] ss:$16 sps:$4 sm:$0xff]   ;;  %v4469_v31 = vld [vmem:[#allocation12 + $0xec] ss:$16 sps:$4 sm:$0xff]   ;;  %v4471_v32 = vld [vmem:[#allocation12 + $0xe0] ss:$16 sps:$4 sm:$0xff]  }
  0x89   :  { %380 = vmatpush1.bf16.msra.mxu0 %v4441_v12  ;;  %453 = vmatpush1.bf16.msra.mxu1 %v4442_v13  ;;  %v137_v33 = vld [vmem:[#allocation7] sm:$0xff]  ;;  %v138_v34 = vld [vmem:[#allocation7 + $0x8] sm:$0xff]  ;;  %v139_v45 = vld [vmem:[#allocation7 + $0x10] sm:$0xff]  ;;  %p4005_p0 = scmp.le.s32.totalorder %s5886_s0, 0 }
  0x8a   :  { %381 = vmatprep.subr.bf16.mxu0 %v4443_v14  ;;  %454 = vmatprep.subr.bf16.mxu1 %v4445_v15  ;;  %v4472_v35 = vld [vmem:[#allocation12 + $0xe8] ss:$16 sps:$4 sm:$0xff]   ;;  %v4475_v36 = vld [vmem:[#allocation15 + $0x4] ss:$16 sps:$4 sm:$0xff]   ;;  %v4478_v37 = vld [vmem:[#allocation15 + $0xc] ss:$16 sps:$4 sm:$0xff]   ;;  %v145_v38 = vpack.c.bf16 %v138_v34, %v137_v33 }
  0x8b   :  { %v4473_v39 = vld [vmem:[#allocation15] ss:$16 sps:$4 sm:$0xff]   ;;  %v4476_v40 = vld [vmem:[#allocation15 + $0x8] ss:$16 sps:$4 sm:$0xff]   ;;  %v4481_v41 = vld [vmem:[#allocation15 + $0x24] ss:$16 sps:$4 sm:$0xff]  }
  0x8c   :  { %v4484_v42 = vld [vmem:[#allocation15 + $0x2c] ss:$16 sps:$4 sm:$0xff]   ;;  %v4479_v43 = vld [vmem:[#allocation15 + $0x20] ss:$16 sps:$4 sm:$0xff]   ;;  %v4482_v44 = vld [vmem:[#allocation15 + $0x28] ss:$16 sps:$4 sm:$0xff]  }
  0x8d   :  { %382 = vmatpush1.bf16.msra.mxu0 %v4447_v16  ;;  %455 = vmatpush1.bf16.msra.mxu1 %v4448_v17  ;;  %v140_v46 = vld [vmem:[#allocation7 + $0x18] sm:$0xff]  ;;  %v4487_v47 = vld [vmem:[#allocation15 + $0x44] ss:$16 sps:$4 sm:$0xff]   ;;  %v4485_v50 = vld [vmem:[#allocation15 + $0x40] ss:$16 sps:$4 sm:$0xff]   ;;  %s5367_s5 = smov (!%p4005_p0), 0  }
  0x8e   :  { %383 = vmatprep.subr.bf16.mxu0 %v4449_v18  ;;  %456 = vmatprep.subr.bf16.mxu1 %v4451_v19  ;;  %v4490_v48 = vld [vmem:[#allocation15 + $0x4c] ss:$16 sps:$4 sm:$0xff]   ;;  %v146_v49 = vpack.c.bf16 %v140_v46, %v139_v45  ;;  %v4488_v51 = vld [vmem:[#allocation15 + $0x48] ss:$16 sps:$4 sm:$0xff]   ;;  %v4493_v52 = vld [vmem:[#allocation15 + $0x64] ss:$16 sps:$4 sm:$0xff]  }
  0x8f   :  { %v4491_v53 = vld [vmem:[#allocation15 + $0x60] ss:$16 sps:$4 sm:$0xff]   ;;  %v4496_v54 = vld [vmem:[#allocation15 + $0x6c] ss:$16 sps:$4 sm:$0xff]   ;;  %v4494_v57 = vld [vmem:[#allocation15 + $0x68] ss:$16 sps:$4 sm:$0xff]  }
  0x90   :  { %v141_v55 = vld [vmem:[#allocation7 + $0x20] sm:$0xff]  ;;  %v142_v56 = vld [vmem:[#allocation7 + $0x28] sm:$0xff]  ;;  %v143_v4 = vld [vmem:[#allocation7 + $0x30] sm:$0xff] }
  0x91   :  { %384 = vmatpush1.bf16.msra.mxu0 %v4453_v20  ;;  %457 = vmatpush1.bf16.msra.mxu1 %v4454_v21  ;;  %v4499_v58 = vld [vmem:[#allocation15 + $0x84] ss:$16 sps:$4 sm:$0xff]   ;;  %v4502_v59 = vld [vmem:[#allocation15 + $0x8c] ss:$16 sps:$4 sm:$0xff]   ;;  %v147_v60 = vpack.c.bf16 %v142_v56, %v141_v55  ;;  %v4497_v61 = vld [vmem:[#allocation15 + $0x80] ss:$16 sps:$4 sm:$0xff]  }
  0x92   :  { %385 = vmatprep.subr.bf16.mxu0 %v4455_v22  ;;  %458 = vmatprep.subr.bf16.mxu1 %v4457_v23  ;;  %v4500_v62 = vld [vmem:[#allocation15 + $0x88] ss:$16 sps:$4 sm:$0xff]   ;;  %v4505_v63 = vld [vmem:[#allocation15 + $0xa4] ss:$16 sps:$4 sm:$0xff]   ;;  %v4508_v2 = vld [vmem:[#allocation15 + $0xac] ss:$16 sps:$4 sm:$0xff]  }
  0x93   :  { %v4503_v3 = vld [vmem:[#allocation15 + $0xa0] ss:$16 sps:$4 sm:$0xff]   ;;  %v144_v5 = vld [vmem:[#allocation7 + $0x38] sm:$0xff]  ;;  %v4511_v7 = vld [vmem:[#allocation15 + $0xc4] ss:$16 sps:$4 sm:$0xff]  }
  0x94   :  { %v4506_v6 = vld [vmem:[#allocation15 + $0xa8] ss:$16 sps:$4 sm:$0xff]   ;;  %v4514_v8 = vld [vmem:[#allocation15 + $0xcc] ss:$16 sps:$4 sm:$0xff]   ;;  %v148_v9 = vpack.c.bf16 %v144_v5, %v143_v4  ;;  %v4509_v10 = vld [vmem:[#allocation15 + $0xc0] ss:$16 sps:$4 sm:$0xff]  }
  0x95   :  { %386 = vmatpush1.bf16.msra.mxu0 %v4459_v24  ;;  %459 = vmatpush1.bf16.msra.mxu1 %v4460_v25  ;;  %v4512_v11 = vld [vmem:[#allocation15 + $0xc8] ss:$16 sps:$4 sm:$0xff]   ;;  %v4517_v12 = vld [vmem:[#allocation15 + $0xe4] ss:$16 sps:$4 sm:$0xff]   ;;  %v4520_v13 = vld [vmem:[#allocation15 + $0xec] ss:$16 sps:$4 sm:$0xff]  }
  0x96   :  { %387 = vmatprep.subr.bf16.mxu0 %v4461_v26  ;;  %460 = vmatprep.subr.bf16.mxu1 %v4463_v27  ;;  %v4515_v14 = vld [vmem:[#allocation15 + $0xe0] ss:$16 sps:$4 sm:$0xff]   ;;  %v150_v16 = vld [vmem:[#allocation10 + $0x8] sm:$0xff]  ;;  %v152_v20 = vld [vmem:[#allocation10 + $0x18] sm:$0xff] }
  0x97   :  { %v149_v15 = vld [vmem:[#allocation10] sm:$0xff]  ;;  %v4518_v17 = vld [vmem:[#allocation15 + $0xe8] ss:$16 sps:$4 sm:$0xff]   ;;  %v151_v19 = vld [vmem:[#allocation10 + $0x10] sm:$0xff] }
  0x98   :  { %v157_v18 = vpack.c.bf16 %v150_v16, %v149_v15  ;;  %v158_v21 = vpack.c.bf16 %v152_v20, %v151_v19  ;;  %v153_v22 = vld [vmem:[#allocation10 + $0x20] sm:$0xff]  ;;  %v154_v23 = vld [vmem:[#allocation10 + $0x28] sm:$0xff]  ;;  %v155_v25 = vld [vmem:[#allocation10 + $0x30] sm:$0xff] }
  0x99   :  { %388 = vmatpush1.bf16.msra.mxu0 %v4465_v28  ;;  %461 = vmatpush1.bf16.msra.mxu1 %v4466_v29  ;;  %v159_v24 = vpack.c.bf16 %v154_v23, %v153_v22  ;;  %v156_v26 = vld [vmem:[#allocation10 + $0x38] sm:$0xff]  ;;  %v195_v28 = vlaneseq }
  0x9a   :  { %389 = vmatprep.subr.bf16.mxu0 %v4467_v30  ;;  %462 = vmatprep.subr.bf16.mxu1 %v4469_v31  ;;  %v160_v27 = vpack.c.bf16 %v156_v26, %v155_v25  ;;  %v193_v31 = vld [vmem:[%s5892_s6] sm:$0xf] }
  0x9b   :  { %v5248_v29 = vshrl.u32 %v195_v28, 7 }
  0x9d   :  { %390 = vmatpush1.bf16.msra.mxu0 %v4471_v32  ;;  %463 = vmatpush1.bf16.msra.mxu1 %v4472_v35  ;;  %v197_v30 = vsub.s32 0, %v5248_v29  ;;  %v205_v32 = vsub.s32 2, %v5248_v29  ;;  %v201_v33 = vsub.s32 1, %v5248_v29  ;;  %v209_v34 = vsub.s32 3, %v5248_v29 }
  0x9e   :  { %767 = vmatprep.subr.bf16.mxu0 %v4475_v36  ;;  %840 = vmatprep.subr.bf16.mxu1 %v4478_v37 }
  0x9f   :  { %v5259_v35 = vrot.slane %v193_v31, %v197_v30  ;;  %v5263_v36 = vrot.slane %v193_v31, %v205_v32  ;;  %v5267_v37 = vrot.slane %v193_v31, %v201_v33 }
  0xa0   :  { %408 = vmatmul.mubr.bf16.vlgmr.msra.gmra.mrb[0].mxu0 %v145_v38  ;;  %481 = vmatmul.mubr.bf16.vlgmr.msra.gmra.mrb[0].mxu1 %v145_v38  ;;  %v5271_v38 = vrot.slane %v193_v31, %v209_v34 }
  0xa1   :  { %768 = vmatpush1.bf16.msra.mxu0 %v4473_v39  ;;  %841 = vmatpush1.bf16.msra.mxu1 %v4476_v40 }
  0xa2   :  { %769 = vmatprep.subr.bf16.mxu0 %v4481_v41  ;;  %842 = vmatprep.subr.bf16.mxu1 %v4484_v42 }
  0xa3   :  { %417 = vmatprep.mubr.bf16.mxu0 %v5057_v0  ;;  %490 = vmatprep.mubr.bf16.mxu1 %v5057_v0 }
  0xa5   :  { %770 = vmatpush1.bf16.msra.mxu0 %v4479_v43  ;;  %843 = vmatpush1.bf16.msra.mxu1 %v4482_v44 }
  0xa6   :  { %771 = vmatprep.subr.bf16.mxu0 %v4487_v47  ;;  %844 = vmatprep.subr.bf16.mxu1 %v4490_v48 }
  0xa8   :  { %418 = vmatmul.mubr.bf16.gmra.mrb[4].mxu0 %v146_v49  ;;  %491 = vmatmul.mubr.bf16.gmra.mrb[4].mxu1 %v146_v49 }
  0xa9   :  { %772 = vmatpush1.bf16.msra.mxu0 %v4485_v50  ;;  %845 = vmatpush1.bf16.msra.mxu1 %v4488_v51 }
  0xaa   :  { %773 = vmatprep.subr.bf16.mxu0 %v4493_v52  ;;  %846 = vmatprep.subr.bf16.mxu1 %v4496_v54 }
  0xab   :  { %427 = vmatprep.mubr.bf16.mxu0 %v5057_v0  ;;  %500 = vmatprep.mubr.bf16.mxu1 %v5057_v0 }
  0xad   :  { %774 = vmatpush1.bf16.msra.mxu0 %v4491_v53  ;;  %847 = vmatpush1.bf16.msra.mxu1 %v4494_v57 }
  0xae   :  { %775 = vmatprep.subr.bf16.mxu0 %v4499_v58  ;;  %848 = vmatprep.subr.bf16.mxu1 %v4502_v59 }
  0xb0   :  { %428 = vmatmul.mubr.bf16.gmra.mrb[8].mxu0 %v147_v60  ;;  %501 = vmatmul.mubr.bf16.gmra.mrb[8].mxu1 %v147_v60 }
  0xb1   :  { %776 = vmatpush1.bf16.msra.mxu0 %v4497_v61  ;;  %849 = vmatpush1.bf16.msra.mxu1 %v4500_v62 }
  0xb2   :  { %777 = vmatprep.subr.bf16.mxu0 %v4505_v63  ;;  %850 = vmatprep.subr.bf16.mxu1 %v4508_v2 }
  0xb3   :  { %437 = vmatprep.mubr.bf16.mxu0 %v5057_v0  ;;  %510 = vmatprep.mubr.bf16.mxu1 %v5057_v0 }
  0xb5   :  { %778 = vmatpush1.bf16.msra.mxu0 %v4503_v3  ;;  %851 = vmatpush1.bf16.msra.mxu1 %v4506_v6 }
  0xb6   :  { %779 = vmatprep.subr.bf16.mxu0 %v4511_v7  ;;  %852 = vmatprep.subr.bf16.mxu1 %v4514_v8 }
  0xb8   :  { %438 = vmatmul.mubr.bf16.gmra.mrb[12].mxu0 %v148_v9  ;;  %511 = vmatmul.mubr.bf16.gmra.mrb[12].mxu1 %v148_v9 }
  0xb9   :  { %780 = vmatpush1.bf16.msra.mxu0 %v4509_v10  ;;  %853 = vmatpush1.bf16.msra.mxu1 %v4512_v11 }
  0xba   :  { %781 = vmatprep.subr.bf16.mxu0 %v4517_v12  ;;  %854 = vmatprep.subr.bf16.mxu1 %v4520_v13 }
  0xbb   :  { %799 = vmatprep.mubr.bf16.mxu0 %v5057_v0  ;;  %872 = vmatprep.mubr.bf16.mxu1 %v5057_v0 }
  0xbd   :  { %782 = vmatpush1.bf16.msra.mxu0 %v4515_v14  ;;  %855 = vmatpush1.bf16.msra.mxu1 %v4518_v17 }
  0xc0   :  { %800 = vmatmul.mubr.bf16.vlgmr.msra.gmra.mrb[16].mxu0 %v157_v18  ;;  %873 = vmatmul.mubr.bf16.vlgmr.msra.gmra.mrb[16].mxu1 %v157_v18 }
  0xc1   :  { %809 = vmatprep.mubr.bf16.mxu0 %v5057_v0  ;;  %882 = vmatprep.mubr.bf16.mxu1 %v5057_v0 }
  0xc8   :  { %810 = vmatmul.mubr.bf16.gmra.mrb[20].mxu0 %v158_v21  ;;  %883 = vmatmul.mubr.bf16.gmra.mrb[20].mxu1 %v158_v21 }
  0xc9   :  { %819 = vmatprep.mubr.bf16.mxu0 %v5057_v0  ;;  %892 = vmatprep.mubr.bf16.mxu1 %v5057_v0 }
  0xd0   :  { %820 = vmatmul.mubr.bf16.gmra.mrb[24].mxu0 %v159_v24  ;;  %893 = vmatmul.mubr.bf16.gmra.mrb[24].mxu1 %v159_v24 }
  0xd1   :  { %829 = vmatprep.mubr.bf16.mxu0 %v5057_v0  ;;  %902 = vmatprep.mubr.bf16.mxu1 %v5057_v0 }
  0xd8   :  { %830 = vmatmul.mubr.bf16.gmra.mrb[28].mxu0 %v160_v27  ;;  %903 = vmatmul.mubr.bf16.gmra.mrb[28].mxu1 %v160_v27 }
 0x173   :  { %v409_v39 = vpop.f32.mrb[0].mxu0  ;;  %v482_v41 = vpop.f32.mrb[0].mxu1 }
 0x174   :  { %v410_v40 = vadd.f32 %v409_v39, %v5259_v35  ;;  %v411_v42 = vpop.f32.mrb[1].mxu0  ;;  %v483_v43 = vadd.f32 %v482_v41, %v5263_v36  ;;  %v484_v45 = vpop.f32.mrb[1].mxu1 }
 0x175   :  { %v412_v44 = vadd.f32 %v411_v42, %v5267_v37  ;;  %v413_v46 = vpop.f32.mrb[2].mxu0  ;;  %v485_v47 = vadd.f32 %v484_v45, %v5271_v38  ;;  %v486_v49 = vpop.f32.mrb[2].mxu1  ;;  %v585_v42 = vld [vmem:[%s5895_s9] sm:$0xf] }
 0x176   :  { %521 = vst [vmem:[#allocation2] sm:$0xff] %v410_v40  ;;  %v414_v48 = vadd.f32 %v413_v46, %v5259_v35  ;;  %v415_v50 = vpop.f32.mrb[3].mxu0  ;;  %523 = vst [vmem:[#allocation2 + $0x10] sm:$0xff] %v483_v43  ;;  %v487_v51 = vadd.f32 %v486_v49, %v5263_v36  ;;  %v488_v53 = vpop.f32.mrb[3].mxu1 }
 0x177   :  { %522 = vst [vmem:[#allocation2 + $0x8] sm:$0xff] %v412_v44  ;;  %v416_v52 = vadd.f32 %v415_v50, %v5267_v37  ;;  %524 = vst [vmem:[#allocation2 + $0x18] sm:$0xff] %v485_v47  ;;  %v489_v54 = vadd.f32 %v488_v53, %v5271_v38 }
 0x178   :  { %525 = vst [vmem:[#allocation2 + $0x20] sm:$0xff] %v414_v48  ;;  %527 = vst [vmem:[#allocation2 + $0x30] sm:$0xff] %v487_v51  ;;  %v5310_v51 = vrot.slane %v585_v42, %v197_v30 }
 0x179   :  { %526 = vst [vmem:[#allocation2 + $0x28] sm:$0xff] %v416_v52  ;;  %528 = vst [vmem:[#allocation2 + $0x38] sm:$0xff] %v489_v54 }
 0x17b   :  { %v419_v55 = vpop.f32.mrb[4].mxu0  ;;  %v492_v57 = vpop.f32.mrb[4].mxu1 }
 0x17c   :  { %v420_v56 = vadd.f32 %v419_v55, %v5259_v35  ;;  %v421_v58 = vpop.f32.mrb[5].mxu0  ;;  %v493_v59 = vadd.f32 %v492_v57, %v5263_v36  ;;  %v494_v61 = vpop.f32.mrb[5].mxu1 }
 0x17d   :  { %v422_v60 = vadd.f32 %v421_v58, %v5267_v37  ;;  %v423_v62 = vpop.f32.mrb[6].mxu0  ;;  %v495_v63 = vadd.f32 %v494_v61, %v5271_v38  ;;  %v496_v3 = vpop.f32.mrb[6].mxu1 }
 0x17e   :  { %529 = vst [vmem:[#allocation2 + $0x40] sm:$0xff] %v420_v56  ;;  %v424_v2 = vadd.f32 %v423_v62, %v5259_v35  ;;  %v425_v4 = vpop.f32.mrb[7].mxu0  ;;  %531 = vst [vmem:[#allocation2 + $0x50] sm:$0xff] %v493_v59  ;;  %v497_v5 = vadd.f32 %v496_v3, %v5263_v36  ;;  %v498_v7 = vpop.f32.mrb[7].mxu1 }
 0x17f   :  { %530 = vst [vmem:[#allocation2 + $0x48] sm:$0xff] %v422_v60  ;;  %v426_v6 = vadd.f32 %v425_v4, %v5267_v37  ;;  %532 = vst [vmem:[#allocation2 + $0x58] sm:$0xff] %v495_v63  ;;  %v499_v8 = vadd.f32 %v498_v7, %v5271_v38 }
 0x180   :  { %533 = vst [vmem:[#allocation2 + $0x60] sm:$0xff] %v424_v2  ;;  %535 = vst [vmem:[#allocation2 + $0x70] sm:$0xff] %v497_v5 }
 0x181   :  { %534 = vst [vmem:[#allocation2 + $0x68] sm:$0xff] %v426_v6  ;;  %536 = vst [vmem:[#allocation2 + $0x78] sm:$0xff] %v499_v8 }
 0x183   :  { %v429_v9 = vpop.f32.mrb[8].mxu0  ;;  %v502_v11 = vpop.f32.mrb[8].mxu1 }
 0x184   :  { %v430_v10 = vadd.f32 %v429_v9, %v5259_v35  ;;  %v431_v12 = vpop.f32.mrb[9].mxu0  ;;  %v503_v13 = vadd.f32 %v502_v11, %v5263_v36  ;;  %v504_v15 = vpop.f32.mrb[9].mxu1 }
 0x185   :  { %v432_v14 = vadd.f32 %v431_v12, %v5267_v37  ;;  %v433_v16 = vpop.f32.mrb[10].mxu0  ;;  %v505_v17 = vadd.f32 %v504_v15, %v5271_v38  ;;  %v506_v19 = vpop.f32.mrb[10].mxu1 }
 0x186   :  { %537 = vst [vmem:[#allocation2 + $0x80] sm:$0xff] %v430_v10  ;;  %v434_v18 = vadd.f32 %v433_v16, %v5259_v35  ;;  %v435_v20 = vpop.f32.mrb[11].mxu0  ;;  %539 = vst [vmem:[#allocation2 + $0x90] sm:$0xff] %v503_v13  ;;  %v507_v21 = vadd.f32 %v506_v19, %v5263_v36  ;;  %v508_v23 = vpop.f32.mrb[11].mxu1 }
 0x187   :  { %538 = vst [vmem:[#allocation2 + $0x88] sm:$0xff] %v432_v14  ;;  %v436_v22 = vadd.f32 %v435_v20, %v5267_v37  ;;  %540 = vst [vmem:[#allocation2 + $0x98] sm:$0xff] %v505_v17  ;;  %v509_v24 = vadd.f32 %v508_v23, %v5271_v38 }
 0x188   :  { %541 = vst [vmem:[#allocation2 + $0xa0] sm:$0xff] %v434_v18  ;;  %543 = vst [vmem:[#allocation2 + $0xb0] sm:$0xff] %v507_v21 }
 0x189   :  { %542 = vst [vmem:[#allocation2 + $0xa8] sm:$0xff] %v436_v22  ;;  %544 = vst [vmem:[#allocation2 + $0xb8] sm:$0xff] %v509_v24 }
 0x18b   :  { %v439_v25 = vpop.f32.mrb[12].mxu0  ;;  %v512_v27 = vpop.f32.mrb[12].mxu1 }
 0x18c   :  { %v440_v26 = vadd.f32 %v439_v25, %v5259_v35  ;;  %v441_v28 = vpop.f32.mrb[13].mxu0  ;;  %v513_v31 = vadd.f32 %v512_v27, %v5263_v36  ;;  %v514_v40 = vpop.f32.mrb[13].mxu1 }
 0x18d   :  { %v442_v39 = vadd.f32 %v441_v28, %v5267_v37  ;;  %v443_v41 = vpop.f32.mrb[14].mxu0  ;;  %v515_v43 = vadd.f32 %v514_v40, %v5271_v38  ;;  %v516_v45 = vpop.f32.mrb[14].mxu1 }
 0x18e   :  { %545 = vst [vmem:[#allocation2 + $0xc0] sm:$0xff] %v440_v26  ;;  %v444_v44 = vadd.f32 %v443_v41, %v5259_v35  ;;  %v445_v46 = vpop.f32.mrb[15].mxu0  ;;  %547 = vst [vmem:[#allocation2 + $0xd0] sm:$0xff] %v513_v31  ;;  %v517_v47 = vadd.f32 %v516_v45, %v5263_v36  ;;  %v518_v49 = vpop.f32.mrb[15].mxu1  ;;  %v5314_v35 = vrot.slane %v585_v42, %v205_v32 }
 0x18f   :  { %546 = vst [vmem:[#allocation2 + $0xc8] sm:$0xff] %v442_v39  ;;  %v446_v48 = vadd.f32 %v445_v46, %v5267_v37  ;;  %548 = vst [vmem:[#allocation2 + $0xd8] sm:$0xff] %v515_v43  ;;  %v519_v50 = vadd.f32 %v518_v49, %v5271_v38  ;;  %v5318_v36 = vrot.slane %v585_v42, %v201_v33 }
 0x190   :  { %549 = vst [vmem:[#allocation2 + $0xe0] sm:$0xff] %v444_v44  ;;  %551 = vst [vmem:[#allocation2 + $0xf0] sm:$0xff] %v517_v47  ;;  %v5322_v37 = vrot.slane %v585_v42, %v209_v34 }
 0x191   :  { %550 = vst [vmem:[#allocation2 + $0xe8] sm:$0xff] %v446_v48  ;;  %552 = vst [vmem:[#allocation2 + $0xf8] sm:$0xff] %v519_v50 }
 0x193   :  { %v801_v38 = vpop.f32.mrb[16].mxu0  ;;  %v874_v30 = vpop.f32.mrb[16].mxu1 }
 0x194   :  { %v802_v52 = vadd.f32 %v801_v38, %v5310_v51  ;;  %v803_v53 = vpop.f32.mrb[17].mxu0  ;;  %v875_v54 = vadd.f32 %v874_v30, %v5314_v35  ;;  %v876_v32 = vpop.f32.mrb[17].mxu1 }
 0x195   :  { %v804_v55 = vadd.f32 %v803_v53, %v5318_v36  ;;  %v805_v56 = vpop.f32.mrb[18].mxu0  ;;  %v877_v33 = vadd.f32 %v876_v32, %v5322_v37  ;;  %v878_v58 = vpop.f32.mrb[18].mxu1  ;;  %v5361_v32 = vmov 0.0  }
 0x196   :  { %913 = vst [vmem:[#allocation3] sm:$0xff] %v802_v52  ;;  %v806_v57 = vadd.f32 %v805_v56, %v5310_v51  ;;  %v807_v29 = vpop.f32.mrb[19].mxu0  ;;  %915 = vst [vmem:[#allocation3 + $0x10] sm:$0xff] %v875_v54  ;;  %v879_v34 = vadd.f32 %v878_v58, %v5314_v35  ;;  %v880_v60 = vpop.f32.mrb[19].mxu1 }
 0x197   :  { %914 = vst [vmem:[#allocation3 + $0x8] sm:$0xff] %v804_v55  ;;  %v808_v59 = vadd.f32 %v807_v29, %v5318_v36  ;;  %916 = vst [vmem:[#allocation3 + $0x18] sm:$0xff] %v877_v33  ;;  %v881_v61 = vadd.f32 %v880_v60, %v5322_v37 }
 0x198   :  { %917 = vst [vmem:[#allocation3 + $0x20] sm:$0xff] %v806_v57  ;;  %919 = vst [vmem:[#allocation3 + $0x30] sm:$0xff] %v879_v34 }
 0x199   :  { %918 = vst [vmem:[#allocation3 + $0x28] sm:$0xff] %v808_v59  ;;  %920 = vst [vmem:[#allocation3 + $0x38] sm:$0xff] %v881_v61 }
 0x19b   :  { %v811_v62 = vpop.f32.mrb[20].mxu0  ;;  %v884_v2 = vpop.f32.mrb[20].mxu1 }
 0x19c   :  { %v812_v63 = vadd.f32 %v811_v62, %v5310_v51  ;;  %v813_v3 = vpop.f32.mrb[21].mxu0  ;;  %v885_v4 = vadd.f32 %v884_v2, %v5314_v35  ;;  %v886_v6 = vpop.f32.mrb[21].mxu1 }
 0x19d   :  { %v814_v5 = vadd.f32 %v813_v3, %v5318_v36  ;;  %v815_v7 = vpop.f32.mrb[22].mxu0  ;;  %v887_v8 = vadd.f32 %v886_v6, %v5322_v37  ;;  %v888_v10 = vpop.f32.mrb[22].mxu1 }
 0x19e   :  { %921 = vst [vmem:[#allocation3 + $0x40] sm:$0xff] %v812_v63  ;;  %v816_v9 = vadd.f32 %v815_v7, %v5310_v51  ;;  %v817_v11 = vpop.f32.mrb[23].mxu0  ;;  %923 = vst [vmem:[#allocation3 + $0x50] sm:$0xff] %v885_v4  ;;  %v889_v12 = vadd.f32 %v888_v10, %v5314_v35  ;;  %v890_v14 = vpop.f32.mrb[23].mxu1 }
 0x19f   :  { %922 = vst [vmem:[#allocation3 + $0x48] sm:$0xff] %v814_v5  ;;  %v818_v13 = vadd.f32 %v817_v11, %v5318_v36  ;;  %924 = vst [vmem:[#allocation3 + $0x58] sm:$0xff] %v887_v8  ;;  %v891_v15 = vadd.f32 %v890_v14, %v5322_v37 }
 0x1a0   :  { %925 = vst [vmem:[#allocation3 + $0x60] sm:$0xff] %v816_v9  ;;  %927 = vst [vmem:[#allocation3 + $0x70] sm:$0xff] %v889_v12 }
 0x1a1   :  { %926 = vst [vmem:[#allocation3 + $0x68] sm:$0xff] %v818_v13  ;;  %928 = vst [vmem:[#allocation3 + $0x78] sm:$0xff] %v891_v15 }
 0x1a3   :  { %v821_v16 = vpop.f32.mrb[24].mxu0  ;;  %v894_v18 = vpop.f32.mrb[24].mxu1 }
 0x1a4   :  { %v822_v17 = vadd.f32 %v821_v16, %v5310_v51  ;;  %v823_v19 = vpop.f32.mrb[25].mxu0  ;;  %v895_v20 = vadd.f32 %v894_v18, %v5314_v35  ;;  %v896_v22 = vpop.f32.mrb[25].mxu1 }
 0x1a5   :  { %v824_v21 = vadd.f32 %v823_v19, %v5318_v36  ;;  %v825_v23 = vpop.f32.mrb[26].mxu0  ;;  %v897_v24 = vadd.f32 %v896_v22, %v5322_v37  ;;  %v898_v26 = vpop.f32.mrb[26].mxu1 }
 0x1a6   :  { %929 = vst [vmem:[#allocation3 + $0x80] sm:$0xff] %v822_v17  ;;  %v826_v25 = vadd.f32 %v825_v23, %v5310_v51  ;;  %v827_v27 = vpop.f32.mrb[27].mxu0  ;;  %931 = vst [vmem:[#allocation3 + $0x90] sm:$0xff] %v895_v20  ;;  %v899_v28 = vadd.f32 %v898_v26, %v5314_v35  ;;  %v900_v39 = vpop.f32.mrb[27].mxu1 }
 0x1a7   :  { %930 = vst [vmem:[#allocation3 + $0x88] sm:$0xff] %v824_v21  ;;  %v828_v31 = vadd.f32 %v827_v27, %v5318_v36  ;;  %932 = vst [vmem:[#allocation3 + $0x98] sm:$0xff] %v897_v24  ;;  %v901_v40 = vadd.f32 %v900_v39, %v5322_v37 }
 0x1a8   :  { %933 = vst [vmem:[#allocation3 + $0xa0] sm:$0xff] %v826_v25  ;;  %935 = vst [vmem:[#allocation3 + $0xb0] sm:$0xff] %v899_v28 }
 0x1a9   :  { %934 = vst [vmem:[#allocation3 + $0xa8] sm:$0xff] %v828_v31  ;;  %936 = vst [vmem:[#allocation3 + $0xb8] sm:$0xff] %v901_v40 }
 0x1ab   :  { %v831_v41 = vpop.f32.mrb[28].mxu0  ;;  %v904_v43 = vpop.f32.mrb[28].mxu1  ;;  %3934 = sbr.rel (%p4005_p0) target bundleno = 728 (0x2d8), region = 108 }
 0x1ac   :  { %v832_v42 = vadd.f32 %v831_v41, %v5310_v51  ;;  %v833_v44 = vpop.f32.mrb[29].mxu0  ;;  %v905_v45 = vadd.f32 %v904_v43, %v5314_v35  ;;  %v906_v47 = vpop.f32.mrb[29].mxu1 }
 0x1ad   :  { %v834_v46 = vadd.f32 %v833_v44, %v5318_v36  ;;  %v835_v48 = vpop.f32.mrb[30].mxu0  ;;  %v907_v49 = vadd.f32 %v906_v47, %v5322_v37  ;;  %v908_v38 = vpop.f32.mrb[30].mxu1 }
 0x1ae   :  { %937 = vst [vmem:[#allocation3 + $0xc0] sm:$0xff] %v832_v42  ;;  %v836_v50 = vadd.f32 %v835_v48, %v5310_v51  ;;  %v837_v52 = vpop.f32.mrb[31].mxu0  ;;  %939 = vst [vmem:[#allocation3 + $0xd0] sm:$0xff] %v905_v45  ;;  %v909_v30 = vadd.f32 %v908_v38, %v5314_v35  ;;  %v910_v54 = vpop.f32.mrb[31].mxu1  ;;  %v5359_v51 = vmov 0.0   ;;  %v5363_v35 = vmov (!%p4005_p0), 0.0  }
 0x1af   :  { %938 = vst [vmem:[#allocation3 + $0xc8] sm:$0xff] %v834_v46  ;;  %v838_v53 = vadd.f32 %v837_v52, %v5318_v36  ;;  %940 = vst [vmem:[#allocation3 + $0xd8] sm:$0xff] %v907_v49  ;;  %v911_v55 = vadd.f32 %v910_v54, %v5322_v37  ;;  %v5365_v36 = vmov (!%p4005_p0), 0.0  }
 0x1b0   :  { %941 = vst [vmem:[#allocation3 + $0xe0] sm:$0xff] %v836_v50  ;;  %943 = vst [vmem:[#allocation3 + $0xf0] sm:$0xff] %v909_v30 }
 0x1b1   :  { %942 = vst [vmem:[#allocation3 + $0xe8] sm:$0xff] %v838_v53  ;;  %944 = vst [vmem:[#allocation3 + $0xf8] sm:$0xff] %v911_v55 }
 0x1b2 LB: > { %v4522_v37 = vld [vmem:[#allocation13 + $0x4] ss:$16 sps:$4 sm:$0xff]   ;;  %v4524_v56 = vld [vmem:[#allocation13] ss:$16 sps:$4 sm:$0xff]   ;;  %v5058_v33 = vmov 0   ;;  %v1265_v58 = vstv %s5034_s5  ;;  %v994_v24 = vpack.c.bf16 %v5030_v36, %v5030_v36  ;;  %s4332_s18 = sshll.u32 %s5034_s5, 5  ;;  %s5034_s5 = sphi %s5367_s5, %s950_s5   ;;  %v5030_v36 = vphi %v5365_v36, %v5900_v36   ;;  %v5026_v35 = vphi %v5363_v35, %v5899_v35  }
 0x1b3   : > { %1187 = vmatprep.mubr.bf16.mxu0 %v5058_v33  ;;  %1228 = vmatprep.mubr.bf16.mxu1 %v5058_v33  ;;  %v4525_v57 = vld [vmem:[#allocation13 + $0x24] ss:$16 sps:$4 sm:$0xff]   ;;  %v4527_v29 = vld [vmem:[#allocation13 + $0x20] ss:$16 sps:$4 sm:$0xff]   ;;  %vm1266_vm0 = vcmp.lt.s32.totalorder %v1265_v58, %v5232_v1  ;;  %v4533_v60 = vld [vmem:[#allocation13 + $0xc] ss:$16 sps:$4 sm:$0xff]  }
 0x1b4   : > { %1155 = vmatprep.subr.bf16.mxu0 %v4522_v37  ;;  %4521 = vset.pattern.permute.xlu0 %v5058_v33  ;;  %v4528_v34 = vld [vmem:[#allocation13 + $0x44] ss:$16 sps:$4 sm:$0xff]   ;;  %v1267_v59 = vsel %vm1266_vm0, 1, %v5058_v33  ;;  %v4536_v61 = vld [vmem:[#allocation13 + $0x8] ss:$16 sps:$4 sm:$0xff]   ;;  %s957_s27 = scalar_lea.vmem [#allocation2], %s4332_s18 }
 0x1b5   : > { %1156 = vmatpush1.bf16.msra.mxu0 %v4524_v56  ;;  %1269 = vperm.xlu0 %4521, %v1267_v59   ;;  %v4530_v62 = vld [vmem:[#allocation13 + $0x40] ss:$16 sps:$4 sm:$0xff]   ;;  %v4531_v63 = vld [vmem:[#allocation13 + $0x64] ss:$16 sps:$4 sm:$0xff]   ;;  %v4539_v2 = vld [vmem:[#allocation13 + $0x2c] ss:$16 sps:$4 sm:$0xff]  }
 0x1b6   : > { %1157 = vmatprep.subr.bf16.mxu0 %v4525_v57  ;;  %1196 = vmatprep.subr.bf16.mxu1 %v4533_v60  ;;  %v4542_v3 = vld [vmem:[#allocation13 + $0x28] ss:$16 sps:$4 sm:$0xff]   ;;  %v4535_v4 = vld [vmem:[#allocation13 + $0x60] ss:$16 sps:$4 sm:$0xff]   ;;  %v4537_v5 = vld [vmem:[#allocation13 + $0x84] ss:$16 sps:$4 sm:$0xff]  }
 0x1b7   : > { %1197 = vmatpush1.bf16.msra.mxu1 %v4536_v61  ;;  %v4545_v6 = vld [vmem:[#allocation13 + $0x4c] ss:$16 sps:$4 sm:$0xff]   ;;  %v4548_v7 = vld [vmem:[#allocation13 + $0x48] ss:$16 sps:$4 sm:$0xff]   ;;  %v4541_v9 = vld [vmem:[#allocation13 + $0x80] ss:$16 sps:$4 sm:$0xff]  }
 0x1b8   : > { %1198 = vmatprep.subr.bf16.mxu1 %v4539_v2  ;;  %v4551_v8 = vld [vmem:[#allocation13 + $0x6c] ss:$16 sps:$4 sm:$0xff]   ;;  %v4543_v10 = vld [vmem:[#allocation13 + $0xa4] ss:$16 sps:$4 sm:$0xff]   ;;  %v4554_v11 = vld [vmem:[#allocation13 + $0x68] ss:$16 sps:$4 sm:$0xff]  }
 0x1b9   : > { %1158 = vmatpush1.bf16.msra.mxu0 %v4527_v29  ;;  %v4557_v12 = vld [vmem:[#allocation13 + $0x8c] ss:$16 sps:$4 sm:$0xff]   ;;  %v4547_v13 = vld [vmem:[#allocation13 + $0xa0] ss:$16 sps:$4 sm:$0xff]   ;;  %v4549_v14 = vld [vmem:[#allocation13 + $0xc4] ss:$16 sps:$4 sm:$0xff]  }
 0x1ba   : > { %1159 = vmatprep.subr.bf16.mxu0 %v4528_v34  ;;  %v4560_v15 = vld [vmem:[#allocation13 + $0x88] ss:$16 sps:$4 sm:$0xff]   ;;  %v4561_v16 = vld [vmem:[#allocation13 + $0xac] ss:$16 sps:$4 sm:$0xff]   ;;  %v4553_v17 = vld [vmem:[#allocation13 + $0xc0] ss:$16 sps:$4 sm:$0xff]  }
 0x1bb   : > { %1199 = vmatpush1.bf16.msra.mxu1 %v4542_v3  ;;  %v4555_v18 = vld [vmem:[#allocation13 + $0xe4] ss:$16 sps:$4 sm:$0xff]   ;;  %v4563_v19 = vld [vmem:[#allocation13 + $0xa8] ss:$16 sps:$4 sm:$0xff]   ;;  %v4564_v20 = vld [vmem:[#allocation13 + $0xcc] ss:$16 sps:$4 sm:$0xff]  }
 0x1bc   : > { %1200 = vmatprep.subr.bf16.mxu1 %v4545_v6  ;;  %v4559_v21 = vld [vmem:[#allocation13 + $0xe0] ss:$16 sps:$4 sm:$0xff]   ;;  %v4566_v22 = vld [vmem:[#allocation13 + $0xc8] ss:$16 sps:$4 sm:$0xff]   ;;  %v4567_v23 = vld [vmem:[#allocation13 + $0xec] ss:$16 sps:$4 sm:$0xff]  }
 0x1bd   : > { %1160 = vmatpush1.bf16.msra.mxu0 %v4530_v62  ;;  %v4569_v25 = vld [vmem:[#allocation13 + $0xe8] ss:$16 sps:$4 sm:$0xff]   ;;  %v958_v26 = vld [vmem:[%s957_s27] sm:$0xff]  ;;  %v960_v44 = vld [vmem:[%s957_s27 + $0x10] sm:$0xff]  ;;  %s950_s5 = sadd.s32 1, %s5034_s5  }
 0x1be   : > { %1161 = vmatprep.subr.bf16.mxu0 %v4531_v63  ;;  %v959_v27 = vld [vmem:[%s957_s27 + $0x8] sm:$0xff]  ;;  %v961_v46 = vld [vmem:[%s957_s27 + $0x18] sm:$0xff]  ;;  %p949_p1 = scmp.ge.s32.totalorder %s950_s5, %s5886_s0 }
 0x1bf   : > { %1201 = vmatpush1.bf16.msra.mxu1 %v4548_v7 }
 0x1c0   : > { %1202 = vmatprep.subr.bf16.mxu1 %v4551_v8 }
 0x1c1   : > { %1162 = vmatpush1.bf16.msra.mxu0 %v4535_v4 }
 0x1c2   : > { %1163 = vmatprep.subr.bf16.mxu0 %v4537_v5 }
 0x1c3   : > { %1203 = vmatpush1.bf16.msra.mxu1 %v4554_v11 }
 0x1c4   : > { %1204 = vmatprep.subr.bf16.mxu1 %v4557_v12 }
 0x1c5   : > { %1164 = vmatpush1.bf16.msra.mxu0 %v4541_v9 }
 0x1c6   : > { %1165 = vmatprep.subr.bf16.mxu0 %v4543_v10 }
 0x1c7   : > { %1205 = vmatpush1.bf16.msra.mxu1 %v4560_v15 }
 0x1c8   : > { %1206 = vmatprep.subr.bf16.mxu1 %v4561_v16 }
 0x1c9   : > { %1166 = vmatpush1.bf16.msra.mxu0 %v4547_v13 }
 0x1ca   : > { %1167 = vmatprep.subr.bf16.mxu0 %v4549_v14 }
 0x1cb   : > { %1207 = vmatpush1.bf16.msra.mxu1 %v4563_v19 }
 0x1cc   : > { %1208 = vmatprep.subr.bf16.mxu1 %v4564_v20 }
 0x1cd   : > { %1168 = vmatpush1.bf16.msra.mxu0 %v4553_v17 }
 0x1ce   : > { %1169 = vmatprep.subr.bf16.mxu0 %v4555_v18 }
 0x1cf   : > { %1209 = vmatpush1.bf16.msra.mxu1 %v4566_v22 }
 0x1d0   : > { %1210 = vmatprep.subr.bf16.mxu1 %v4567_v23 }
 0x1d1   : > { %1170 = vmatpush1.bf16.msra.mxu0 %v4559_v21 }
 0x1d3   : > { %1211 = vmatpush1.bf16.msra.mxu1 %v4569_v25 }
 0x1d4   : > { %1188 = vmatmul.mubr.bf16.vlgmr.msra.gmra.mrb[0].mxu0 %v994_v24 }
 0x1d6   : > { %1229 = vmatmul.mubr.bf16.vlgmr.msra.gmra.mrb[0].mxu1 %v994_v24 }
 0x234   : > { %v1270_v57 = vpop.permute.xlu0 %1269 }
 0x235   : > { %vm1271_vm1 = vcmp.eq.s32.totalorder %v1270_v57, 1 }
 0x2a7   : > { %v1189_v28 = vpop.f32.mrb[0].mxu0 }
 0x2a8   : > { %v1237_v31 = vadd.f32 %v1189_v28, %v958_v26  ;;  %v1191_v39 = vpop.f32.mrb[1].mxu0 }
 0x2a9   : > { %v1238_v40 = vadd.f32 %v1191_v39, %v959_v27  ;;  %v1193_v41 = vpop.f32.mrb[2].mxu0  ;;  %v1230_v47 = vpop.f32.mrb[0].mxu1 }
 0x2aa   : > { %v4040_v42 = vmul.f32 -1.442695, %v1237_v31  ;;  %v1194_v43 = vpop.f32.mrb[3].mxu0  ;;  %v1239_v48 = vadd.f32 %v1230_v47, %v960_v44  ;;  %v1232_v49 = vpop.f32.mrb[1].mxu1 }
 0x2ab   : > { %v4041_v45 = vmul.f32 -1.442695, %v1238_v40  ;;  %v1240_v50 = vadd.f32 %v1232_v49, %v961_v46  ;;  %v1234_v38 = vpop.f32.mrb[2].mxu1 }
 0x2ac   : > { %4570 = vpow2.f32 %v4040_v42  ;;  %v1235_v52 = vpop.f32.mrb[3].mxu1 }
 0x2ad   : > { %4572 = vpow2.f32 %v4041_v45  ;;  %v4042_v30 = vmul.f32 -1.442695, %v1240_v50 }
 0x2af   : > { %4574 = vpow2.f32 %v4042_v30 }
 0x2b0   : > { %4576 = vtanh.f32 %v1239_v48 }
 0x2b6   : > { %v4571_v53 = vpop.eup %4570 }
 0x2b7   : > { %v4573_v54 = vpop.eup %4572  ;;  %v1244_v55 = vadd.f32 1.0, %v4571_v53 }
 0x2b8   : > { %v1250_v51 = vadd.f32 1.0, %v4573_v54 }
 0x2b9   : > { %4578 = vrcp.f32 %v1244_v55  ;;  %v4575_v32 = vpop.eup %4574 }
 0x2ba   : > { %4580 = vrcp.f32 %v1250_v51  ;;  %v4577_v37 = vpop.eup %4576  ;;  %v1257_v33 = vadd.f32 1.0, %v4575_v32 }
 0x2bc   : > { %4582 = vrcp.f32 %v1257_v33 }
 0x2c3   : > { %v4579_v56 = vpop.eup %4578 }
 0x2c4   : > { %v4581_v58 = vpop.eup %4580  ;;  %v1261_v29 = vmul.f32 %v4579_v56, %v4577_v37 }
 0x2c5   : > { %v1260_v34 = vmul.f32 %v5026_v35, %v4581_v58 }
 0x2c6   : > { %v4583_v61 = vpop.eup %4582 }
 0x2c7   : > { %v1262_v59 = vadd.f32 %v1261_v29, %v1260_v34 }
 0x2c9   : > { %4584 = vtanh.f32 %v1262_v59  ;;  %v1273_v60 = vsel %vm1271_vm1, %v1262_v59, %v5026_v35  }
 0x2ca   : > { %v5899_v35 = vmov %v1273_v60  ;;  %v5901_v51 = vmov (%p949_p1), %v1273_v60 }
 0x2d1   :  { %952 = sbr.rel (!%p949_p1) target bundleno = 434 (0x1b2), region = 114 }
 0x2d3   : > { %v4585_v62 = vpop.eup %4584 }
 0x2d4   : > { %v1264_v63 = vmul.f32 %v4585_v62, %v4583_v61 }
 0x2d6   : > { %v1272_v2 = vsel %vm1271_vm1, %v1264_v63, %v5030_v36  }
 0x2d7   : > { %v5900_v36 = vmov %v1272_v2  ;;  %v5902_v32 = vmov (%p949_p1), %v1272_v2 }
 0x2d8 PF:  { %v5404_v36 = vld [vmem:[#allocation16 + $0x4] ss:$16 sps:$4 sm:$0xff]   ;;  %1503 = vmatprep.mubr.bf16.mxu1 %v5057_v0  ;;  %1812 = vmatprep.mubr.bf16.mxu0 %v5057_v0  ;;  %v5408_v3 = vld [vmem:[#allocation16] ss:$16 sps:$4 sm:$0xff]   ;;  %v5464_v16 = vld [vmem:[#allocation16 + $0xc] ss:$16 sps:$4 sm:$0xff]   ;;  %v1310_v18 = vpack.c.bf16 %v5042_v32, %v5042_v32  ;;  %v5042_v32 = vphi %v5361_v32, %v5902_v32   ;;  %v5038_v51 = vphi %v5359_v51, %v5901_v51  }
 0x2d9   :  { %1471 = vmatprep.subr.bf16.mxu1 %v5404_v36  ;;  %v5411_v1 = vld [vmem:[#allocation16 + $0x24] ss:$16 sps:$4 sm:$0xff]   ;;  %1780 = vmatprep.subr.bf16.mxu0 %v5404_v36  ;;  %v5415_v35 = vld [vmem:[#allocation16 + $0x20] ss:$16 sps:$4 sm:$0xff]   ;;  %v5470_v17 = vld [vmem:[#allocation16 + $0x8] ss:$16 sps:$4 sm:$0xff]  }
 0x2da   :  { %1472 = vmatpush1.bf16.msra.mxu1 %v5408_v3  ;;  %1781 = vmatpush1.bf16.msra.mxu0 %v5408_v3  ;;  %v5419_v4 = vld [vmem:[#allocation16 + $0x44] ss:$16 sps:$4 sm:$0xff]   ;;  %v5423_v5 = vld [vmem:[#allocation16 + $0x40] ss:$16 sps:$4 sm:$0xff]   ;;  %v5472_v19 = vld [vmem:[#allocation16 + $0x2c] ss:$16 sps:$4 sm:$0xff]  }
 0x2db   :  { %1473 = vmatprep.subr.bf16.mxu1 %v5411_v1  ;;  %1782 = vmatprep.subr.bf16.mxu0 %v5411_v1  ;;  %v5427_v6 = vld [vmem:[#allocation16 + $0x64] ss:$16 sps:$4 sm:$0xff]   ;;  %v5431_v7 = vld [vmem:[#allocation16 + $0x60] ss:$16 sps:$4 sm:$0xff]   ;;  %v5478_v20 = vld [vmem:[#allocation16 + $0x28] ss:$16 sps:$4 sm:$0xff]  }
 0x2dc   :  { %v5435_v8 = vld [vmem:[#allocation16 + $0x84] ss:$16 sps:$4 sm:$0xff]   ;;  %v5439_v9 = vld [vmem:[#allocation16 + $0x80] ss:$16 sps:$4 sm:$0xff]   ;;  %v5480_v21 = vld [vmem:[#allocation16 + $0x4c] ss:$16 sps:$4 sm:$0xff]  }
 0x2dd   :  { %v5443_v10 = vld [vmem:[#allocation16 + $0xa4] ss:$16 sps:$4 sm:$0xff]   ;;  %v5447_v11 = vld [vmem:[#allocation16 + $0xa0] ss:$16 sps:$4 sm:$0xff]   ;;  %v5486_v22 = vld [vmem:[#allocation16 + $0x48] ss:$16 sps:$4 sm:$0xff]  }
 0x2de   :  { %1474 = vmatpush1.bf16.msra.mxu1 %v5415_v35  ;;  %1783 = vmatpush1.bf16.msra.mxu0 %v5415_v35  ;;  %v5451_v12 = vld [vmem:[#allocation16 + $0xc4] ss:$16 sps:$4 sm:$0xff]   ;;  %v5454_v13 = vld [vmem:[#allocation16 + $0xc0] ss:$16 sps:$4 sm:$0xff]   ;;  %v5489_v23 = vld [vmem:[#allocation16 + $0x6c] ss:$16 sps:$4 sm:$0xff]  }
 0x2df   :  { %1475 = vmatprep.subr.bf16.mxu1 %v5419_v4  ;;  %1784 = vmatprep.subr.bf16.mxu0 %v5419_v4  ;;  %v5456_v14 = vld [vmem:[#allocation16 + $0xe4] ss:$16 sps:$4 sm:$0xff]   ;;  %v5462_v15 = vld [vmem:[#allocation16 + $0xe0] ss:$16 sps:$4 sm:$0xff]   ;;  %v5492_v24 = vld [vmem:[#allocation16 + $0x68] ss:$16 sps:$4 sm:$0xff]  }
 0x2e0   :  { %v5495_v25 = vld [vmem:[#allocation16 + $0x8c] ss:$16 sps:$4 sm:$0xff]   ;;  %v5498_v26 = vld [vmem:[#allocation16 + $0x88] ss:$16 sps:$4 sm:$0xff]   ;;  %v1274_v47 = vld [vmem:[#allocation3] sm:$0xff] }
 0x2e1   :  { %v5501_v27 = vld [vmem:[#allocation16 + $0xac] ss:$16 sps:$4 sm:$0xff]   ;;  %v5504_v28 = vld [vmem:[#allocation16 + $0xa8] ss:$16 sps:$4 sm:$0xff]   ;;  %v1276_v55 = vld [vmem:[#allocation3 + $0x10] sm:$0xff] }
 0x2e2   :  { %1476 = vmatpush1.bf16.msra.mxu1 %v5423_v5  ;;  %1785 = vmatpush1.bf16.msra.mxu0 %v5423_v5  ;;  %v5507_v31 = vld [vmem:[#allocation16 + $0xcc] ss:$16 sps:$4 sm:$0xff]   ;;  %v5510_v39 = vld [vmem:[#allocation16 + $0xc8] ss:$16 sps:$4 sm:$0xff]  }
 0x2e3   :  { %1477 = vmatprep.subr.bf16.mxu1 %v5427_v6  ;;  %1786 = vmatprep.subr.bf16.mxu0 %v5427_v6  ;;  %v5513_v40 = vld [vmem:[#allocation16 + $0xec] ss:$16 sps:$4 sm:$0xff]   ;;  %v5516_v41 = vld [vmem:[#allocation16 + $0xe8] ss:$16 sps:$4 sm:$0xff]  }
 0x2e4   :  { %v1275_v46 = vld [vmem:[#allocation3 + $0x8] sm:$0xff]  ;;  %v1277_v32 = vld [vmem:[#allocation3 + $0x18] sm:$0xff] }
 0x2e6   :  { %1478 = vmatpush1.bf16.msra.mxu1 %v5431_v7  ;;  %1787 = vmatpush1.bf16.msra.mxu0 %v5431_v7 }
 0x2e7   :  { %1479 = vmatprep.subr.bf16.mxu1 %v5435_v8  ;;  %1788 = vmatprep.subr.bf16.mxu0 %v5435_v8 }
 0x2ea   :  { %1480 = vmatpush1.bf16.msra.mxu1 %v5439_v9  ;;  %1789 = vmatpush1.bf16.msra.mxu0 %v5439_v9 }
 0x2eb   :  { %1481 = vmatprep.subr.bf16.mxu1 %v5443_v10  ;;  %1790 = vmatprep.subr.bf16.mxu0 %v5443_v10 }
 0x2ee   :  { %1482 = vmatpush1.bf16.msra.mxu1 %v5447_v11  ;;  %1791 = vmatpush1.bf16.msra.mxu0 %v5447_v11 }
 0x2ef   :  { %1483 = vmatprep.subr.bf16.mxu1 %v5451_v12  ;;  %1792 = vmatprep.subr.bf16.mxu0 %v5451_v12 }
 0x2f2   :  { %1484 = vmatpush1.bf16.msra.mxu1 %v5454_v13  ;;  %1793 = vmatpush1.bf16.msra.mxu0 %v5454_v13 }
 0x2f3   :  { %1485 = vmatprep.subr.bf16.mxu1 %v5456_v14  ;;  %1794 = vmatprep.subr.bf16.mxu0 %v5456_v14 }
 0x2f6   :  { %1486 = vmatpush1.bf16.msra.mxu1 %v5462_v15  ;;  %1795 = vmatpush1.bf16.msra.mxu0 %v5462_v15 }
 0x2f7   :  { %1512 = vmatprep.subr.bf16.mxu1 %v5464_v16  ;;  %2090 = vmatprep.subr.bf16.mxu0 %v5404_v36 }
 0x2f9   :  { %1504 = vmatmul.mubr.bf16.vlgmr.msra.gmra.mrb[0].mxu1 %v1310_v18 }
 0x2fa   :  { %1513 = vmatpush1.bf16.msra.mxu1 %v5470_v17  ;;  %1544 = vmatprep.mubr.bf16.mxu1 %v5057_v0 }
 0x2fb   :  { %1514 = vmatprep.subr.bf16.mxu1 %v5472_v19 }
 0x2fe   :  { %1515 = vmatpush1.bf16.msra.mxu1 %v5478_v20 }
 0x2ff   :  { %1516 = vmatprep.subr.bf16.mxu1 %v5480_v21 }
 0x302   :  { %1517 = vmatpush1.bf16.msra.mxu1 %v5486_v22 }
 0x303   :  { %1518 = vmatprep.subr.bf16.mxu1 %v5489_v23 }
 0x306   :  { %1519 = vmatpush1.bf16.msra.mxu1 %v5492_v24 }
 0x307   :  { %1520 = vmatprep.subr.bf16.mxu1 %v5495_v25 }
 0x30a   :  { %1521 = vmatpush1.bf16.msra.mxu1 %v5498_v26 }
 0x30b   :  { %1522 = vmatprep.subr.bf16.mxu1 %v5501_v27 }
 0x30e   :  { %1523 = vmatpush1.bf16.msra.mxu1 %v5504_v28 }
 0x30f   :  { %1524 = vmatprep.subr.bf16.mxu1 %v5507_v31 }
 0x312   :  { %1525 = vmatpush1.bf16.msra.mxu1 %v5510_v39 }
 0x313   :  { %1526 = vmatprep.subr.bf16.mxu1 %v5513_v40 }
 0x316   :  { %1527 = vmatpush1.bf16.msra.mxu1 %v5516_v41 }
 0x317   :  { %1821 = vmatprep.subr.bf16.mxu1 %v5464_v16 }
 0x319   :  { %1545 = vmatmul.mubr.bf16.vlgmr.msra.gmra.mrb[4].mxu1 %v1310_v18 }
 0x31a   :  { %1822 = vmatpush1.bf16.msra.mxu1 %v5470_v17  ;;  %1853 = vmatprep.mubr.bf16.mxu1 %v5057_v0 }
 0x31b   :  { %1823 = vmatprep.subr.bf16.mxu1 %v5472_v19 }
 0x31e   :  { %1824 = vmatpush1.bf16.msra.mxu1 %v5478_v20 }
 0x31f   :  { %1825 = vmatprep.subr.bf16.mxu1 %v5480_v21 }
 0x322   :  { %1826 = vmatpush1.bf16.msra.mxu1 %v5486_v22 }
 0x323   :  { %1827 = vmatprep.subr.bf16.mxu1 %v5489_v23 }
 0x326   :  { %1828 = vmatpush1.bf16.msra.mxu1 %v5492_v24 }
 0x327   :  { %1829 = vmatprep.subr.bf16.mxu1 %v5495_v25 }
 0x32a   :  { %1830 = vmatpush1.bf16.msra.mxu1 %v5498_v26 }
 0x32b   :  { %1831 = vmatprep.subr.bf16.mxu1 %v5501_v27 }
 0x32e   :  { %1832 = vmatpush1.bf16.msra.mxu1 %v5504_v28 }
 0x32f   :  { %1833 = vmatprep.subr.bf16.mxu1 %v5507_v31 }
 0x332   :  { %1834 = vmatpush1.bf16.msra.mxu1 %v5510_v39 }
 0x333   :  { %1835 = vmatprep.subr.bf16.mxu1 %v5513_v40 }
 0x336   :  { %1836 = vmatpush1.bf16.msra.mxu1 %v5516_v41 }
 0x337   :  { %2131 = vmatprep.subr.bf16.mxu1 %v5464_v16 }
 0x3cc   :  { %v1505_v42 = vpop.f32.mrb[0].mxu1 }
 0x3cd   :  { %v1507_v43 = vpop.f32.mrb[1].mxu1  ;;  %v1553_v49 = vadd.f32 %v1505_v42, %v1274_v47  ;;  %v1584_v47 = vld [vmem:[#allocation3 + $0x28] sm:$0xff] }
 0x3ce   :  { %v1509_v44 = vpop.f32.mrb[2].mxu1  ;;  %v1554_v48 = vadd.f32 %v1507_v43, %v1275_v46 }
 0x3cf   :  { %v1510_v45 = vpop.f32.mrb[3].mxu1  ;;  %v4075_v38 = vmul.f32 -1.442695, %v1553_v49 }
 0x3d0   :  { %v4076_v50 = vmul.f32 -1.442695, %v1554_v48 }
 0x3d2   :  { %4690 = vpow2.f32 %v4076_v50 }
 0x3d3   :  { %4692 = vpow2.f32 %v4075_v38 }
 0x3dc   :  { %v4691_v52 = vpop.eup %4690 }
 0x3dd   :  { %v4693_v30 = vpop.eup %4692  ;;  %v1566_v53 = vadd.f32 1.0, %v4691_v52 }
 0x3de   :  { %v1560_v54 = vadd.f32 1.0, %v4693_v30 }
 0x3df   :  { %4694 = vrcp.f32 %v1566_v53 }
 0x3e0   :  { %4696 = vrcp.f32 %v1560_v54 }
 0x3e9   :  { %v4695_v59 = vpop.eup %4694 }
 0x3ea   :  { %v4697_v60 = vpop.eup %4696  ;;  %v1576_v62 = vmul.f32 %v5038_v51, %v4695_v59  ;;  %v1583_v51 = vld [vmem:[#allocation3 + $0x20] sm:$0xff] }
 0x3ec   :  { %v1546_v37 = vpop.f32.mrb[4].mxu1 }
 0x3ed   :  { %v1555_v56 = vadd.f32 %v1546_v37, %v1276_v55  ;;  %v1548_v33 = vpop.f32.mrb[5].mxu1 }
 0x3ee   :  { %v1556_v57 = vadd.f32 %v1548_v33, %v1277_v32  ;;  %v1550_v58 = vpop.f32.mrb[6].mxu1  ;;  %v1586_v33 = vld [vmem:[#allocation3 + $0x38] sm:$0xff] }
 0x3ef   :  { %4698 = vtanh.f32 %v1555_v56  ;;  %v1551_v29 = vpop.f32.mrb[7].mxu1 }
 0x3f0   :  { %v4077_v34 = vmul.f32 -1.442695, %v1556_v57  ;;  %v1585_v57 = vld [vmem:[#allocation3 + $0x30] sm:$0xff] }
 0x3f2   :  { %4700 = vpow2.f32 %v4077_v34 }
 0x3f9   :  { %v4699_v61 = vpop.eup %4698 }
 0x3fa   :  { %v1577_v63 = vmul.f32 %v4699_v61, %v4697_v60 }
 0x3fc   :  { %v4701_v2 = vpop.eup %4700  ;;  %v5539_v18 = vadd.f32 %v1577_v63, %v1576_v62 }
 0x3fd   :  { %v1573_v42 = vadd.f32 1.0, %v4701_v2 }
 0x3fe   :  { %4702 = vtanh.f32 %v5539_v18 }
 0x3ff   :  { %4704 = vrcp.f32 %v1573_v42 }
 0x408   :  { %v4703_v43 = vpop.eup %4702 }
 0x409   :  { %v4705_v44 = vpop.eup %4704 }
 0x40a   :  { %v5542_v45 = vmul.f32 %v4705_v44, %v4703_v43 }
 0x40c   :  { %v1619_v46 = vpack.c.bf16 %v5542_v45, %v5542_v45 }
 0x40e   :  { %1813 = vmatmul.mubr.bf16.vlgmr.msra.gmra.mrb[0].mxu0 %v1619_v46  ;;  %1854 = vmatmul.mubr.bf16.vlgmr.msra.gmra.mrb[8].mxu1 %v1619_v46 }
 0x40f   :  { %2091 = vmatpush1.bf16.msra.mxu0 %v5408_v3  ;;  %2132 = vmatpush1.bf16.msra.mxu1 %v5470_v17 }
 0x410   :  { %2092 = vmatprep.subr.bf16.mxu0 %v5411_v1  ;;  %2133 = vmatprep.subr.bf16.mxu1 %v5472_v19 }
 0x411   :  { %2122 = vmatprep.mubr.bf16.mxu0 %v5057_v0  ;;  %2163 = vmatprep.mubr.bf16.mxu1 %v5057_v0 }
 0x413   :  { %2093 = vmatpush1.bf16.msra.mxu0 %v5415_v35  ;;  %2134 = vmatpush1.bf16.msra.mxu1 %v5478_v20 }
 0x414   :  { %2094 = vmatprep.subr.bf16.mxu0 %v5419_v4  ;;  %2135 = vmatprep.subr.bf16.mxu1 %v5480_v21 }
 0x417   :  { %2095 = vmatpush1.bf16.msra.mxu0 %v5423_v5  ;;  %2136 = vmatpush1.bf16.msra.mxu1 %v5486_v22 }
 0x418   :  { %2096 = vmatprep.subr.bf16.mxu0 %v5427_v6  ;;  %2137 = vmatprep.subr.bf16.mxu1 %v5489_v23 }
 0x41b   :  { %2097 = vmatpush1.bf16.msra.mxu0 %v5431_v7  ;;  %2138 = vmatpush1.bf16.msra.mxu1 %v5492_v24 }
 0x41c   :  { %2098 = vmatprep.subr.bf16.mxu0 %v5435_v8  ;;  %2139 = vmatprep.subr.bf16.mxu1 %v5495_v25 }
 0x41f   :  { %2099 = vmatpush1.bf16.msra.mxu0 %v5439_v9  ;;  %2140 = vmatpush1.bf16.msra.mxu1 %v5498_v26 }
 0x420   :  { %2100 = vmatprep.subr.bf16.mxu0 %v5443_v10  ;;  %2141 = vmatprep.subr.bf16.mxu1 %v5501_v27 }
 0x423   :  { %2101 = vmatpush1.bf16.msra.mxu0 %v5447_v11  ;;  %2142 = vmatpush1.bf16.msra.mxu1 %v5504_v28 }
 0x424   :  { %2102 = vmatprep.subr.bf16.mxu0 %v5451_v12  ;;  %2143 = vmatprep.subr.bf16.mxu1 %v5507_v31 }
 0x427   :  { %2103 = vmatpush1.bf16.msra.mxu0 %v5454_v13  ;;  %2144 = vmatpush1.bf16.msra.mxu1 %v5510_v39 }
 0x428   :  { %2104 = vmatprep.subr.bf16.mxu0 %v5456_v14  ;;  %2145 = vmatprep.subr.bf16.mxu1 %v5513_v40 }
 0x42b   :  { %2105 = vmatpush1.bf16.msra.mxu0 %v5462_v15  ;;  %2146 = vmatpush1.bf16.msra.mxu1 %v5516_v41 }
 0x42c   :  { %2400 = vmatprep.subr.bf16.mxu0 %v5404_v36  ;;  %2441 = vmatprep.subr.bf16.mxu1 %v5464_v16 }
 0x4e1   :  { %v1814_v48 = vpop.f32.mrb[0].mxu0  ;;  %v1855_v49 = vpop.f32.mrb[8].mxu1 }
 0x4e2   :  { %v1862_v50 = vadd.f32 %v1814_v48, %v1583_v51  ;;  %v1816_v38 = vpop.f32.mrb[1].mxu0  ;;  %v1857_v52 = vpop.f32.mrb[9].mxu1  ;;  %v1864_v29 = vadd.f32 %v1855_v49, %v1585_v57  ;;  %v5640_v57 = vld [vmem:[#allocation16] ss:$16 sps:$4 sm:$0xff]  }
 0x4e3   :  { %v1863_v30 = vadd.f32 %v1816_v38, %v1584_v47  ;;  %v1818_v53 = vpop.f32.mrb[2].mxu0  ;;  %v1859_v54 = vpop.f32.mrb[10].mxu1  ;;  %v1865_v36 = vadd.f32 %v1857_v52, %v1586_v33 }
 0x4e4   :  { %v4110_v55 = vmul.f32 -1.442695, %v1862_v50  ;;  %v1819_v32 = vpop.f32.mrb[3].mxu0  ;;  %v1860_v37 = vpop.f32.mrb[11].mxu1 }
 0x4e5   :  { %v4111_v56 = vmul.f32 -1.442695, %v1863_v30  ;;  %v4112_v58 = vmul.f32 -1.442695, %v1865_v36  ;;  %v5638_v36 = vld [vmem:[#allocation16 + $0x4] ss:$16 sps:$4 sm:$0xff]  }
 0x4e6   :  { %4706 = vpow2.f32 %v4110_v55 }
 0x4e7   :  { %4708 = vpow2.f32 %v4111_v56 }
 0x4e8   :  { %4710 = vpow2.f32 %v4112_v58  ;;  %v5664_v58 = vld [vmem:[#allocation16 + $0x8c] ss:$16 sps:$4 sm:$0xff]  }
 0x4e9   :  { %4712 = vtanh.f32 %v1864_v29  ;;  %v5666_v29 = vld [vmem:[#allocation16 + $0x80] ss:$16 sps:$4 sm:$0xff]  }
 0x4f0   :  { %v4707_v34 = vpop.eup %4706 }
 0x4f1   :  { %v4709_v59 = vpop.eup %4708  ;;  %v1869_v60 = vadd.f32 1.0, %v4707_v34  ;;  %v5668_v34 = vld [vmem:[#allocation16 + $0x88] ss:$16 sps:$4 sm:$0xff]  }
 0x4f2   :  { %v1875_v61 = vadd.f32 1.0, %v4709_v59  ;;  %v4711_v62 = vpop.eup %4710  ;;  %v5672_v59 = vld [vmem:[#allocation16 + $0xa4] ss:$16 sps:$4 sm:$0xff]  }
 0x4f3   :  { %4714 = vrcp.f32 %v1869_v60  ;;  %v4713_v63 = vpop.eup %4712  ;;  %v1882_v44 = vadd.f32 1.0, %v4711_v62  ;;  %v5676_v60 = vld [vmem:[#allocation16 + $0xa0] ss:$16 sps:$4 sm:$0xff]   ;;  %v5680_v62 = vld [vmem:[#allocation16 + $0xac] ss:$16 sps:$4 sm:$0xff]  }
 0x4f4   :  { %4716 = vrcp.f32 %v1875_v61  ;;  %v5678_v61 = vld [vmem:[#allocation16 + $0xa8] ss:$16 sps:$4 sm:$0xff]  }
 0x4f5   :  { %4718 = vrcp.f32 %v1882_v44  ;;  %v5696_v44 = vld [vmem:[#allocation16 + $0xe4] ss:$16 sps:$4 sm:$0xff]  }
 0x4fd   :  { %v4715_v2 = vpop.eup %4714 }
 0x4fe   :  { %v4717_v42 = vpop.eup %4716  ;;  %v1886_v43 = vmul.f32 %v4715_v2, %v4713_v63  ;;  %v5683_v63 = vld [vmem:[#allocation16 + $0xc4] ss:$16 sps:$4 sm:$0xff]   ;;  %v5685_v2 = vld [vmem:[#allocation16 + $0xcc] ss:$16 sps:$4 sm:$0xff]  }
 0x4ff   :  { %v1885_v46 = vmul.f32 %v4717_v42, %v5539_v18  ;;  %v4719_v47 = vpop.eup %4718  ;;  %v5690_v42 = vld [vmem:[#allocation16 + $0xc0] ss:$16 sps:$4 sm:$0xff]  }
 0x501   :  { %v5581_v51 = vadd.f32 %v1886_v43, %v1885_v46  ;;  %v5692_v43 = vld [vmem:[#allocation16 + $0xc8] ss:$16 sps:$4 sm:$0xff]   ;;  %v5698_v46 = vld [vmem:[#allocation16 + $0xec] ss:$16 sps:$4 sm:$0xff]  }
 0x503   :  { %4720 = vtanh.f32 %v5581_v51 }
 0x50d   :  { %v4721_v48 = vpop.eup %4720 }
 0x50e   :  { %v5584_v49 = vmul.f32 %v4721_v48, %v4719_v47  ;;  %v5704_v47 = vld [vmem:[#allocation16 + $0xe8] ss:$16 sps:$4 sm:$0xff]   ;;  %v2203_v48 = vld [vmem:[#allocation3 + $0x60] sm:$0xff] }
 0x510   :  { %v1929_v50 = vpack.c.bf16 %v5584_v49, %v5584_v49 }
 0x512   :  { %2123 = vmatmul.mubr.bf16.vlgmr.msra.gmra.mrb[4].mxu0 %v1929_v50  ;;  %2164 = vmatmul.mubr.bf16.vlgmr.msra.gmra.mrb[12].mxu1 %v1929_v50  ;;  %v2204_v50 = vld [vmem:[#allocation3 + $0x68] sm:$0xff] }
 0x513   :  { %2401 = vmatpush1.bf16.msra.mxu0 %v5408_v3  ;;  %2442 = vmatpush1.bf16.msra.mxu1 %v5470_v17  ;;  %v1893_v3 = vld [vmem:[#allocation3 + $0x40] sm:$0xff] }
 0x514   :  { %2402 = vmatprep.subr.bf16.mxu0 %v5411_v1  ;;  %2443 = vmatprep.subr.bf16.mxu1 %v5472_v19  ;;  %v1894_v1 = vld [vmem:[#allocation3 + $0x48] sm:$0xff] }
 0x515   :  { %2432 = vmatprep.mubr.bf16.mxu0 %v5057_v0  ;;  %2473 = vmatprep.mubr.bf16.mxu1 %v5057_v0 }
 0x517   :  { %2403 = vmatpush1.bf16.msra.mxu0 %v5415_v35  ;;  %2444 = vmatpush1.bf16.msra.mxu1 %v5478_v20 }
 0x518   :  { %2404 = vmatprep.subr.bf16.mxu0 %v5419_v4  ;;  %2445 = vmatprep.subr.bf16.mxu1 %v5480_v21 }
 0x51b   :  { %2405 = vmatpush1.bf16.msra.mxu0 %v5423_v5  ;;  %2446 = vmatpush1.bf16.msra.mxu1 %v5486_v22 }
 0x51c   :  { %2406 = vmatprep.subr.bf16.mxu0 %v5427_v6  ;;  %2447 = vmatprep.subr.bf16.mxu1 %v5489_v23 }
 0x51f   :  { %2407 = vmatpush1.bf16.msra.mxu0 %v5431_v7  ;;  %2448 = vmatpush1.bf16.msra.mxu1 %v5492_v24 }
 0x520   :  { %2408 = vmatprep.subr.bf16.mxu0 %v5435_v8  ;;  %2449 = vmatprep.subr.bf16.mxu1 %v5495_v25 }
 0x523   :  { %2409 = vmatpush1.bf16.msra.mxu0 %v5439_v9  ;;  %2450 = vmatpush1.bf16.msra.mxu1 %v5498_v26  ;;  %v1895_v26 = vld [vmem:[#allocation3 + $0x50] sm:$0xff] }
 0x524   :  { %2410 = vmatprep.subr.bf16.mxu0 %v5443_v10  ;;  %2451 = vmatprep.subr.bf16.mxu1 %v5501_v27 }
 0x527   :  { %2411 = vmatpush1.bf16.msra.mxu0 %v5447_v11  ;;  %2452 = vmatpush1.bf16.msra.mxu1 %v5504_v28 }
 0x528   :  { %2412 = vmatprep.subr.bf16.mxu0 %v5451_v12  ;;  %2453 = vmatprep.subr.bf16.mxu1 %v5507_v31 }
 0x52b   :  { %2413 = vmatpush1.bf16.msra.mxu0 %v5454_v13  ;;  %2454 = vmatpush1.bf16.msra.mxu1 %v5510_v39 }
 0x52c   :  { %2414 = vmatprep.subr.bf16.mxu0 %v5456_v14  ;;  %2455 = vmatprep.subr.bf16.mxu1 %v5513_v40 }
 0x52f   :  { %2415 = vmatpush1.bf16.msra.mxu0 %v5462_v15  ;;  %2456 = vmatpush1.bf16.msra.mxu1 %v5516_v41  ;;  %v1896_v15 = vld [vmem:[#allocation3 + $0x58] sm:$0xff] }
 0x530   :  { %2751 = vmatprep.subr.bf16.mxu1 %v5464_v16  ;;  %2710 = vmatprep.subr.bf16.mxu0 %v5638_v36 }
 0x5e5   :  { %v2124_v35 = vpop.f32.mrb[4].mxu0  ;;  %v2165_v4 = vpop.f32.mrb[12].mxu1 }
 0x5e6   :  { %v2172_v5 = vadd.f32 %v2124_v35, %v1893_v3  ;;  %v2126_v6 = vpop.f32.mrb[5].mxu0  ;;  %v2167_v7 = vpop.f32.mrb[13].mxu1  ;;  %v2174_v27 = vadd.f32 %v2165_v4, %v1895_v26 }
 0x5e7   :  { %v2173_v8 = vadd.f32 %v2126_v6, %v1894_v1  ;;  %v2128_v9 = vpop.f32.mrb[6].mxu0  ;;  %v2169_v10 = vpop.f32.mrb[14].mxu1  ;;  %v2175_v25 = vadd.f32 %v2167_v7, %v1896_v15  ;;  %v2205_v15 = vld [vmem:[#allocation3 + $0x70] sm:$0xff] }
 0x5e8   :  { %v4145_v11 = vmul.f32 -1.442695, %v2172_v5  ;;  %v2129_v12 = vpop.f32.mrb[7].mxu0  ;;  %v2170_v13 = vpop.f32.mrb[15].mxu1 }
 0x5e9   :  { %v4146_v14 = vmul.f32 -1.442695, %v2173_v8  ;;  %v4147_v16 = vmul.f32 -1.442695, %v2175_v25  ;;  %v2206_v13 = vld [vmem:[#allocation3 + $0x78] sm:$0xff] }
 0x5ea   :  { %4722 = vpow2.f32 %v4145_v11 }
 0x5eb   :  { %4724 = vpow2.f32 %v4146_v14 }
 0x5ec   :  { %4726 = vpow2.f32 %v4147_v16 }
 0x5ed   :  { %4728 = vtanh.f32 %v2174_v27 }
 0x5f4   :  { %v4723_v28 = vpop.eup %4722 }
 0x5f5   :  { %v4725_v31 = vpop.eup %4724  ;;  %v2179_v39 = vadd.f32 1.0, %v4723_v28 }
 0x5f6   :  { %v2185_v40 = vadd.f32 1.0, %v4725_v31  ;;  %v4727_v41 = vpop.eup %4726 }
 0x5f7   :  { %4730 = vrcp.f32 %v2179_v39  ;;  %v4729_v18 = vpop.eup %4728  ;;  %v2192_v53 = vadd.f32 1.0, %v4727_v41 }
 0x5f8   :  { %4732 = vrcp.f32 %v2185_v40 }
 0x5f9   :  { %4734 = vrcp.f32 %v2192_v53 }
 0x601   :  { %v4731_v38 = vpop.eup %4730 }
 0x602   :  { %v4733_v52 = vpop.eup %4732  ;;  %v2196_v30 = vmul.f32 %v4731_v38, %v4729_v18 }
 0x603   :  { %v2195_v54 = vmul.f32 %v4733_v52, %v5581_v51  ;;  %v4735_v32 = vpop.eup %4734  ;;  %v5702_v51 = vld [vmem:[#allocation16 + $0xe0] ss:$16 sps:$4 sm:$0xff]  }
 0x605   :  { %v5622_v55 = vadd.f32 %v2196_v30, %v2195_v54 }
 0x607   :  { %4736 = vtanh.f32 %v5622_v55 }
 0x611   :  { %v4737_v37 = vpop.eup %4736 }
 0x612   :  { %v5625_v56 = vmul.f32 %v4737_v37, %v4735_v32 }
 0x614   :  { %v2239_v33 = vpack.c.bf16 %v5625_v56, %v5625_v56 }
 0x616   :  { %2433 = vmatmul.mubr.bf16.vlgmr.msra.gmra.mrb[8].mxu0 %v2239_v33  ;;  %2474 = vmatmul.mubr.bf16.vlgmr.msra.gmra.mrb[16].mxu1 %v2239_v33 }
 0x617   :  { %2752 = vmatpush1.bf16.msra.mxu1 %v5470_v17  ;;  %2742 = vmatprep.mubr.bf16.mxu0 %v5057_v0  ;;  %v5644_v17 = vld [vmem:[#allocation16 + $0x24] ss:$16 sps:$4 sm:$0xff]  }
 0x618   :  { %2753 = vmatprep.subr.bf16.mxu1 %v5472_v19  ;;  %2783 = vmatprep.mubr.bf16.mxu1 %v5057_v0  ;;  %v5646_v19 = vld [vmem:[#allocation16 + $0x20] ss:$16 sps:$4 sm:$0xff]  }
 0x619   :  { %2711 = vmatpush1.bf16.msra.mxu0 %v5640_v57 }
 0x61a   :  { %2712 = vmatprep.subr.bf16.mxu0 %v5644_v17 }
 0x61b   :  { %2754 = vmatpush1.bf16.msra.mxu1 %v5478_v20  ;;  %v5650_v20 = vld [vmem:[#allocation16 + $0x44] ss:$16 sps:$4 sm:$0xff]  }
 0x61c   :  { %2755 = vmatprep.subr.bf16.mxu1 %v5480_v21  ;;  %v5652_v21 = vld [vmem:[#allocation16 + $0x40] ss:$16 sps:$4 sm:$0xff]  }
 0x61d   :  { %2713 = vmatpush1.bf16.msra.mxu0 %v5646_v19 }
 0x61e   :  { %2714 = vmatprep.subr.bf16.mxu0 %v5650_v20 }
 0x61f   :  { %2756 = vmatpush1.bf16.msra.mxu1 %v5486_v22  ;;  %v5656_v22 = vld [vmem:[#allocation16 + $0x64] ss:$16 sps:$4 sm:$0xff]  }
 0x620   :  { %2757 = vmatprep.subr.bf16.mxu1 %v5489_v23  ;;  %v5658_v23 = vld [vmem:[#allocation16 + $0x60] ss:$16 sps:$4 sm:$0xff]  }
 0x621   :  { %2715 = vmatpush1.bf16.msra.mxu0 %v5652_v21 }
 0x622   :  { %2716 = vmatprep.subr.bf16.mxu0 %v5656_v22 }
 0x623   :  { %2758 = vmatpush1.bf16.msra.mxu1 %v5492_v24  ;;  %v5662_v24 = vld [vmem:[#allocation16 + $0x84] ss:$16 sps:$4 sm:$0xff]  }
 0x624   :  { %2759 = vmatprep.subr.bf16.mxu1 %v5664_v58 }
 0x625   :  { %2717 = vmatpush1.bf16.msra.mxu0 %v5658_v23 }
 0x626   :  { %2718 = vmatprep.subr.bf16.mxu0 %v5662_v24 }
 0x627   :  { %2760 = vmatpush1.bf16.msra.mxu1 %v5668_v34 }
 0x628   :  { %2761 = vmatprep.subr.bf16.mxu1 %v5680_v62 }
 0x629   :  { %2719 = vmatpush1.bf16.msra.mxu0 %v5666_v29 }
 0x62a   :  { %2720 = vmatprep.subr.bf16.mxu0 %v5672_v59 }
 0x62b   :  { %2762 = vmatpush1.bf16.msra.mxu1 %v5678_v61 }
 0x62c   :  { %2763 = vmatprep.subr.bf16.mxu1 %v5685_v2 }
 0x62d   :  { %2721 = vmatpush1.bf16.msra.mxu0 %v5676_v60 }
 0x62e   :  { %2722 = vmatprep.subr.bf16.mxu0 %v5683_v63 }
 0x62f   :  { %2764 = vmatpush1.bf16.msra.mxu1 %v5692_v43 }
 0x630   :  { %2765 = vmatprep.subr.bf16.mxu1 %v5698_v46 }
 0x631   :  { %2723 = vmatpush1.bf16.msra.mxu0 %v5690_v42 }
 0x632   :  { %2724 = vmatprep.subr.bf16.mxu0 %v5696_v44 }
 0x633   :  { %2766 = vmatpush1.bf16.msra.mxu1 %v5704_v47 }
 0x635   :  { %2725 = vmatpush1.bf16.msra.mxu0 %v5702_v51 }
 0x636   :  { %3020 = vmatprep.subr.bf16.mxu0 %v5638_v36 }
 0x6e9   :  { %v2434_v3 = vpop.f32.mrb[8].mxu0  ;;  %v2475_v1 = vpop.f32.mrb[16].mxu1 }
 0x6ea   :  { %v2482_v35 = vadd.f32 %v2434_v3, %v2203_v48  ;;  %v2436_v4 = vpop.f32.mrb[9].mxu0  ;;  %v2477_v5 = vpop.f32.mrb[17].mxu1  ;;  %v2484_v26 = vadd.f32 %v2475_v1, %v2205_v15  ;;  %v5739_v48 = vld [vmem:[#allocation16 + $0x8] ss:$16 sps:$4 sm:$0xff]   ;;  %v5749_v1 = vld [vmem:[#allocation16 + $0x4c] ss:$16 sps:$4 sm:$0xff]  }
 0x6eb   :  { %v2483_v6 = vadd.f32 %v2436_v4, %v2204_v50  ;;  %v2438_v7 = vpop.f32.mrb[10].mxu0  ;;  %v2479_v8 = vpop.f32.mrb[18].mxu1  ;;  %v2485_v14 = vadd.f32 %v2477_v5, %v2206_v13  ;;  %v5743_v50 = vld [vmem:[#allocation16 + $0x2c] ss:$16 sps:$4 sm:$0xff]   ;;  %v5745_v3 = vld [vmem:[#allocation16 + $0x28] ss:$16 sps:$4 sm:$0xff]  }
 0x6ec   :  { %v4180_v9 = vmul.f32 -1.442695, %v2482_v35  ;;  %v2439_v10 = vpop.f32.mrb[11].mxu0  ;;  %v2480_v11 = vpop.f32.mrb[19].mxu1  ;;  %v5751_v35 = vld [vmem:[#allocation16 + $0x48] ss:$16 sps:$4 sm:$0xff]  }
 0x6ed   :  { %v4181_v12 = vmul.f32 -1.442695, %v2483_v6  ;;  %v4182_v25 = vmul.f32 -1.442695, %v2485_v14  ;;  %v5755_v4 = vld [vmem:[#allocation16 + $0x6c] ss:$16 sps:$4 sm:$0xff]  }
 0x6ee   :  { %4738 = vpow2.f32 %v4180_v9  ;;  %v5757_v5 = vld [vmem:[#allocation16 + $0x68] ss:$16 sps:$4 sm:$0xff]   ;;  %v2513_v6 = vld [vmem:[#allocation3 + $0x80] sm:$0xff] }
 0x6ef   :  { %4740 = vpow2.f32 %v4181_v12  ;;  %v2514_v7 = vld [vmem:[#allocation3 + $0x88] sm:$0xff] }
 0x6f0   :  { %4742 = vpow2.f32 %v4182_v25 }
 0x6f1   :  { %4744 = vtanh.f32 %v2484_v26 }
 0x6f8   :  { %v4739_v16 = vpop.eup %4738 }
 0x6f9   :  { %v4741_v27 = vpop.eup %4740  ;;  %v2489_v28 = vadd.f32 1.0, %v4739_v16 }
 0x6fa   :  { %v2495_v31 = vadd.f32 1.0, %v4741_v27  ;;  %v4743_v39 = vpop.eup %4742 }
 0x6fb   :  { %4746 = vrcp.f32 %v2489_v28  ;;  %v4745_v40 = vpop.eup %4744  ;;  %v2502_v52 = vadd.f32 1.0, %v4743_v39  ;;  %v2516_v28 = vld [vmem:[#allocation3 + $0x98] sm:$0xff]  ;;  %v2515_v39 = vld [vmem:[#allocation3 + $0x90] sm:$0xff] }
 0x6fc   :  { %4748 = vrcp.f32 %v2495_v31 }
 0x6fd   :  { %4750 = vrcp.f32 %v2502_v52 }
 0x705   :  { %v4747_v41 = vpop.eup %4746 }
 0x706   :  { %v4749_v18 = vpop.eup %4748  ;;  %v2506_v38 = vmul.f32 %v4747_v41, %v4745_v40 }
 0x707   :  { %v2505_v30 = vmul.f32 %v4749_v18, %v5622_v55  ;;  %v4751_v54 = vpop.eup %4750  ;;  %v5737_v55 = vld [vmem:[#allocation16 + $0xc] ss:$16 sps:$4 sm:$0xff]  }
 0x708   :  { %3061 = vmatprep.subr.bf16.mxu1 %v5737_v55 }
 0x709   :  { %v5712_v53 = vadd.f32 %v2506_v38, %v2505_v30 }
 0x70b   :  { %4752 = vtanh.f32 %v5712_v53 }
 0x715   :  { %v4753_v32 = vpop.eup %4752 }
 0x716   :  { %v5715_v37 = vmul.f32 %v4753_v32, %v4751_v54 }
 0x718   :  { %v2549_v33 = vpack.c.bf16 %v5715_v37, %v5715_v37 }
 0x71a   :  { %2743 = vmatmul.mubr.bf16.vlgmr.msra.gmra.mrb[12].mxu0 %v2549_v33  ;;  %2784 = vmatmul.mubr.bf16.vlgmr.msra.gmra.mrb[20].mxu1 %v2549_v33 }
 0x71b   :  { %3021 = vmatpush1.bf16.msra.mxu0 %v5640_v57  ;;  %3052 = vmatprep.mubr.bf16.mxu0 %v5057_v0 }
 0x71c   :  { %3022 = vmatprep.subr.bf16.mxu0 %v5644_v17  ;;  %3093 = vmatprep.mubr.bf16.mxu1 %v5057_v0 }
 0x71d   :  { %3062 = vmatpush1.bf16.msra.mxu1 %v5739_v48 }
 0x71e   :  { %3063 = vmatprep.subr.bf16.mxu1 %v5743_v50 }
 0x71f   :  { %3023 = vmatpush1.bf16.msra.mxu0 %v5646_v19 }
 0x720   :  { %3024 = vmatprep.subr.bf16.mxu0 %v5650_v20 }
 0x721   :  { %3064 = vmatpush1.bf16.msra.mxu1 %v5745_v3 }
 0x722   :  { %3065 = vmatprep.subr.bf16.mxu1 %v5749_v1 }
 0x723   :  { %3025 = vmatpush1.bf16.msra.mxu0 %v5652_v21 }
 0x724   :  { %3026 = vmatprep.subr.bf16.mxu0 %v5656_v22 }
 0x725   :  { %3066 = vmatpush1.bf16.msra.mxu1 %v5751_v35 }
 0x726   :  { %3067 = vmatprep.subr.bf16.mxu1 %v5755_v4 }
 0x727   :  { %3027 = vmatpush1.bf16.msra.mxu0 %v5658_v23 }
 0x728   :  { %3028 = vmatprep.subr.bf16.mxu0 %v5662_v24 }
 0x729   :  { %3068 = vmatpush1.bf16.msra.mxu1 %v5757_v5 }
 0x72a   :  { %3069 = vmatprep.subr.bf16.mxu1 %v5664_v58 }
 0x72b   :  { %3029 = vmatpush1.bf16.msra.mxu0 %v5666_v29 }
 0x72c   :  { %3030 = vmatprep.subr.bf16.mxu0 %v5672_v59 }
 0x72d   :  { %3070 = vmatpush1.bf16.msra.mxu1 %v5668_v34 }
 0x72e   :  { %3071 = vmatprep.subr.bf16.mxu1 %v5680_v62 }
 0x72f   :  { %3031 = vmatpush1.bf16.msra.mxu0 %v5676_v60 }
 0x730   :  { %3032 = vmatprep.subr.bf16.mxu0 %v5683_v63 }
 0x731   :  { %3072 = vmatpush1.bf16.msra.mxu1 %v5678_v61 }
 0x732   :  { %3073 = vmatprep.subr.bf16.mxu1 %v5685_v2 }
 0x733   :  { %3033 = vmatpush1.bf16.msra.mxu0 %v5690_v42 }
 0x734   :  { %3034 = vmatprep.subr.bf16.mxu0 %v5696_v44 }
 0x735   :  { %3074 = vmatpush1.bf16.msra.mxu1 %v5692_v43 }
 0x736   :  { %3075 = vmatprep.subr.bf16.mxu1 %v5698_v46 }
 0x737   :  { %3035 = vmatpush1.bf16.msra.mxu0 %v5702_v51 }
 0x738   :  { %3330 = vmatprep.subr.bf16.mxu0 %v5638_v36 }
 0x739   :  { %3076 = vmatpush1.bf16.msra.mxu1 %v5704_v47 }
 0x73a   :  { %3371 = vmatprep.subr.bf16.mxu1 %v5737_v55 }
 0x7ed   :  { %v2744_v8 = vpop.f32.mrb[12].mxu0  ;;  %v2785_v9 = vpop.f32.mrb[20].mxu1 }
 0x7ee   :  { %v2792_v10 = vadd.f32 %v2744_v8, %v2513_v6  ;;  %v2746_v11 = vpop.f32.mrb[13].mxu0  ;;  %v2787_v12 = vpop.f32.mrb[21].mxu1  ;;  %v2794_v41 = vadd.f32 %v2785_v9, %v2515_v39 }
 0x7ef   :  { %v2793_v13 = vadd.f32 %v2746_v11, %v2514_v7  ;;  %v2748_v14 = vpop.f32.mrb[14].mxu0  ;;  %v2789_v15 = vpop.f32.mrb[22].mxu1  ;;  %v2795_v31 = vadd.f32 %v2787_v12, %v2516_v28 }
 0x7f0   :  { %v4215_v25 = vmul.f32 -1.442695, %v2792_v10  ;;  %v2749_v26 = vpop.f32.mrb[15].mxu0  ;;  %v2790_v16 = vpop.f32.mrb[23].mxu1  ;;  %v2824_v15 = vld [vmem:[#allocation3 + $0xa8] sm:$0xff] }
 0x7f1   :  { %v4216_v27 = vmul.f32 -1.442695, %v2793_v13  ;;  %v4217_v40 = vmul.f32 -1.442695, %v2795_v31 }
 0x7f2   :  { %4754 = vpow2.f32 %v4215_v25 }
 0x7f3   :  { %4756 = vpow2.f32 %v4216_v27 }
 0x7f4   :  { %4758 = vpow2.f32 %v4217_v40 }
 0x7f5   :  { %4760 = vtanh.f32 %v2794_v41 }
 0x7fc   :  { %v4755_v18 = vpop.eup %4754 }
 0x7fd   :  { %v4757_v38 = vpop.eup %4756  ;;  %v2799_v52 = vadd.f32 1.0, %v4755_v18 }
 0x7fe   :  { %v2805_v30 = vadd.f32 1.0, %v4757_v38  ;;  %v4759_v54 = vpop.eup %4758 }
 0x7ff   :  { %4762 = vrcp.f32 %v2799_v52  ;;  %v4761_v32 = vpop.eup %4760  ;;  %v2812_v8 = vadd.f32 1.0, %v4759_v54  ;;  %v2825_v54 = vld [vmem:[#allocation3 + $0xb0] sm:$0xff] }
 0x800   :  { %4764 = vrcp.f32 %v2805_v30  ;;  %v2826_v30 = vld [vmem:[#allocation3 + $0xb8] sm:$0xff] }
 0x801   :  { %4766 = vrcp.f32 %v2812_v8 }
 0x809   :  { %v4763_v33 = vpop.eup %4762 }
 0x80a   :  { %v4765_v6 = vpop.eup %4764  ;;  %v2816_v7 = vmul.f32 %v4763_v33, %v4761_v32 }
 0x80b   :  { %v2815_v10 = vmul.f32 %v4765_v6, %v5712_v53  ;;  %v4767_v9 = vpop.eup %4766  ;;  %v2823_v53 = vld [vmem:[#allocation3 + $0xa0] sm:$0xff] }
 0x80d   :  { %v5771_v11 = vadd.f32 %v2816_v7, %v2815_v10 }
 0x80f   :  { %4768 = vtanh.f32 %v5771_v11 }
 0x819   :  { %v4769_v12 = vpop.eup %4768 }
 0x81a   :  { %v5774_v13 = vmul.f32 %v4769_v12, %v4767_v9 }
 0x81c   :  { %v2859_v14 = vpack.c.bf16 %v5774_v13, %v5774_v13 }
 0x81e   :  { %3053 = vmatmul.mubr.bf16.vlgmr.msra.gmra.mrb[16].mxu0 %v2859_v14  ;;  %3094 = vmatmul.mubr.bf16.vlgmr.msra.gmra.mrb[24].mxu1 %v2859_v14 }
 0x81f   :  { %3331 = vmatpush1.bf16.msra.mxu0 %v5640_v57  ;;  %3372 = vmatpush1.bf16.msra.mxu1 %v5739_v48 }
 0x820   :  { %3332 = vmatprep.subr.bf16.mxu0 %v5644_v17  ;;  %3373 = vmatprep.subr.bf16.mxu1 %v5743_v50 }
 0x821   :  { %3362 = vmatprep.mubr.bf16.mxu0 %v5057_v0  ;;  %3403 = vmatprep.mubr.bf16.mxu1 %v5057_v0 }
 0x823   :  { %3333 = vmatpush1.bf16.msra.mxu0 %v5646_v19  ;;  %3374 = vmatpush1.bf16.msra.mxu1 %v5745_v3 }
 0x824   :  { %3334 = vmatprep.subr.bf16.mxu0 %v5650_v20  ;;  %3375 = vmatprep.subr.bf16.mxu1 %v5749_v1 }
 0x827   :  { %3335 = vmatpush1.bf16.msra.mxu0 %v5652_v21  ;;  %3376 = vmatpush1.bf16.msra.mxu1 %v5751_v35 }
 0x828   :  { %3336 = vmatprep.subr.bf16.mxu0 %v5656_v22  ;;  %3377 = vmatprep.subr.bf16.mxu1 %v5755_v4 }
 0x82b   :  { %3337 = vmatpush1.bf16.msra.mxu0 %v5658_v23  ;;  %3378 = vmatpush1.bf16.msra.mxu1 %v5757_v5 }
 0x82c   :  { %3338 = vmatprep.subr.bf16.mxu0 %v5662_v24  ;;  %3379 = vmatprep.subr.bf16.mxu1 %v5664_v58 }
 0x82f   :  { %3339 = vmatpush1.bf16.msra.mxu0 %v5666_v29  ;;  %3380 = vmatpush1.bf16.msra.mxu1 %v5668_v34 }
 0x830   :  { %3340 = vmatprep.subr.bf16.mxu0 %v5672_v59  ;;  %3381 = vmatprep.subr.bf16.mxu1 %v5680_v62 }
 0x833   :  { %3341 = vmatpush1.bf16.msra.mxu0 %v5676_v60  ;;  %3382 = vmatpush1.bf16.msra.mxu1 %v5678_v61 }
 0x834   :  { %3342 = vmatprep.subr.bf16.mxu0 %v5683_v63  ;;  %3383 = vmatprep.subr.bf16.mxu1 %v5685_v2 }
 0x837   :  { %3343 = vmatpush1.bf16.msra.mxu0 %v5690_v42  ;;  %3384 = vmatpush1.bf16.msra.mxu1 %v5692_v43 }
 0x838   :  { %3344 = vmatprep.subr.bf16.mxu0 %v5696_v44  ;;  %3385 = vmatprep.subr.bf16.mxu1 %v5698_v46 }
 0x83b   :  { %3345 = vmatpush1.bf16.msra.mxu0 %v5702_v51  ;;  %3386 = vmatpush1.bf16.msra.mxu1 %v5704_v47 }
 0x83c   :  { %3640 = vmatprep.subr.bf16.mxu0 %v5638_v36  ;;  %3681 = vmatprep.subr.bf16.mxu1 %v5737_v55 }
 0x8f1   :  { %v3054_v25 = vpop.f32.mrb[16].mxu0  ;;  %v3095_v26 = vpop.f32.mrb[24].mxu1 }
 0x8f2   :  { %v3102_v16 = vadd.f32 %v3054_v25, %v2823_v53  ;;  %v3056_v27 = vpop.f32.mrb[17].mxu0  ;;  %v3097_v28 = vpop.f32.mrb[25].mxu1  ;;  %v3104_v32 = vadd.f32 %v3095_v26, %v2825_v54  ;;  %v4686_v54 = vld [vmem:[#allocation18 + $0x20] sm:$0xff]  }
 0x8f3   :  { %v3103_v31 = vadd.f32 %v3056_v27, %v2824_v15  ;;  %v3058_v39 = vpop.f32.mrb[18].mxu0  ;;  %v3099_v40 = vpop.f32.mrb[26].mxu1  ;;  %v3105_v36 = vadd.f32 %v3097_v28, %v2826_v30  ;;  %v4684_v30 = vld [vmem:[#allocation18 + $0x10] sm:$0xff]  }
 0x8f4   :  { %v4250_v41 = vmul.f32 -1.442695, %v3102_v16  ;;  %v3059_v18 = vpop.f32.mrb[19].mxu0  ;;  %v3100_v38 = vpop.f32.mrb[27].mxu1 }
 0x8f5   :  { %v4251_v52 = vmul.f32 -1.442695, %v3103_v31  ;;  %v4252_v55 = vmul.f32 -1.442695, %v3105_v36  ;;  %v4683_v38 = vld [vmem:[#allocation18 + $0x8] sm:$0xff]   ;;  %v4685_v36 = vld [vmem:[#allocation18 + $0x18] sm:$0xff]  }
 0x8f6   :  { %4770 = vpow2.f32 %v4250_v41 }
 0x8f7   :  { %4772 = vpow2.f32 %v4251_v52  ;;  %v3760_v52 = vpack.c.bf16 %v5584_v49, %v5542_v45  ;;  %v4689_v45 = vld [vmem:[#allocation18 + $0x38] sm:$0xff]   ;;  %v3761_v49 = vpack.c.bf16 %v5715_v37, %v5625_v56 }
 0x8f8   :  { %4774 = vpow2.f32 %v4252_v55  ;;  %v4687_v55 = vld [vmem:[#allocation18 + $0x28] sm:$0xff]   ;;  %v3446_v56 = vld [vmem:[#allocation3 + $0xf8] sm:$0xff] }
 0x8f9   :  { %4776 = vtanh.f32 %v3104_v32  ;;  %v4688_v32 = vld [vmem:[#allocation18 + $0x30] sm:$0xff]  }
 0x900   :  { %v4771_v33 = vpop.eup %4770 }
 0x901   :  { %v4773_v6 = vpop.eup %4772  ;;  %v3109_v7 = vadd.f32 1.0, %v4771_v33 }
 0x902   :  { %v3115_v8 = vadd.f32 1.0, %v4773_v6  ;;  %v4775_v10 = vpop.eup %4774  ;;  %v3443_v6 = vld [vmem:[#allocation3 + $0xe0] sm:$0xff] }
 0x903   :  { %4778 = vrcp.f32 %v3109_v7  ;;  %v4777_v9 = vpop.eup %4776  ;;  %v3122_v15 = vadd.f32 1.0, %v4775_v10  ;;  %v3444_v7 = vld [vmem:[#allocation3 + $0xe8] sm:$0xff] }
 0x904   :  { %4780 = vrcp.f32 %v3115_v8 }
 0x905   :  { %4782 = vrcp.f32 %v3122_v15 }
 0x90d   :  { %v4779_v12 = vpop.eup %4778 }
 0x90e   :  { %v4781_v14 = vpop.eup %4780  ;;  %v3126_v53 = vmul.f32 %v4779_v12, %v4777_v9 }
 0x90f   :  { %v3125_v25 = vmul.f32 %v4781_v14, %v5771_v11  ;;  %v4783_v26 = vpop.eup %4782 }
 0x911   :  { %v5813_v16 = vadd.f32 %v3126_v53, %v3125_v25 }
 0x913   :  { %4784 = vtanh.f32 %v5813_v16 }
 0x91d   :  { %v4785_v27 = vpop.eup %4784 }
 0x91e   :  { %v5816_v28 = vmul.f32 %v4785_v27, %v4783_v26 }
 0x920   :  { %v3169_v31 = vpack.c.bf16 %v5816_v28, %v5816_v28  ;;  %v3762_v33 = vpack.c.bf16 %v5816_v28, %v5774_v13  ;;  %v3445_v13 = vld [vmem:[#allocation3 + $0xf0] sm:$0xff] }
 0x922   :  { %3363 = vmatmul.mubr.bf16.vlgmr.msra.gmra.mrb[20].mxu0 %v3169_v31  ;;  %3404 = vmatmul.mubr.bf16.vlgmr.msra.gmra.mrb[28].mxu1 %v3169_v31 }
 0x923   :  { %3641 = vmatpush1.bf16.msra.mxu0 %v5640_v57  ;;  %3682 = vmatpush1.bf16.msra.mxu1 %v5739_v48  ;;  %v3133_v57 = vld [vmem:[#allocation3 + $0xc0] sm:$0xff] }
 0x924   :  { %3642 = vmatprep.subr.bf16.mxu0 %v5644_v17  ;;  %3683 = vmatprep.subr.bf16.mxu1 %v5743_v50  ;;  %v3134_v17 = vld [vmem:[#allocation3 + $0xc8] sm:$0xff] }
 0x925   :  { %3672 = vmatprep.mubr.bf16.mxu0 %v5057_v0  ;;  %3713 = vmatprep.mubr.bf16.mxu1 %v5057_v0  ;;  %v4682_v0 = vld [vmem:[#allocation18] sm:$0xff]  }
 0x927   :  { %3643 = vmatpush1.bf16.msra.mxu0 %v5646_v19  ;;  %3684 = vmatpush1.bf16.msra.mxu1 %v5745_v3 }
 0x928   :  { %3644 = vmatprep.subr.bf16.mxu0 %v5650_v20  ;;  %3685 = vmatprep.subr.bf16.mxu1 %v5749_v1 }
 0x92b   :  { %3645 = vmatpush1.bf16.msra.mxu0 %v5652_v21  ;;  %3686 = vmatpush1.bf16.msra.mxu1 %v5751_v35 }
 0x92c   :  { %3646 = vmatprep.subr.bf16.mxu0 %v5656_v22  ;;  %3687 = vmatprep.subr.bf16.mxu1 %v5755_v4 }
 0x92f   :  { %3647 = vmatpush1.bf16.msra.mxu0 %v5658_v23  ;;  %3688 = vmatpush1.bf16.msra.mxu1 %v5757_v5 }
 0x930   :  { %3648 = vmatprep.subr.bf16.mxu0 %v5662_v24  ;;  %3689 = vmatprep.subr.bf16.mxu1 %v5664_v58 }
 0x933   :  { %3649 = vmatpush1.bf16.msra.mxu0 %v5666_v29  ;;  %3690 = vmatpush1.bf16.msra.mxu1 %v5668_v34 }
 0x934   :  { %3650 = vmatprep.subr.bf16.mxu0 %v5672_v59  ;;  %3691 = vmatprep.subr.bf16.mxu1 %v5680_v62  ;;  %v3136_v62 = vld [vmem:[#allocation3 + $0xd8] sm:$0xff] }
 0x937   :  { %3651 = vmatpush1.bf16.msra.mxu0 %v5676_v60  ;;  %3692 = vmatpush1.bf16.msra.mxu1 %v5678_v61 }
 0x938   :  { %3652 = vmatprep.subr.bf16.mxu0 %v5683_v63  ;;  %3693 = vmatprep.subr.bf16.mxu1 %v5685_v2  ;;  %v3135_v2 = vld [vmem:[#allocation3 + $0xd0] sm:$0xff] }
 0x93b   :  { %3653 = vmatpush1.bf16.msra.mxu0 %v5690_v42  ;;  %3694 = vmatpush1.bf16.msra.mxu1 %v5692_v43 }
 0x93c   :  { %3654 = vmatprep.subr.bf16.mxu0 %v5696_v44  ;;  %3695 = vmatprep.subr.bf16.mxu1 %v5698_v46 }
 0x93f   :  { %3655 = vmatpush1.bf16.msra.mxu0 %v5702_v51  ;;  %3696 = vmatpush1.bf16.msra.mxu1 %v5704_v47 }
 0x940   :  { %4345 = vmatprep.subr.bf16.mxu0 %v4682_v0 }
 0x9f5   :  { %v3364_v19 = vpop.f32.mrb[20].mxu0  ;;  %v3405_v20 = vpop.f32.mrb[28].mxu1 }
 0x9f6   :  { %v3412_v21 = vadd.f32 %v3364_v19, %v3133_v57  ;;  %v3366_v22 = vpop.f32.mrb[21].mxu0  ;;  %v3407_v23 = vpop.f32.mrb[29].mxu1  ;;  %v3414_v43 = vadd.f32 %v3405_v20, %v3135_v2 }
 0x9f7   :  { %v3413_v24 = vadd.f32 %v3366_v22, %v3134_v17  ;;  %v3368_v58 = vpop.f32.mrb[22].mxu0  ;;  %v3409_v29 = vpop.f32.mrb[30].mxu1  ;;  %v3415_v63 = vadd.f32 %v3407_v23, %v3136_v62 }
 0x9f8   :  { %v4285_v34 = vmul.f32 -1.442695, %v3412_v21  ;;  %v3369_v59 = vpop.f32.mrb[23].mxu0  ;;  %v3410_v60 = vpop.f32.mrb[31].mxu1 }
 0x9f9   :  { %v4286_v61 = vmul.f32 -1.442695, %v3413_v24  ;;  %v4287_v42 = vmul.f32 -1.442695, %v3415_v63  ;;  %v4323_v59 = vld [vmem:[%s5897_s11] ss:$0 sm:$0xff] }
 0x9fa   :  { %4786 = vpow2.f32 %v4285_v34  ;;  %s5059_s11 = smov [#allocation19]  }
 0x9fb   :  { %4788 = vpow2.f32 %v4286_v61  ;;  %s3913_s15 = sshll.u32 %s5059_s11, 4  ;;  %s3914_s15 = int_to_ptr.vmem [resolvable:$true] %s3913_s15 }
 0x9fc   :  { %4790 = vpow2.f32 %v4287_v42  ;;  %s4972_s16 = scalar_lea.vmem %s3914_s15, 1024  ;;  %p4977_p3 = scmp.lt.s32.totalorder %s3914_s15, %s3914_s15 }
 0x9fd   :  { %4792 = vtanh.f32 %v3414_v43  ;;  %p4973_p2 = scmp.ne.s32.totalorder %s3914_s15, %s4972_s16  ;;  %p4978_p4 = scmp.lt.s32.totalorder %s4972_s16, %s4972_s16 }
 0x9ff   :  { %p4979_p5 = por %p4978_p4, %p4977_p3 }
 0xa01   :  { %p4980_p6 = pnand %p4979_p5, %p4973_p2 }
 0xa04   :  { %v4787_v44 = vpop.eup %4786 }
 0xa05   :  { %v4789_v46 = vpop.eup %4788  ;;  %v3419_v51 = vadd.f32 1.0, %v4787_v44 }
 0xa06   :  { %v3425_v47 = vadd.f32 1.0, %v4789_v46  ;;  %v4791_v48 = vpop.eup %4790 }
 0xa07   :  { %4794 = vrcp.f32 %v3419_v51  ;;  %v4793_v50 = vpop.eup %4792  ;;  %v3432_v4 = vadd.f32 1.0, %v4791_v48 }
 0xa08   :  { %4796 = vrcp.f32 %v3425_v47 }
 0xa09   :  { %4798 = vrcp.f32 %v3432_v4 }
 0xa11   :  { %v4795_v3 = vpop.eup %4794 }
 0xa12   :  { %v4797_v1 = vpop.eup %4796  ;;  %v3436_v35 = vmul.f32 %v4795_v3, %v4793_v50 }
 0xa13   :  { %v3435_v5 = vmul.f32 %v4797_v1, %v5813_v16  ;;  %v4799_v39 = vpop.eup %4798 }
 0xa15   :  { %v5853_v11 = vadd.f32 %v3436_v35, %v3435_v5 }
 0xa17   :  { %4800 = vtanh.f32 %v5853_v11 }
 0xa21   :  { %v4801_v40 = vpop.eup %4800 }
 0xa22   :  { %v5856_v41 = vmul.f32 %v4801_v40, %v4799_v39 }
 0xa24   :  { %v3479_v18 = vpack.c.bf16 %v5856_v41, %v5856_v41 }
 0xa26   :  { %3673 = vmatmul.mubr.bf16.vlgmr.msra.gmra.mrb[24].mxu0 %v3479_v18  ;;  %3714 = vmatmul.mubr.bf16.vlgmr.msra.gmra.mrb[32].mxu1 %v3479_v18 }
 0xa27   :  { %4346 = vmatpush3.bf16.msra.mxu0 %v4682_v0  ;;  %4361 = vmatprep.mubr.bf16.mxu0 %v3760_v52 }
 0xa28   :  { %4347 = vmatprep.subr.bf16.mxu0 %v4683_v38 }
 0xa2b   :  { %4348 = vmatpush3.bf16.msra.mxu0 %v4683_v38 }
 0xa2c   :  { %4349 = vmatprep.subr.bf16.mxu0 %v4684_v30 }
 0xa2f   :  { %4350 = vmatpush3.bf16.msra.mxu0 %v4684_v30 }
 0xa30   :  { %4351 = vmatprep.subr.bf16.mxu0 %v4685_v36 }
 0xa33   :  { %4352 = vmatpush3.bf16.msra.mxu0 %v4685_v36 }
 0xa34   :  { %4353 = vmatprep.subr.bf16.mxu0 %v4686_v54 }
 0xa37   :  { %4354 = vmatpush3.bf16.msra.mxu0 %v4686_v54 }
 0xa38   :  { %4355 = vmatprep.subr.bf16.mxu0 %v4687_v55 }
 0xa3b   :  { %4356 = vmatpush3.bf16.msra.mxu0 %v4687_v55 }
 0xa3c   :  { %4357 = vmatprep.subr.bf16.mxu0 %v4688_v32 }
 0xa3f   :  { %4358 = vmatpush3.bf16.msra.mxu0 %v4688_v32 }
 0xa40   :  { %4359 = vmatprep.subr.bf16.mxu0 %v4689_v45 }
 0xa43   :  { %4360 = vmatpush3.bf16.msra.mxu0 %v4689_v45 }
 0xa46   :  { %4362 = vmatmul.mubr.bf16.vlgmr.msra.gmra.mrb[28].mxu0 %v3761_v49 }
 0xa47   :  { %4365 = vmatprep.mubr.bf16.mxu0 %v3762_v33 }
 0xaf9   :  { %v3674_v8 = vpop.f32.mrb[24].mxu0  ;;  %v3715_v10 = vpop.f32.mrb[32].mxu1 }
 0xafa   :  { %v3722_v9 = vadd.f32 %v3674_v8, %v3443_v6  ;;  %v3676_v12 = vpop.f32.mrb[25].mxu0  ;;  %v3717_v14 = vpop.f32.mrb[33].mxu1  ;;  %v3724_v0 = vadd.f32 %v3715_v10, %v3445_v13 }
 0xafb   :  { %v3723_v53 = vadd.f32 %v3676_v12, %v3444_v7  ;;  %v3678_v15 = vpop.f32.mrb[26].mxu0  ;;  %v3719_v25 = vpop.f32.mrb[34].mxu1  ;;  %v3725_v37 = vadd.f32 %v3717_v14, %v3446_v56 }
 0xafc   :  { %v4320_v16 = vmul.f32 -1.442695, %v3722_v9  ;;  %v3679_v26 = vpop.f32.mrb[27].mxu0  ;;  %v3720_v27 = vpop.f32.mrb[35].mxu1 }
 0xafd   :  { %v4321_v31 = vmul.f32 -1.442695, %v3723_v53  ;;  %v4322_v28 = vmul.f32 -1.442695, %v3725_v37 }
 0xafe   :  { %4802 = vpow2.f32 %v4320_v16 }
 0xaff   :  { %4804 = vpow2.f32 %v4321_v31 }
 0xb00   :  { %4806 = vpow2.f32 %v4322_v28 }
 0xb01   :  { %4808 = vtanh.f32 %v3724_v0 }
 0xb08   :  { %v4803_v57 = vpop.eup %4802 }
 0xb09   :  { %v4805_v17 = vpop.eup %4804  ;;  %v3729_v19 = vadd.f32 1.0, %v4803_v57 }
 0xb0a   :  { %v3735_v20 = vadd.f32 1.0, %v4805_v17  ;;  %v4807_v21 = vpop.eup %4806 }
 0xb0b   :  { %4810 = vrcp.f32 %v3729_v19  ;;  %v4809_v22 = vpop.eup %4808  ;;  %v3742_v29 = vadd.f32 1.0, %v4807_v21 }
 0xb0c   :  { %4812 = vrcp.f32 %v3735_v20 }
 0xb0d   :  { %4814 = vrcp.f32 %v3742_v29 }
 0xb15   :  { %v4811_v23 = vpop.eup %4810 }
 0xb16   :  { %v4813_v24 = vpop.eup %4812  ;;  %v3746_v58 = vmul.f32 %v4811_v23, %v4809_v22 }
 0xb17   :  { %v3745_v34 = vmul.f32 %v4813_v24, %v5853_v11  ;;  %v4815_v51 = vpop.eup %4814 }
 0xb19   :  { %v4363_v60 = vpop.f32.mrb[28].mxu0  ;;  %v3747_v61 = vadd.f32 %v3746_v58, %v3745_v34 }
 0xb1a   :  { %v3878_v62 = vadd.f32 %v4363_v60, %v4323_v59  ;;  %v3869_v63 = vpop.f32.mrb[29].mxu0 }
 0xb1b   :  { %v3870_v2 = vadd.f32 %v4323_v59, %v3869_v63  ;;  %v4364_v42 = vpop.f32.mrb[30].mxu0  ;;  %4816 = vtanh.f32 %v3747_v61 }
 0xb1c   :  { %3902 = vst [vmem:[#allocation19 + $0x10] sm:$0xff] %v3878_v62  ;;  %v3881_v43 = vadd.f32 %v4364_v42, %v4323_v59  ;;  %v3872_v44 = vpop.f32.mrb[31].mxu0 }
 0xb1d   :  { %3900 = vst [vmem:[#allocation19] sm:$0xff] %v3870_v2  ;;  %v3873_v46 = vadd.f32 %v4323_v59, %v3872_v44 }
 0xb1e   :  { %3903 = vst [vmem:[#allocation19 + $0x18] sm:$0xff] %v3881_v43 }
 0xb1f   :  { %3901 = vst [vmem:[#allocation19 + $0x8] sm:$0xff] %v3873_v46 }
 0xb25   :  { %v4817_v47 = vpop.eup %4816 }
 0xb26   :  { %v3749_v48 = vmul.f32 %v4817_v47, %v4815_v51 }
 0xb28   :  { %v3763_v50 = vpack.c.bf16 %v3749_v48, %v5856_v41 }
 0xb2a   :  { %4366 = vmatmul.mubr.bf16.gmra.mrb[32].mxu0 %v3763_v50 }
 0xbfd   :  { %v4367_v3 = vpop.f32.mrb[32].mxu0 }
 0xbfe   :  { %v3894_v1 = vadd.f32 %v4367_v3, %v4323_v59  ;;  %v3885_v35 = vpop.f32.mrb[33].mxu0 }
 0xbff   :  { %v3886_v4 = vadd.f32 %v4323_v59, %v3885_v35  ;;  %v4368_v5 = vpop.f32.mrb[34].mxu0 }
 0xc00   :  { %3906 = vst [vmem:[#allocation19 + $0x30] sm:$0xff] %v3894_v1  ;;  %v3897_v11 = vadd.f32 %v4368_v5, %v4323_v59  ;;  %v3888_v39 = vpop.f32.mrb[35].mxu0 }
 0xc01   :  { %3904 = vst [vmem:[#allocation19 + $0x20] sm:$0xff] %v3886_v4  ;;  %v3889_v40 = vadd.f32 %v4323_v59, %v3888_v39 }
 0xc02   :  { %3907 = vst [vmem:[#allocation19 + $0x38] sm:$0xff] %v3897_v11 }
 0xc03   :  { %3905 = vst [vmem:[#allocation19 + $0x28] sm:$0xff] %v3889_v40 }
 0xc04   :  { %4983 = shalt.err (!%p4980_p6)
}
 0xc05   :  { %s4984_s28 = scalar_lea.hbm %s5898_s12, 1024 }
 0xc06   :  { %p4985_p7 = scmp.ne.s32.totalorder %s5898_s12, %s4984_s28  ;;  %p4988_p8 = scmp.lt.u32.totalorder %s4984_s28, %s5898_s12 }
 0xc08   :  { %p4990_p9 = pnand %p4988_p8, %p4985_p7 }
 0xc0a   :  { %4993 = shalt.err (!%p4990_p9)
}
 0xc0b   :  { %3919 = dma.vmem_to_hbm [thread:$0]  %s3914_s15, 1024, %s5898_s12, [#allocation9], %s5045_s13, %s5045_s13, %s5046_s14  }
 0xc0c   :  { %5022 = dma.done.wait [#allocation9], 1024  }
 0xc0d   :  { %5023 = vsyncadd [#allocation9], 4294966272 }
 0xc0e   :  { %3923 = vsyncpa [#allocation8], 1 }
 0xc0f   :  { %3924 = vsyncpa [#allocation11], 1 }
 0xc10   :  { %3925 = vsyncpa [#allocation14], 1 }
 0xc11   :  { %3926 = vsyncpa [#allocation17], 1 }
 0xc12   :  { %3927 = vsyncpa [#allocation9], 1 }

</bundles_post_ra>
